<compile_context>
chip_gen: v7x
topology: tpu7x:2x2x1
jax: 0.10.0
libtpu: 0.0.40
codegen_flags: <defaults>
</compile_context>

<pallas_src>
import functools

import jax
import jax.numpy as jnp
from jax import lax
from jax.experimental import pallas as pl
from jax.experimental.pallas import tpu as pltpu


# ------------------------------ helpers -------------------------------------

def _round_up(x, m):
    return (x + m - 1) // m * m


def _pick_row_tile(H, W, target_rows=1024):
    """Largest divisor TH of H with TH*W <= target_rows (falls back to 1)."""
    best = 1
    for th in range(1, H + 1):
        if H % th == 0 and th * W <= target_rows:
            best = th
    return best


def _pad_channels_vec(v, cp):
    return jnp.pad(v, (0, cp - v.shape[0])).reshape(1, cp)


def _pad_weight(w_hwio, cp):
    kh, kw, ci, co = w_hwio.shape
    w = w_hwio.reshape(kh * kw, ci, co)
    return jnp.pad(w, ((0, 0), (0, cp - ci), (0, cp - co)))   # (9, cp, cp)


# ----------------------------- Pallas kernels -------------------------------

def _conv3x3_kernel(scale_ref, shift_ref, w_ref, b_ref, x_hbm,
                    y_ref, stats_ref, xbuf, sem, *, TH, H, W, pre_act):
    """Fused: [optional BN-apply+ReLU of previous layer] -> 3x3 conv + bias
    (9 shifted-window GEMMs) -> per-tile BN statistics epilogue."""
    n = pl.program_id(0)
    r = pl.program_id(1)
    cp = xbuf.shape[-1]

    # Fetch the halo'd row tile (TH + 2 padded rows) of image n into VMEM.
    copy = pltpu.make_async_copy(x_hbm.at[n, pl.ds(r * TH, TH + 2)], xbuf, sem)
    copy.start()
    copy.wait()

    if pre_act:
        # Fused BN-apply + ReLU of the previous layer on the loaded tile.
        # Re-zero the spatial padding so the conv still sees zeros there.
        x = xbuf[...]                                          # (TH+2, W+2, cp)
        xa = jnp.maximum(x * scale_ref[...] + shift_ref[...], 0.0)
        row = r * TH + lax.broadcasted_iota(jnp.int32, (TH + 2, W + 2, 1), 0)
        col = lax.broadcasted_iota(jnp.int32, (TH + 2, W + 2, 1), 1)
        interior = ((row >= 1) & (row <= H) & (col >= 1) & (col <= W))
        xbuf[...] = xa * interior.astype(jnp.float32)

    # 3x3 conv as 9 shifted-window GEMMs accumulated in f32 (no im2col in HBM).
    acc = jnp.zeros((TH * W, cp), jnp.float32)
    for dy in range(3):
        for dx in range(3):
            tap = xbuf[dy:dy + TH, dx:dx + W, :].reshape(TH * W, cp)
            acc = acc + jnp.dot(tap, w_ref[dy * 3 + dx],
                                preferred_element_type=jnp.float32)
    acc = acc + b_ref[...]

    y_ref[...] = acc.reshape(TH, W, cp)

    # Per-tile partial BatchNorm statistics (sum, sum of squares).
    s1 = jnp.sum(acc, axis=0, keepdims=True)
    s2 = jnp.sum(acc * acc, axis=0, keepdims=True)
    stats_ref[...] = jnp.concatenate([s1, s2], axis=0)


def _bn_apply_relu_kernel(y_ref, scale_ref, shift_ref, o_ref):
    o_ref[...] = jnp.maximum(y_ref[...] * scale_ref[...] + shift_ref[...], 0.0)


# ------------------------------ wrappers -------------------------------------

def conv3x3_bn_stats(x_pad, w9, bias, pre_scale, pre_shift, *, H, W, TH, pre_act):
    """x_pad: (N, H+2, W+2, Cp) f32 (spatial + channel padded, NHWC).
    Returns (y, stats): y (N, H, W, Cp) pre-BN conv output; stats (N, R, 2, Cp)
    per-tile partial [sum, sum_of_squares] for this layer's BatchNorm."""
    N = x_pad.shape[0]
    Cp = x_pad.shape[-1]
    R = H // TH

    flops = 2 * N * H * W * 9 * Cp * Cp
    bytes_acc = 4 * (x_pad.size + N * H * W * Cp + w9.size)

    kern = functools.partial(_conv3x3_kernel, TH=TH, H=H, W=W, pre_act=pre_act)
    return pl.pallas_call(
        kern,
        out_shape=(jax.ShapeDtypeStruct((N, H, W, Cp), jnp.float32),
                   jax.ShapeDtypeStruct((N, R, 2, Cp), jnp.float32)),
        grid_spec=pltpu.PrefetchScalarGridSpec(
            num_scalar_prefetch=0,
            grid=(N, R),
            in_specs=[
                pl.BlockSpec((1, Cp), lambda n, r: (0, 0)),          # pre-BN scale
                pl.BlockSpec((1, Cp), lambda n, r: (0, 0)),          # pre-BN shift
                pl.BlockSpec((9, Cp, Cp), lambda n, r: (0, 0, 0)),   # weights (resident)
                pl.BlockSpec((1, Cp), lambda n, r: (0, 0)),          # bias
                pl.BlockSpec(memory_space=pl.ANY),                   # padded input in HBM
            ],
            out_specs=[
                pl.BlockSpec((None, TH, W, Cp), lambda n, r: (n, r, 0, 0)),
                pl.BlockSpec((None, None, 2, Cp), lambda n, r: (n, r, 0, 0)),
            ],
            scratch_shapes=[
                pltpu.VMEM((TH + 2, W + 2, Cp), jnp.float32),        # halo'd input tile
                pltpu.SemaphoreType.DMA,
            ],
        ),
        compiler_params=pltpu.CompilerParams(
            dimension_semantics=("parallel", "parallel")),
        cost_estimate=pl.CostEstimate(flops=flops, transcendentals=0,
                                      bytes_accessed=bytes_acc),
    )(pre_scale, pre_shift, w9, bias, x_pad)


def bn_apply_relu(y, scale, shift, *, TH):
    """Tiled, lane-dense per-channel affine + ReLU: y (N, H, W, Cp)."""
    N, H, W, Cp = y.shape
    R = H // TH
    return pl.pallas_call(
        _bn_apply_relu_kernel,
        out_shape=jax.ShapeDtypeStruct((N, H, W, Cp), jnp.float32),
        grid_spec=pltpu.PrefetchScalarGridSpec(
            num_scalar_prefetch=0,
            grid=(N, R),
            in_specs=[
                pl.BlockSpec((None, TH, W, Cp), lambda n, r: (n, r, 0, 0)),
                pl.BlockSpec((1, Cp), lambda n, r: (0, 0)),
                pl.BlockSpec((1, Cp), lambda n, r: (0, 0)),
            ],
            out_specs=pl.BlockSpec((None, TH, W, Cp), lambda n, r: (n, r, 0, 0)),
        ),
        compiler_params=pltpu.CompilerParams(
            dimension_semantics=("parallel", "parallel")),
    )(y, scale, shift)


def _bn_affine(stats, count, gamma_p, beta_p, eps):
    """Reduce per-tile partials -> per-channel (scale, shift) for y*scale+shift."""
    s = jnp.sum(stats, axis=(0, 1))                          # (2, Cp)
    mean = s[0:1] / count                                    # (1, Cp)
    var = jnp.maximum(s[1:2] / count - mean * mean, 0.0)     # biased variance
    scale = gamma_p * lax.rsqrt(var + eps)
    shift = beta_p - mean * scale
    return scale, shift


# ------------------------------- forward -------------------------------------

def conv_block_forward(x_nchw, params, *, eps=1e-5):
    """Pallas implementation of ConvBlock.forward. Input/output are NCHW."""
    N, Cin, H, W = x_nchw.shape
    Cout = params["b1"].shape[0]
    Cp = _round_up(max(Cin, Cout, 1), 128)     # lane-dense channel padding
    TH = _pick_row_tile(H, W)

    w1 = _pad_weight(params["w1"], Cp)
    w2 = _pad_weight(params["w2"], Cp)
    b1 = _pad_channels_vec(params["b1"], Cp)
    b2 = _pad_channels_vec(params["b2"], Cp)
    g1 = _pad_channels_vec(params["g1"], Cp)
    g2 = _pad_channels_vec(params["g2"], Cp)
    be1 = _pad_channels_vec(params["be1"], Cp)
    be2 = _pad_channels_vec(params["be2"], Cp)

    x = jnp.transpose(x_nchw, (0, 2, 3, 1))                         # NCHW -> NHWC
    x_pad = jnp.pad(x, ((0, 0), (1, 1), (1, 1), (0, Cp - Cin)))     # spatial+channel pad

    ones = jnp.ones((1, Cp), jnp.float32)
    zeros = jnp.zeros((1, Cp), jnp.float32)
    count = float(N * H * W)

    # conv1 + bias, with fused BN1-statistics epilogue.
    y1, st1 = conv3x3_bn_stats(x_pad, w1, b1, ones, zeros,
                               H=H, W=W, TH=TH, pre_act=False)
    scale1, shift1 = _bn_affine(st1, count, g1, be1, eps)

    # conv2 + bias: BN1-apply + ReLU fused into the conv2 input path.
    y1_pad = jnp.pad(y1, ((0, 0), (1, 1), (1, 1), (0, 0)))
    y2, st2 = conv3x3_bn_stats(y1_pad, w2, b2, scale1, shift1,
                               H=H, W=W, TH=TH, pre_act=True)
    scale2, shift2 = _bn_affine(st2, count, g2, be2, eps)

    # Final BN2-apply + ReLU (tiled elementwise, lane-dense stores).
    out = bn_apply_relu(y2, scale2, shift2, TH=TH)

    out = out[..., :Cout]                                           # drop padded channels
    return jnp.transpose(out, (0, 3, 1, 2))                         # NHWC -> NCHW


# --------------------------- reference (pure JAX) ----------------------------

def _ref_conv(x_nchw, w_hwio, b):
    w_oihw = jnp.transpose(w_hwio, (3, 2, 0, 1))
    y = lax.conv_general_dilated(
        x_nchw, w_oihw, window_strides=(1, 1), padding="SAME",
        dimension_numbers=("NCHW", "OIHW", "NCHW"))
    return y + b[None, :, None, None]


def _ref_bn_relu(y_nchw, gamma, beta, eps=1e-5):
    mean = jnp.mean(y_nchw, axis=(0, 2, 3), keepdims=True)
    var = jnp.mean((y_nchw - mean) ** 2, axis=(0, 2, 3), keepdims=True)
    yn = (y_nchw - mean) * lax.rsqrt(var + eps)
    yn = yn * gamma[None, :, None, None] + beta[None, :, None, None]
    return jnp.maximum(yn, 0.0)


def conv_block_reference(x_nchw, params, eps=1e-5):
    y = _ref_bn_relu(_ref_conv(x_nchw, params["w1"], params["b1"]),
                     params["g1"], params["be1"], eps)
    y = _ref_bn_relu(_ref_conv(y, params["w2"], params["b2"]),
                     params["g2"], params["be2"], eps)
    return y


# --------------------------------- main --------------------------------------

if __name__ == "__main__":
    in_channels, out_channels = 4, 8
    N, H, W = 2, 16, 16

    key = jax.random.PRNGKey(0)
    k_x, k_w1, k_b1, k_w2, k_b2 = jax.random.split(key, 5)

    # Conv kernels in HWIO (equivalent to torch's (Cout,Cin,3,3) transposed).
    # BN params use PyTorch defaults for a freshly constructed module: gamma=1, beta=0.
    w1_hwio = 0.1 * jax.random.normal(k_w1, (3, 3, in_channels, out_channels), jnp.float32)
    b1 = 0.1 * jax.random.normal(k_b1, (out_channels,), jnp.float32)
    w2_hwio = 0.1 * jax.random.normal(k_w2, (3, 3, out_channels, out_channels), jnp.float32)
    b2 = 0.1 * jax.random.normal(k_b2, (out_channels,), jnp.float32)

    params = {
        "w1": w1_hwio, "b1": b1,
        "g1": jnp.ones((out_channels,), jnp.float32),
        "be1": jnp.zeros((out_channels,), jnp.float32),
        "w2": w2_hwio, "b2": b2,
        "g2": jnp.ones((out_channels,), jnp.float32),
        "be2": jnp.zeros((out_channels,), jnp.float32),
    }

    x = jax.random.normal(k_x, (N, in_channels, H, W), jnp.float32)  # NCHW input

    out = jax.jit(conv_block_forward)(x, params)
    out = jax.block_until_ready(out)

    ref = conv_block_reference(x, params)
    assert out.shape == (N, out_channels, H, W)
    max_err = float(jnp.max(jnp.abs(out - ref)))
    assert jnp.allclose(out, ref, rtol=1e-4, atol=1e-4), max_err

    print("KERNEL_OK")
</pallas_src>

<mosaic_0001>
module attributes {stable_mosaic.version = 11 : i64} {
  func.func @_conv3x3_kernel(%arg0: i32, %arg1: i32, %arg2: memref<1x128xf32, #tpu.memory_space<vmem>>, %arg3: memref<1x128xf32, #tpu.memory_space<vmem>>, %arg4: memref<9x128x128xf32, #tpu.memory_space<vmem>>, %arg5: memref<1x128xf32, #tpu.memory_space<vmem>>, %arg6: memref<2x18x18x128xf32, #tpu.memory_space<any>>, %arg7: memref<1x16x16x128xf32, #tpu.memory_space<vmem>>, %arg8: memref<1x1x2x128xf32, #tpu.memory_space<vmem>>, %arg9: memref<18x18x128xf32, #tpu.memory_space<vmem>>, %arg10: memref<!tpu.dma_semaphore, #tpu.memory_space<semaphore_mem>>) attributes {dimension_semantics = [#tpu.dimension_semantics<parallel>, #tpu.dimension_semantics<parallel>], iteration_bounds = array<i64: 2, 1>, scalar_prefetch = 0 : i64, scratch_operands = 2 : i64, tpu.core_type = #tpu.core_type<tc>, window_params = [{pipeline_mode = #tpu.pipeline_mode<synchronous>, transform_indices = @transform_0, window_bounds = array<i64: 1, 128>}, {pipeline_mode = #tpu.pipeline_mode<synchronous>, transform_indices = @transform_1, window_bounds = array<i64: 1, 128>}, {pipeline_mode = #tpu.pipeline_mode<synchronous>, transform_indices = @transform_2, window_bounds = array<i64: 9, 128, 128>}, {pipeline_mode = #tpu.pipeline_mode<synchronous>, transform_indices = @transform_3, window_bounds = array<i64: 1, 128>}, {}, {transform_indices = @transform_5, window_bounds = array<i64: 1, 16, 16, 128>}, {transform_indices = @transform_6, window_bounds = array<i64: 1, 1, 2, 128>}]} {
    %c16_i32 = arith.constant 16 : i32
    %0 = arith.muli %arg1, %c16_i32 : i32
    %c0_i32 = arith.constant 0 : i32
    %c0_i32_0 = arith.constant 0 : i32
    %1 = tpu.memref_slice %arg6[%arg0, %0, %c0_i32, %c0_i32_0] : memref<2x18x18x128xf32, #tpu.memory_space<any>> -> memref<1x18x18x128xf32, #tpu.memory_space<any>>
    %2 = tpu.memref_squeeze %1 : memref<1x18x18x128xf32, #tpu.memory_space<any>> -> memref<18x18x128xf32, #tpu.memory_space<any>>
    tpu.enqueue_dma source(%2 : memref<18x18x128xf32, #tpu.memory_space<any>>) target(%arg9 : memref<18x18x128xf32, #tpu.memory_space<vmem>>) target_semaphore(%arg10 : memref<!tpu.dma_semaphore, #tpu.memory_space<semaphore_mem>>)
    %c0_i32_1 = arith.constant 0 : i32
    %c0_i32_2 = arith.constant 0 : i32
    %3 = tpu.memref_slice %arg6[%arg0, %0, %c0_i32_1, %c0_i32_2] : memref<2x18x18x128xf32, #tpu.memory_space<any>> -> memref<1x18x18x128xf32, #tpu.memory_space<any>>
    %4 = tpu.memref_squeeze %3 : memref<1x18x18x128xf32, #tpu.memory_space<any>> -> memref<18x18x128xf32, #tpu.memory_space<any>>
    tpu.wait_dma2 semaphore(%arg10 : memref<!tpu.dma_semaphore, #tpu.memory_space<semaphore_mem>>) src(%4 : memref<18x18x128xf32, #tpu.memory_space<any>>) dst(%arg9 : memref<18x18x128xf32, #tpu.memory_space<vmem>>)
    %cst = arith.constant 0.000000e+00 : f32
    %5 = vector.broadcast %cst : f32 to vector<256x128xf32>
    %c0 = arith.constant 0 : index
    %c0_3 = arith.constant 0 : index
    %c0_4 = arith.constant 0 : index
    %6 = vector.load %arg9[%c0, %c0_3, %c0_4] : memref<18x18x128xf32, #tpu.memory_space<vmem>>, vector<16x16x128xf32>
    %7 = vector.shape_cast %6 : vector<16x16x128xf32> to vector<256x128xf32>
    %c0_5 = arith.constant 0 : index
    %c0_6 = arith.constant 0 : index
    %c0_7 = arith.constant 0 : index
    %8 = vector.load %arg4[%c0_5, %c0_6, %c0_7] : memref<9x128x128xf32, #tpu.memory_space<vmem>>, vector<1x128x128xf32>
    %9 = vector.shape_cast %8 : vector<1x128x128xf32> to vector<128x128xf32>
    %cst_8 = arith.constant dense<0.000000e+00> : vector<256x128xf32>
    %10 = tpu.matmul %7, %9, %cst_8 {dimension_numbers = #tpu.dot_dimension_numbers<[1], [0], [0], [1], [0, 0, 1, 1], [], []>} : vector<256x128xf32>, vector<128x128xf32>, vector<256x128xf32> -> vector<256x128xf32>
    %11 = arith.addf %5, %10 : vector<256x128xf32>
    %c0_9 = arith.constant 0 : index
    %c1 = arith.constant 1 : index
    %c0_10 = arith.constant 0 : index
    %12 = vector.load %arg9[%c0_9, %c1, %c0_10] : memref<18x18x128xf32, #tpu.memory_space<vmem>>, vector<16x16x128xf32>
    %13 = vector.shape_cast %12 : vector<16x16x128xf32> to vector<256x128xf32>
    %c1_11 = arith.constant 1 : index
    %c0_12 = arith.constant 0 : index
    %c0_13 = arith.constant 0 : index
    %14 = vector.load %arg4[%c1_11, %c0_12, %c0_13] : memref<9x128x128xf32, #tpu.memory_space<vmem>>, vector<1x128x128xf32>
    %15 = vector.shape_cast %14 : vector<1x128x128xf32> to vector<128x128xf32>
    %cst_14 = arith.constant dense<0.000000e+00> : vector<256x128xf32>
    %16 = tpu.matmul %13, %15, %cst_14 {dimension_numbers = #tpu.dot_dimension_numbers<[1], [0], [0], [1], [0, 0, 1, 1], [], []>} : vector<256x128xf32>, vector<128x128xf32>, vector<256x128xf32> -> vector<256x128xf32>
    %17 = arith.addf %11, %16 : vector<256x128xf32>
    %c0_15 = arith.constant 0 : index
    %c2 = arith.constant 2 : index
    %c0_16 = arith.constant 0 : index
    %18 = vector.load %arg9[%c0_15, %c2, %c0_16] : memref<18x18x128xf32, #tpu.memory_space<vmem>>, vector<16x16x128xf32>
    %19 = vector.shape_cast %18 : vector<16x16x128xf32> to vector<256x128xf32>
    %c2_17 = arith.constant 2 : index
    %c0_18 = arith.constant 0 : index
    %c0_19 = arith.constant 0 : index
    %20 = vector.load %arg4[%c2_17, %c0_18, %c0_19] : memref<9x128x128xf32, #tpu.memory_space<vmem>>, vector<1x128x128xf32>
    %21 = vector.shape_cast %20 : vector<1x128x128xf32> to vector<128x128xf32>
    %cst_20 = arith.constant dense<0.000000e+00> : vector<256x128xf32>
    %22 = tpu.matmul %19, %21, %cst_20 {dimension_numbers = #tpu.dot_dimension_numbers<[1], [0], [0], [1], [0, 0, 1, 1], [], []>} : vector<256x128xf32>, vector<128x128xf32>, vector<256x128xf32> -> vector<256x128xf32>
    %23 = arith.addf %17, %22 : vector<256x128xf32>
    %c1_21 = arith.constant 1 : index
    %c0_22 = arith.constant 0 : index
    %c0_23 = arith.constant 0 : index
    %24 = vector.load %arg9[%c1_21, %c0_22, %c0_23] : memref<18x18x128xf32, #tpu.memory_space<vmem>>, vector<16x16x128xf32>
    %25 = vector.shape_cast %24 : vector<16x16x128xf32> to vector<256x128xf32>
    %c3 = arith.constant 3 : index
    %c0_24 = arith.constant 0 : index
    %c0_25 = arith.constant 0 : index
    %26 = vector.load %arg4[%c3, %c0_24, %c0_25] : memref<9x128x128xf32, #tpu.memory_space<vmem>>, vector<1x128x128xf32>
    %27 = vector.shape_cast %26 : vector<1x128x128xf32> to vector<128x128xf32>
    %cst_26 = arith.constant dense<0.000000e+00> : vector<256x128xf32>
    %28 = tpu.matmul %25, %27, %cst_26 {dimension_numbers = #tpu.dot_dimension_numbers<[1], [0], [0], [1], [0, 0, 1, 1], [], []>} : vector<256x128xf32>, vector<128x128xf32>, vector<256x128xf32> -> vector<256x128xf32>
    %29 = arith.addf %23, %28 : vector<256x128xf32>
    %c1_27 = arith.constant 1 : index
    %c1_28 = arith.constant 1 : index
    %c0_29 = arith.constant 0 : index
    %30 = vector.load %arg9[%c1_27, %c1_28, %c0_29] : memref<18x18x128xf32, #tpu.memory_space<vmem>>, vector<16x16x128xf32>
    %31 = vector.shape_cast %30 : vector<16x16x128xf32> to vector<256x128xf32>
    %c4 = arith.constant 4 : index
    %c0_30 = arith.constant 0 : index
    %c0_31 = arith.constant 0 : index
    %32 = vector.load %arg4[%c4, %c0_30, %c0_31] : memref<9x128x128xf32, #tpu.memory_space<vmem>>, vector<1x128x128xf32>
    %33 = vector.shape_cast %32 : vector<1x128x128xf32> to vector<128x128xf32>
    %cst_32 = arith.constant dense<0.000000e+00> : vector<256x128xf32>
    %34 = tpu.matmul %31, %33, %cst_32 {dimension_numbers = #tpu.dot_dimension_numbers<[1], [0], [0], [1], [0, 0, 1, 1], [], []>} : vector<256x128xf32>, vector<128x128xf32>, vector<256x128xf32> -> vector<256x128xf32>
    %35 = arith.addf %29, %34 : vector<256x128xf32>
    %c1_33 = arith.constant 1 : index
    %c2_34 = arith.constant 2 : index
    %c0_35 = arith.constant 0 : index
    %36 = vector.load %arg9[%c1_33, %c2_34, %c0_35] : memref<18x18x128xf32, #tpu.memory_space<vmem>>, vector<16x16x128xf32>
    %37 = vector.shape_cast %36 : vector<16x16x128xf32> to vector<256x128xf32>
    %c5 = arith.constant 5 : index
    %c0_36 = arith.constant 0 : index
    %c0_37 = arith.constant 0 : index
    %38 = vector.load %arg4[%c5, %c0_36, %c0_37] : memref<9x128x128xf32, #tpu.memory_space<vmem>>, vector<1x128x128xf32>
    %39 = vector.shape_cast %38 : vector<1x128x128xf32> to vector<128x128xf32>
    %cst_38 = arith.constant dense<0.000000e+00> : vector<256x128xf32>
    %40 = tpu.matmul %37, %39, %cst_38 {dimension_numbers = #tpu.dot_dimension_numbers<[1], [0], [0], [1], [0, 0, 1, 1], [], []>} : vector<256x128xf32>, vector<128x128xf32>, vector<256x128xf32> -> vector<256x128xf32>
    %41 = arith.addf %35, %40 : vector<256x128xf32>
    %c2_39 = arith.constant 2 : index
    %c0_40 = arith.constant 0 : index
    %c0_41 = arith.constant 0 : index
    %42 = vector.load %arg9[%c2_39, %c0_40, %c0_41] : memref<18x18x128xf32, #tpu.memory_space<vmem>>, vector<16x16x128xf32>
    %43 = vector.shape_cast %42 : vector<16x16x128xf32> to vector<256x128xf32>
    %c6 = arith.constant 6 : index
    %c0_42 = arith.constant 0 : index
    %c0_43 = arith.constant 0 : index
    %44 = vector.load %arg4[%c6, %c0_42, %c0_43] : memref<9x128x128xf32, #tpu.memory_space<vmem>>, vector<1x128x128xf32>
    %45 = vector.shape_cast %44 : vector<1x128x128xf32> to vector<128x128xf32>
    %cst_44 = arith.constant dense<0.000000e+00> : vector<256x128xf32>
    %46 = tpu.matmul %43, %45, %cst_44 {dimension_numbers = #tpu.dot_dimension_numbers<[1], [0], [0], [1], [0, 0, 1, 1], [], []>} : vector<256x128xf32>, vector<128x128xf32>, vector<256x128xf32> -> vector<256x128xf32>
    %47 = arith.addf %41, %46 : vector<256x128xf32>
    %c2_45 = arith.constant 2 : index
    %c1_46 = arith.constant 1 : index
    %c0_47 = arith.constant 0 : index
    %48 = vector.load %arg9[%c2_45, %c1_46, %c0_47] : memref<18x18x128xf32, #tpu.memory_space<vmem>>, vector<16x16x128xf32>
    %49 = vector.shape_cast %48 : vector<16x16x128xf32> to vector<256x128xf32>
    %c7 = arith.constant 7 : index
    %c0_48 = arith.constant 0 : index
    %c0_49 = arith.constant 0 : index
    %50 = vector.load %arg4[%c7, %c0_48, %c0_49] : memref<9x128x128xf32, #tpu.memory_space<vmem>>, vector<1x128x128xf32>
    %51 = vector.shape_cast %50 : vector<1x128x128xf32> to vector<128x128xf32>
    %cst_50 = arith.constant dense<0.000000e+00> : vector<256x128xf32>
    %52 = tpu.matmul %49, %51, %cst_50 {dimension_numbers = #tpu.dot_dimension_numbers<[1], [0], [0], [1], [0, 0, 1, 1], [], []>} : vector<256x128xf32>, vector<128x128xf32>, vector<256x128xf32> -> vector<256x128xf32>
    %53 = arith.addf %47, %52 : vector<256x128xf32>
    %c2_51 = arith.constant 2 : index
    %c2_52 = arith.constant 2 : index
    %c0_53 = arith.constant 0 : index
    %54 = vector.load %arg9[%c2_51, %c2_52, %c0_53] : memref<18x18x128xf32, #tpu.memory_space<vmem>>, vector<16x16x128xf32>
    %55 = vector.shape_cast %54 : vector<16x16x128xf32> to vector<256x128xf32>
    %c8 = arith.constant 8 : index
    %c0_54 = arith.constant 0 : index
    %c0_55 = arith.constant 0 : index
    %56 = vector.load %arg4[%c8, %c0_54, %c0_55] : memref<9x128x128xf32, #tpu.memory_space<vmem>>, vector<1x128x128xf32>
    %57 = vector.shape_cast %56 : vector<1x128x128xf32> to vector<128x128xf32>
    %cst_56 = arith.constant dense<0.000000e+00> : vector<256x128xf32>
    %58 = tpu.matmul %55, %57, %cst_56 {dimension_numbers = #tpu.dot_dimension_numbers<[1], [0], [0], [1], [0, 0, 1, 1], [], []>} : vector<256x128xf32>, vector<128x128xf32>, vector<256x128xf32> -> vector<256x128xf32>
    %59 = arith.addf %53, %58 : vector<256x128xf32>
    %c0_57 = arith.constant 0 : index
    %c0_58 = arith.constant 0 : index
    %60 = vector.load %arg5[%c0_57, %c0_58] : memref<1x128xf32, #tpu.memory_space<vmem>>, vector<1x128xf32>
    %61 = vector.broadcast %60 : vector<1x128xf32> to vector<256x128xf32>
    %62 = arith.addf %59, %61 : vector<256x128xf32>
    %63 = vector.shape_cast %62 : vector<256x128xf32> to vector<16x16x128xf32>
    %c0_59 = arith.constant 0 : index
    %c0_60 = arith.constant 0 : index
    %c0_61 = arith.constant 0 : index
    %c0_62 = arith.constant 0 : index
    %64 = vector.load %arg7[%c0_59, %c0_60, %c0_61, %c0_62] : memref<1x16x16x128xf32, #tpu.memory_space<vmem>>, vector<1x16x16x128xf32>
    %65 = vector.shape_cast %64 : vector<1x16x16x128xf32> to vector<16x16x128xf32>
    %66 = vector.shape_cast %63 : vector<16x16x128xf32> to vector<1x16x16x128xf32>
    tpu.vector_store %arg7[%c0_59, %c0_60, %c0_61, %c0_62], %66 {strides = array<i32>} : memref<1x16x16x128xf32, #tpu.memory_space<vmem>>, vector<1x16x16x128xf32>,
    %cst_63 = arith.constant dense<0.000000e+00> : vector<128xf32>
    %67 = vector.multi_reduction <add>, %62, %cst_63 [0] : vector<256x128xf32> to vector<128xf32>
    %68 = vector.shape_cast %67 : vector<128xf32> to vector<1x128xf32>
    %69 = arith.mulf %62, %62 : vector<256x128xf32>
    %cst_64 = arith.constant dense<0.000000e+00> : vector<128xf32>
    %70 = vector.multi_reduction <add>, %69, %cst_64 [0] : vector<256x128xf32> to vector<128xf32>
    %71 = vector.shape_cast %70 : vector<128xf32> to vector<1x128xf32>
    %72 = tpu.concatenate %68, %71 in 0 : vector<1x128xf32>, vector<1x128xf32> -> vector<2x128xf32>
    %c0_65 = arith.constant 0 : index
    %c0_66 = arith.constant 0 : index
    %c0_67 = arith.constant 0 : index
    %c0_68 = arith.constant 0 : index
    %73 = vector.load %arg8[%c0_65, %c0_66, %c0_67, %c0_68] : memref<1x1x2x128xf32, #tpu.memory_space<vmem>>, vector<1x1x2x128xf32>
    %74 = vector.shape_cast %73 : vector<1x1x2x128xf32> to vector<2x128xf32>
    %75 = vector.shape_cast %72 : vector<2x128xf32> to vector<1x1x2x128xf32>
    tpu.vector_store %arg8[%c0_65, %c0_66, %c0_67, %c0_68], %75 {strides = array<i32>} : memref<1x1x2x128xf32, #tpu.memory_space<vmem>>, vector<1x1x2x128xf32>,
    return
  }
  func.func @transform_0(%arg0: i32, %arg1: i32) -> (i32, i32) {
    %c0_i32 = arith.constant 0 : i32
    %c0_i32_0 = arith.constant 0 : i32
    %c0_i32_1 = arith.constant 0 : i32
    return %c0_i32, %c0_i32_0 : i32, i32
  }
  func.func @transform_1(%arg0: i32, %arg1: i32) -> (i32, i32) {
    %c0_i32 = arith.constant 0 : i32
    %c0_i32_0 = arith.constant 0 : i32
    %c0_i32_1 = arith.constant 0 : i32
    return %c0_i32, %c0_i32_0 : i32, i32
  }
  func.func @transform_2(%arg0: i32, %arg1: i32) -> (i32, i32, i32) {
    %c0_i32 = arith.constant 0 : i32
    %c0_i32_0 = arith.constant 0 : i32
    %c0_i32_1 = arith.constant 0 : i32
    %c0_i32_2 = arith.constant 0 : i32
    return %c0_i32, %c0_i32_0, %c0_i32_1 : i32, i32, i32
  }
  func.func @transform_3(%arg0: i32, %arg1: i32) -> (i32, i32) {
    %c0_i32 = arith.constant 0 : i32
    %c0_i32_0 = arith.constant 0 : i32
    %c0_i32_1 = arith.constant 0 : i32
    return %c0_i32, %c0_i32_0 : i32, i32
  }
  func.func @transform_5(%arg0: i32, %arg1: i32) -> (i32, i32, i32, i32) {
    %c0_i32 = arith.constant 0 : i32
    %c0_i32_0 = arith.constant 0 : i32
    %c0_i32_1 = arith.constant 0 : i32
    return %arg0, %arg1, %c0_i32, %c0_i32_0 : i32, i32, i32, i32
  }
  func.func @transform_6(%arg0: i32, %arg1: i32) -> (i32, i32, i32, i32) {
    %c0_i32 = arith.constant 0 : i32
    %c0_i32_0 = arith.constant 0 : i32
    %c0_i32_1 = arith.constant 0 : i32
    return %arg0, %arg1, %c0_i32, %c0_i32_0 : i32, i32, i32, i32
  }
}

module attributes {stable_mosaic.version = 11 : i64} {
  func.func @_conv3x3_kernel(%arg0: i32, %arg1: i32, %arg2: memref<1x128xf32, #tpu.memory_space<vmem>>, %arg3: memref<1x128xf32, #tpu.memory_space<vmem>>, %arg4: memref<9x128x128xf32, #tpu.memory_space<vmem>>, %arg5: memref<1x128xf32, #tpu.memory_space<vmem>>, %arg6: memref<2x18x18x128xf32, #tpu.memory_space<any>>, %arg7: memref<1x16x16x128xf32, #tpu.memory_space<vmem>>, %arg8: memref<1x1x2x128xf32, #tpu.memory_space<vmem>>, %arg9: memref<18x18x128xf32, #tpu.memory_space<vmem>>, %arg10: memref<!tpu.dma_semaphore, #tpu.memory_space<semaphore_mem>>) attributes {dimension_semantics = [#tpu.dimension_semantics<parallel>, #tpu.dimension_semantics<parallel>], iteration_bounds = array<i64: 2, 1>, scalar_prefetch = 0 : i64, scratch_operands = 2 : i64, tpu.core_type = #tpu.core_type<tc>, window_params = [{pipeline_mode = #tpu.pipeline_mode<synchronous>, transform_indices = @transform_0, window_bounds = array<i64: 1, 128>}, {pipeline_mode = #tpu.pipeline_mode<synchronous>, transform_indices = @transform_1, window_bounds = array<i64: 1, 128>}, {pipeline_mode = #tpu.pipeline_mode<synchronous>, transform_indices = @transform_2, window_bounds = array<i64: 9, 128, 128>}, {pipeline_mode = #tpu.pipeline_mode<synchronous>, transform_indices = @transform_3, window_bounds = array<i64: 1, 128>}, {}, {transform_indices = @transform_5, window_bounds = array<i64: 1, 16, 16, 128>}, {transform_indices = @transform_6, window_bounds = array<i64: 1, 1, 2, 128>}]} {
    %c16_i32 = arith.constant 16 : i32
    %0 = arith.muli %arg1, %c16_i32 : i32
    %c0_i32 = arith.constant 0 : i32
    %c0_i32_0 = arith.constant 0 : i32
    %1 = tpu.memref_slice %arg6[%arg0, %0, %c0_i32, %c0_i32_0] : memref<2x18x18x128xf32, #tpu.memory_space<any>> -> memref<1x18x18x128xf32, #tpu.memory_space<any>>
    %2 = tpu.memref_squeeze %1 : memref<1x18x18x128xf32, #tpu.memory_space<any>> -> memref<18x18x128xf32, #tpu.memory_space<any>>
    tpu.enqueue_dma source(%2 : memref<18x18x128xf32, #tpu.memory_space<any>>) target(%arg9 : memref<18x18x128xf32, #tpu.memory_space<vmem>>) target_semaphore(%arg10 : memref<!tpu.dma_semaphore, #tpu.memory_space<semaphore_mem>>)
    %c0_i32_1 = arith.constant 0 : i32
    %c0_i32_2 = arith.constant 0 : i32
    %3 = tpu.memref_slice %arg6[%arg0, %0, %c0_i32_1, %c0_i32_2] : memref<2x18x18x128xf32, #tpu.memory_space<any>> -> memref<1x18x18x128xf32, #tpu.memory_space<any>>
    %4 = tpu.memref_squeeze %3 : memref<1x18x18x128xf32, #tpu.memory_space<any>> -> memref<18x18x128xf32, #tpu.memory_space<any>>
    tpu.wait_dma2 semaphore(%arg10 : memref<!tpu.dma_semaphore, #tpu.memory_space<semaphore_mem>>) src(%4 : memref<18x18x128xf32, #tpu.memory_space<any>>) dst(%arg9 : memref<18x18x128xf32, #tpu.memory_space<vmem>>)
    %c0 = arith.constant 0 : index
    %c0_3 = arith.constant 0 : index
    %c0_4 = arith.constant 0 : index
    %5 = vector.load %arg9[%c0, %c0_3, %c0_4] : memref<18x18x128xf32, #tpu.memory_space<vmem>>, vector<18x18x128xf32>
    %c0_5 = arith.constant 0 : index
    %c0_6 = arith.constant 0 : index
    %6 = vector.load %arg2[%c0_5, %c0_6] : memref<1x128xf32, #tpu.memory_space<vmem>>, vector<1x128xf32>
    %7 = vector.shape_cast %6 : vector<1x128xf32> to vector<1x1x128xf32>
    %8 = vector.broadcast %7 : vector<1x1x128xf32> to vector<18x18x128xf32>
    %9 = arith.mulf %5, %8 : vector<18x18x128xf32>
    %c0_7 = arith.constant 0 : index
    %c0_8 = arith.constant 0 : index
    %10 = vector.load %arg3[%c0_7, %c0_8] : memref<1x128xf32, #tpu.memory_space<vmem>>, vector<1x128xf32>
    %11 = vector.shape_cast %10 : vector<1x128xf32> to vector<1x1x128xf32>
    %12 = vector.broadcast %11 : vector<1x1x128xf32> to vector<18x18x128xf32>
    %13 = arith.addf %9, %12 : vector<18x18x128xf32>
    %cst = arith.constant 0.000000e+00 : f32
    %14 = vector.broadcast %cst : f32 to vector<18x18x128xf32>
    %15 = arith.maximumf %13, %14 : vector<18x18x128xf32>
    %c16_i32_9 = arith.constant 16 : i32
    %16 = arith.muli %arg1, %c16_i32_9 : i32
    %17 = tpu.iota {dimensions = array<i32: 0>} : vector<18x18x1xi32>
    %18 = vector.broadcast %16 : i32 to vector<18x18x1xi32>
    %19 = arith.addi %18, %17 : vector<18x18x1xi32>
    %20 = tpu.iota {dimensions = array<i32: 1>} : vector<18x18x1xi32>
    %c1_i32 = arith.constant 1 : i32
    %21 = vector.broadcast %c1_i32 : i32 to vector<18x18x1xi32>
    %22 = arith.cmpi sge, %19, %21 : vector<18x18x1xi32>
    %c16_i32_10 = arith.constant 16 : i32
    %23 = vector.broadcast %c16_i32_10 : i32 to vector<18x18x1xi32>
    %24 = arith.cmpi sle, %19, %23 : vector<18x18x1xi32>
    %25 = arith.andi %22, %24 : vector<18x18x1xi1>
    %c1_i32_11 = arith.constant 1 : i32
    %26 = vector.broadcast %c1_i32_11 : i32 to vector<18x18x1xi32>
    %27 = arith.cmpi sge, %20, %26 : vector<18x18x1xi32>
    %28 = arith.andi %25, %27 : vector<18x18x1xi1>
    %c16_i32_12 = arith.constant 16 : i32
    %29 = vector.broadcast %c16_i32_12 : i32 to vector<18x18x1xi32>
    %30 = arith.cmpi sle, %20, %29 : vector<18x18x1xi32>
    %31 = arith.andi %28, %30 : vector<18x18x1xi1>
    %32 = arith.extui %31 : vector<18x18x1xi1> to vector<18x18x1xi32>
    %33 = arith.sitofp %32 : vector<18x18x1xi32> to vector<18x18x1xf32>
    %34 = vector.broadcast %33 : vector<18x18x1xf32> to vector<18x18x128xf32>
    %35 = arith.mulf %15, %34 : vector<18x18x128xf32>
    %c0_13 = arith.constant 0 : index
    %c0_14 = arith.constant 0 : index
    %c0_15 = arith.constant 0 : index
    %36 = vector.load %arg9[%c0_13, %c0_14, %c0_15] : memref<18x18x128xf32, #tpu.memory_space<vmem>>, vector<18x18x128xf32>
    tpu.vector_store %arg9[%c0_13, %c0_14, %c0_15], %35 {strides = array<i32>} : memref<18x18x128xf32, #tpu.memory_space<vmem>>, vector<18x18x128xf32>,
    %cst_16 = arith.constant 0.000000e+00 : f32
    %37 = vector.broadcast %cst_16 : f32 to vector<256x128xf32>
    %c0_17 = arith.constant 0 : index
    %c0_18 = arith.constant 0 : index
    %c0_19 = arith.constant 0 : index
    %38 = vector.load %arg9[%c0_17, %c0_18, %c0_19] : memref<18x18x128xf32, #tpu.memory_space<vmem>>, vector<16x16x128xf32>
    %39 = vector.shape_cast %38 : vector<16x16x128xf32> to vector<256x128xf32>
    %c0_20 = arith.constant 0 : index
    %c0_21 = arith.constant 0 : index
    %c0_22 = arith.constant 0 : index
    %40 = vector.load %arg4[%c0_20, %c0_21, %c0_22] : memref<9x128x128xf32, #tpu.memory_space<vmem>>, vector<1x128x128xf32>
    %41 = vector.shape_cast %40 : vector<1x128x128xf32> to vector<128x128xf32>
    %cst_23 = arith.constant dense<0.000000e+00> : vector<256x128xf32>
    %42 = tpu.matmul %39, %41, %cst_23 {dimension_numbers = #tpu.dot_dimension_numbers<[1], [0], [0], [1], [0, 0, 1, 1], [], []>} : vector<256x128xf32>, vector<128x128xf32>, vector<256x128xf32> -> vector<256x128xf32>
    %43 = arith.addf %37, %42 : vector<256x128xf32>
    %c0_24 = arith.constant 0 : index
    %c1 = arith.constant 1 : index
    %c0_25 = arith.constant 0 : index
    %44 = vector.load %arg9[%c0_24, %c1, %c0_25] : memref<18x18x128xf32, #tpu.memory_space<vmem>>, vector<16x16x128xf32>
    %45 = vector.shape_cast %44 : vector<16x16x128xf32> to vector<256x128xf32>
    %c1_26 = arith.constant 1 : index
    %c0_27 = arith.constant 0 : index
    %c0_28 = arith.constant 0 : index
    %46 = vector.load %arg4[%c1_26, %c0_27, %c0_28] : memref<9x128x128xf32, #tpu.memory_space<vmem>>, vector<1x128x128xf32>
    %47 = vector.shape_cast %46 : vector<1x128x128xf32> to vector<128x128xf32>
    %cst_29 = arith.constant dense<0.000000e+00> : vector<256x128xf32>
    %48 = tpu.matmul %45, %47, %cst_29 {dimension_numbers = #tpu.dot_dimension_numbers<[1], [0], [0], [1], [0, 0, 1, 1], [], []>} : vector<256x128xf32>, vector<128x128xf32>, vector<256x128xf32> -> vector<256x128xf32>
    %49 = arith.addf %43, %48 : vector<256x128xf32>
    %c0_30 = arith.constant 0 : index
    %c2 = arith.constant 2 : index
    %c0_31 = arith.constant 0 : index
    %50 = vector.load %arg9[%c0_30, %c2, %c0_31] : memref<18x18x128xf32, #tpu.memory_space<vmem>>, vector<16x16x128xf32>
    %51 = vector.shape_cast %50 : vector<16x16x128xf32> to vector<256x128xf32>
    %c2_32 = arith.constant 2 : index
    %c0_33 = arith.constant 0 : index
    %c0_34 = arith.constant 0 : index
    %52 = vector.load %arg4[%c2_32, %c0_33, %c0_34] : memref<9x128x128xf32, #tpu.memory_space<vmem>>, vector<1x128x128xf32>
    %53 = vector.shape_cast %52 : vector<1x128x128xf32> to vector<128x128xf32>
    %cst_35 = arith.constant dense<0.000000e+00> : vector<256x128xf32>
    %54 = tpu.matmul %51, %53, %cst_35 {dimension_numbers = #tpu.dot_dimension_numbers<[1], [0], [0], [1], [0, 0, 1, 1], [], []>} : vector<256x128xf32>, vector<128x128xf32>, vector<256x128xf32> -> vector<256x128xf32>
    %55 = arith.addf %49, %54 : vector<256x128xf32>
    %c1_36 = arith.constant 1 : index
    %c0_37 = arith.constant 0 : index
    %c0_38 = arith.constant 0 : index
    %56 = vector.load %arg9[%c1_36, %c0_37, %c0_38] : memref<18x18x128xf32, #tpu.memory_space<vmem>>, vector<16x16x128xf32>
    %57 = vector.shape_cast %56 : vector<16x16x128xf32> to vector<256x128xf32>
    %c3 = arith.constant 3 : index
    %c0_39 = arith.constant 0 : index
    %c0_40 = arith.constant 0 : index
    %58 = vector.load %arg4[%c3, %c0_39, %c0_40] : memref<9x128x128xf32, #tpu.memory_space<vmem>>, vector<1x128x128xf32>
    %59 = vector.shape_cast %58 : vector<1x128x128xf32> to vector<128x128xf32>
    %cst_41 = arith.constant dense<0.000000e+00> : vector<256x128xf32>
    %60 = tpu.matmul %57, %59, %cst_41 {dimension_numbers = #tpu.dot_dimension_numbers<[1], [0], [0], [1], [0, 0, 1, 1], [], []>} : vector<256x128xf32>, vector<128x128xf32>, vector<256x128xf32> -> vector<256x128xf32>
    %61 = arith.addf %55, %60 : vector<256x128xf32>
    %c1_42 = arith.constant 1 : index
    %c1_43 = arith.constant 1 : index
    %c0_44 = arith.constant 0 : index
    %62 = vector.load %arg9[%c1_42, %c1_43, %c0_44] : memref<18x18x128xf32, #tpu.memory_space<vmem>>, vector<16x16x128xf32>
    %63 = vector.shape_cast %62 : vector<16x16x128xf32> to vector<256x128xf32>
    %c4 = arith.constant 4 : index
    %c0_45 = arith.constant 0 : index
    %c0_46 = arith.constant 0 : index
    %64 = vector.load %arg4[%c4, %c0_45, %c0_46] : memref<9x128x128xf32, #tpu.memory_space<vmem>>, vector<1x128x128xf32>
    %65 = vector.shape_cast %64 : vector<1x128x128xf32> to vector<128x128xf32>
    %cst_47 = arith.constant dense<0.000000e+00> : vector<256x128xf32>
    %66 = tpu.matmul %63, %65, %cst_47 {dimension_numbers = #tpu.dot_dimension_numbers<[1], [0], [0], [1], [0, 0, 1, 1], [], []>} : vector<256x128xf32>, vector<128x128xf32>, vector<256x128xf32> -> vector<256x128xf32>
    %67 = arith.addf %61, %66 : vector<256x128xf32>
    %c1_48 = arith.constant 1 : index
    %c2_49 = arith.constant 2 : index
    %c0_50 = arith.constant 0 : index
    %68 = vector.load %arg9[%c1_48, %c2_49, %c0_50] : memref<18x18x128xf32, #tpu.memory_space<vmem>>, vector<16x16x128xf32>
    %69 = vector.shape_cast %68 : vector<16x16x128xf32> to vector<256x128xf32>
    %c5 = arith.constant 5 : index
    %c0_51 = arith.constant 0 : index
    %c0_52 = arith.constant 0 : index
    %70 = vector.load %arg4[%c5, %c0_51, %c0_52] : memref<9x128x128xf32, #tpu.memory_space<vmem>>, vector<1x128x128xf32>
    %71 = vector.shape_cast %70 : vector<1x128x128xf32> to vector<128x128xf32>
    %cst_53 = arith.constant dense<0.000000e+00> : vector<256x128xf32>
    %72 = tpu.matmul %69, %71, %cst_53 {dimension_numbers = #tpu.dot_dimension_numbers<[1], [0], [0], [1], [0, 0, 1, 1], [], []>} : vector<256x128xf32>, vector<128x128xf32>, vector<256x128xf32> -> vector<256x128xf32>
    %73 = arith.addf %67, %72 : vector<256x128xf32>
    %c2_54 = arith.constant 2 : index
    %c0_55 = arith.constant 0 : index
    %c0_56 = arith.constant 0 : index
    %74 = vector.load %arg9[%c2_54, %c0_55, %c0_56] : memref<18x18x128xf32, #tpu.memory_space<vmem>>, vector<16x16x128xf32>
    %75 = vector.shape_cast %74 : vector<16x16x128xf32> to vector<256x128xf32>
    %c6 = arith.constant 6 : index
    %c0_57 = arith.constant 0 : index
    %c0_58 = arith.constant 0 : index
    %76 = vector.load %arg4[%c6, %c0_57, %c0_58] : memref<9x128x128xf32, #tpu.memory_space<vmem>>, vector<1x128x128xf32>
    %77 = vector.shape_cast %76 : vector<1x128x128xf32> to vector<128x128xf32>
    %cst_59 = arith.constant dense<0.000000e+00> : vector<256x128xf32>
    %78 = tpu.matmul %75, %77, %cst_59 {dimension_numbers = #tpu.dot_dimension_numbers<[1], [0], [0], [1], [0, 0, 1, 1], [], []>} : vector<256x128xf32>, vector<128x128xf32>, vector<256x128xf32> -> vector<256x128xf32>
    %79 = arith.addf %73, %78 : vector<256x128xf32>
    %c2_60 = arith.constant 2 : index
    %c1_61 = arith.constant 1 : index
    %c0_62 = arith.constant 0 : index
    %80 = vector.load %arg9[%c2_60, %c1_61, %c0_62] : memref<18x18x128xf32, #tpu.memory_space<vmem>>, vector<16x16x128xf32>
    %81 = vector.shape_cast %80 : vector<16x16x128xf32> to vector<256x128xf32>
    %c7 = arith.constant 7 : index
    %c0_63 = arith.constant 0 : index
    %c0_64 = arith.constant 0 : index
    %82 = vector.load %arg4[%c7, %c0_63, %c0_64] : memref<9x128x128xf32, #tpu.memory_space<vmem>>, vector<1x128x128xf32>
    %83 = vector.shape_cast %82 : vector<1x128x128xf32> to vector<128x128xf32>
    %cst_65 = arith.constant dense<0.000000e+00> : vector<256x128xf32>
    %84 = tpu.matmul %81, %83, %cst_65 {dimension_numbers = #tpu.dot_dimension_numbers<[1], [0], [0], [1], [0, 0, 1, 1], [], []>} : vector<256x128xf32>, vector<128x128xf32>, vector<256x128xf32> -> vector<256x128xf32>
    %85 = arith.addf %79, %84 : vector<256x128xf32>
    %c2_66 = arith.constant 2 : index
    %c2_67 = arith.constant 2 : index
    %c0_68 = arith.constant 0 : index
    %86 = vector.load %arg9[%c2_66, %c2_67, %c0_68] : memref<18x18x128xf32, #tpu.memory_space<vmem>>, vector<16x16x128xf32>
    %87 = vector.shape_cast %86 : vector<16x16x128xf32> to vector<256x128xf32>
    %c8 = arith.constant 8 : index
    %c0_69 = arith.constant 0 : index
    %c0_70 = arith.constant 0 : index
    %88 = vector.load %arg4[%c8, %c0_69, %c0_70] : memref<9x128x128xf32, #tpu.memory_space<vmem>>, vector<1x128x128xf32>
    %89 = vector.shape_cast %88 : vector<1x128x128xf32> to vector<128x128xf32>
    %cst_71 = arith.constant dense<0.000000e+00> : vector<256x128xf32>
    %90 = tpu.matmul %87, %89, %cst_71 {dimension_numbers = #tpu.dot_dimension_numbers<[1], [0], [0], [1], [0, 0, 1, 1], [], []>} : vector<256x128xf32>, vector<128x128xf32>, vector<256x128xf32> -> vector<256x128xf32>
    %91 = arith.addf %85, %90 : vector<256x128xf32>
    %c0_72 = arith.constant 0 : index
    %c0_73 = arith.constant 0 : index
    %92 = vector.load %arg5[%c0_72, %c0_73] : memref<1x128xf32, #tpu.memory_space<vmem>>, vector<1x128xf32>
    %93 = vector.broadcast %92 : vector<1x128xf32> to vector<256x128xf32>
    %94 = arith.addf %91, %93 : vector<256x128xf32>
    %95 = vector.shape_cast %94 : vector<256x128xf32> to vector<16x16x128xf32>
    %c0_74 = arith.constant 0 : index
    %c0_75 = arith.constant 0 : index
    %c0_76 = arith.constant 0 : index
    %c0_77 = arith.constant 0 : index
    %96 = vector.load %arg7[%c0_74, %c0_75, %c0_76, %c0_77] : memref<1x16x16x128xf32, #tpu.memory_space<vmem>>, vector<1x16x16x128xf32>
    %97 = vector.shape_cast %96 : vector<1x16x16x128xf32> to vector<16x16x128xf32>
    %98 = vector.shape_cast %95 : vector<16x16x128xf32> to vector<1x16x16x128xf32>
    tpu.vector_store %arg7[%c0_74, %c0_75, %c0_76, %c0_77], %98 {strides = array<i32>} : memref<1x16x16x128xf32, #tpu.memory_space<vmem>>, vector<1x16x16x128xf32>,
    %cst_78 = arith.constant dense<0.000000e+00> : vector<128xf32>
    %99 = vector.multi_reduction <add>, %94, %cst_78 [0] : vector<256x128xf32> to vector<128xf32>
    %100 = vector.shape_cast %99 : vector<128xf32> to vector<1x128xf32>
    %101 = arith.mulf %94, %94 : vector<256x128xf32>
    %cst_79 = arith.constant dense<0.000000e+00> : vector<128xf32>
    %102 = vector.multi_reduction <add>, %101, %cst_79 [0] : vector<256x128xf32> to vector<128xf32>
    %103 = vector.shape_cast %102 : vector<128xf32> to vector<1x128xf32>
    %104 = tpu.concatenate %100, %103 in 0 : vector<1x128xf32>, vector<1x128xf32> -> vector<2x128xf32>
    %c0_80 = arith.constant 0 : index
    %c0_81 = arith.constant 0 : index
    %c0_82 = arith.constant 0 : index
    %c0_83 = arith.constant 0 : index
    %105 = vector.load %arg8[%c0_80, %c0_81, %c0_82, %c0_83] : memref<1x1x2x128xf32, #tpu.memory_space<vmem>>, vector<1x1x2x128xf32>
    %106 = vector.shape_cast %105 : vector<1x1x2x128xf32> to vector<2x128xf32>
    %107 = vector.shape_cast %104 : vector<2x128xf32> to vector<1x1x2x128xf32>
    tpu.vector_store %arg8[%c0_80, %c0_81, %c0_82, %c0_83], %107 {strides = array<i32>} : memref<1x1x2x128xf32, #tpu.memory_space<vmem>>, vector<1x1x2x128xf32>,
    return
  }
  func.func @transform_0(%arg0: i32, %arg1: i32) -> (i32, i32) {
    %c0_i32 = arith.constant 0 : i32
    %c0_i32_0 = arith.constant 0 : i32
    %c0_i32_1 = arith.constant 0 : i32
    return %c0_i32, %c0_i32_0 : i32, i32
  }
  func.func @transform_1(%arg0: i32, %arg1: i32) -> (i32, i32) {
    %c0_i32 = arith.constant 0 : i32
    %c0_i32_0 = arith.constant 0 : i32
    %c0_i32_1 = arith.constant 0 : i32
    return %c0_i32, %c0_i32_0 : i32, i32
  }
  func.func @transform_2(%arg0: i32, %arg1: i32) -> (i32, i32, i32) {
    %c0_i32 = arith.constant 0 : i32
    %c0_i32_0 = arith.constant 0 : i32
    %c0_i32_1 = arith.constant 0 : i32
    %c0_i32_2 = arith.constant 0 : i32
    return %c0_i32, %c0_i32_0, %c0_i32_1 : i32, i32, i32
  }
  func.func @transform_3(%arg0: i32, %arg1: i32) -> (i32, i32) {
    %c0_i32 = arith.constant 0 : i32
    %c0_i32_0 = arith.constant 0 : i32
    %c0_i32_1 = arith.constant 0 : i32
    return %c0_i32, %c0_i32_0 : i32, i32
  }
  func.func @transform_5(%arg0: i32, %arg1: i32) -> (i32, i32, i32, i32) {
    %c0_i32 = arith.constant 0 : i32
    %c0_i32_0 = arith.constant 0 : i32
    %c0_i32_1 = arith.constant 0 : i32
    return %arg0, %arg1, %c0_i32, %c0_i32_0 : i32, i32, i32, i32
  }
  func.func @transform_6(%arg0: i32, %arg1: i32) -> (i32, i32, i32, i32) {
    %c0_i32 = arith.constant 0 : i32
    %c0_i32_0 = arith.constant 0 : i32
    %c0_i32_1 = arith.constant 0 : i32
    return %arg0, %arg1, %c0_i32, %c0_i32_0 : i32, i32, i32, i32
  }
}

module attributes {stable_mosaic.version = 11 : i64} {
  func.func @_bn_apply_relu_kernel(%arg0: i32, %arg1: i32, %arg2: memref<1x16x16x128xf32, #tpu.memory_space<vmem>>, %arg3: memref<1x128xf32, #tpu.memory_space<vmem>>, %arg4: memref<1x128xf32, #tpu.memory_space<vmem>>, %arg5: memref<1x16x16x128xf32, #tpu.memory_space<vmem>>) attributes {dimension_semantics = [#tpu.dimension_semantics<parallel>, #tpu.dimension_semantics<parallel>], iteration_bounds = array<i64: 2, 1>, scalar_prefetch = 0 : i64, scratch_operands = 0 : i64, tpu.core_type = #tpu.core_type<tc>, window_params = [{transform_indices = @transform_0, window_bounds = array<i64: 1, 16, 16, 128>}, {pipeline_mode = #tpu.pipeline_mode<synchronous>, transform_indices = @transform_1, window_bounds = array<i64: 1, 128>}, {pipeline_mode = #tpu.pipeline_mode<synchronous>, transform_indices = @transform_2, window_bounds = array<i64: 1, 128>}, {transform_indices = @transform_3, window_bounds = array<i64: 1, 16, 16, 128>}]} {
    %c0 = arith.constant 0 : index
    %c0_0 = arith.constant 0 : index
    %c0_1 = arith.constant 0 : index
    %c0_2 = arith.constant 0 : index
    %0 = vector.load %arg2[%c0, %c0_0, %c0_1, %c0_2] : memref<1x16x16x128xf32, #tpu.memory_space<vmem>>, vector<1x16x16x128xf32>
    %1 = vector.shape_cast %0 : vector<1x16x16x128xf32> to vector<16x16x128xf32>
    %c0_3 = arith.constant 0 : index
    %c0_4 = arith.constant 0 : index
    %2 = vector.load %arg3[%c0_3, %c0_4] : memref<1x128xf32, #tpu.memory_space<vmem>>, vector<1x128xf32>
    %3 = vector.shape_cast %2 : vector<1x128xf32> to vector<1x1x128xf32>
    %4 = vector.broadcast %3 : vector<1x1x128xf32> to vector<16x16x128xf32>
    %5 = arith.mulf %1, %4 : vector<16x16x128xf32>
    %c0_5 = arith.constant 0 : index
    %c0_6 = arith.constant 0 : index
    %6 = vector.load %arg4[%c0_5, %c0_6] : memref<1x128xf32, #tpu.memory_space<vmem>>, vector<1x128xf32>
    %7 = vector.shape_cast %6 : vector<1x128xf32> to vector<1x1x128xf32>
    %8 = vector.broadcast %7 : vector<1x1x128xf32> to vector<16x16x128xf32>
    %9 = arith.addf %5, %8 : vector<16x16x128xf32>
    %cst = arith.constant 0.000000e+00 : f32
    %10 = vector.broadcast %cst : f32 to vector<16x16x128xf32>
    %11 = arith.maximumf %9, %10 : vector<16x16x128xf32>
    %c0_7 = arith.constant 0 : index
    %c0_8 = arith.constant 0 : index
    %c0_9 = arith.constant 0 : index
    %c0_10 = arith.constant 0 : index
    %12 = vector.load %arg5[%c0_7, %c0_8, %c0_9, %c0_10] : memref<1x16x16x128xf32, #tpu.memory_space<vmem>>, vector<1x16x16x128xf32>
    %13 = vector.shape_cast %12 : vector<1x16x16x128xf32> to vector<16x16x128xf32>
    %14 = vector.shape_cast %11 : vector<16x16x128xf32> to vector<1x16x16x128xf32>
    tpu.vector_store %arg5[%c0_7, %c0_8, %c0_9, %c0_10], %14 {strides = array<i32>} : memref<1x16x16x128xf32, #tpu.memory_space<vmem>>, vector<1x16x16x128xf32>,
    return
  }
  func.func @transform_0(%arg0: i32, %arg1: i32) -> (i32, i32, i32, i32) {
    %c0_i32 = arith.constant 0 : i32
    %c0_i32_0 = arith.constant 0 : i32
    %c0_i32_1 = arith.constant 0 : i32
    return %arg0, %arg1, %c0_i32, %c0_i32_0 : i32, i32, i32, i32
  }
  func.func @transform_1(%arg0: i32, %arg1: i32) -> (i32, i32) {
    %c0_i32 = arith.constant 0 : i32
    %c0_i32_0 = arith.constant 0 : i32
    %c0_i32_1 = arith.constant 0 : i32
    return %c0_i32, %c0_i32_0 : i32, i32
  }
  func.func @transform_2(%arg0: i32, %arg1: i32) -> (i32, i32) {
    %c0_i32 = arith.constant 0 : i32
    %c0_i32_0 = arith.constant 0 : i32
    %c0_i32_1 = arith.constant 0 : i32
    return %c0_i32, %c0_i32_0 : i32, i32
  }
  func.func @transform_3(%arg0: i32, %arg1: i32) -> (i32, i32, i32, i32) {
    %c0_i32 = arith.constant 0 : i32
    %c0_i32_0 = arith.constant 0 : i32
    %c0_i32_1 = arith.constant 0 : i32
    return %arg0, %arg1, %c0_i32, %c0_i32_0 : i32, i32, i32, i32
  }
}

</mosaic_0001>

<bundles_post_ra>
// kernel: conv_block_forward.5
= control target key start
LH: loop header
LB: loop body
LE: loop exit
PB: predicated region body
PF: predicated region fallthrough
CT: control target
= control target key end

     0   :  { %s568_s12 = smov 0   ;;  %s570_s13 = smov 0   ;;  %s743_s0 = inlined_call_operand.vmem [shape: f32[2,16,16,128], index: 0, kind: input, shape index: {}]   ;;  %s744_s1 = inlined_call_operand.vmem [shape: f32[1,128], index: 1, kind: input, shape index: {}]   ;;  %s745_s2 = inlined_call_operand.vmem [shape: f32[1,128], index: 2, kind: input, shape index: {}]   ;;  %s746_s3 = inlined_call_operand.vmem [shape: f32[2,16,16,128], index: 3, kind: output, shape index: {}]  }
   0x1   :  { %s572_s14 = smov 0  }
   0x2 LB: > { %s25_s15 = sadd.s32 1, %s542_s13  ;;  %p489_p0 = scmp.ge.s32.totalorder %s546_s14, 1  ;;  %s546_s14 = sphi %s572_s14, %s13_s14   ;;  %s542_s13 = sphi %s570_s13, %s748_s13   ;;  %s538_s12 = sphi %s568_s12, %s747_s12  }
   0x3   : > { %p27_p1 = scmp.ge.s32.totalorder %s25_s15, 2  ;;  %p159_p2 = scmp.lt.s32.totalorder %s546_s14, 3 }
   0x5   : > { %s750_s15 = smov (%p27_p1, %s25_s15), 0  ;;  %p160_p3 = pnand %p489_p0, %p159_p2 }
   0x6   : > { %p194_p4 = scmp.lt.s32.totalorder (!%p160_p3), %s538_s12, 1  ;;  %v589_v0 = vld [vmem:[%s744_s1] ss:$0 sm:$0xff] (!%p160_p3) }
   0x7   : > { %163 = sbr.rel (%p160_p3) target bundleno = 47 (0x2f), region = 32  ;;  %v599_v1 = vld [vmem:[%s745_s2] ss:$0 sm:$0xff] (!%p160_p3) }
   0xe   : > { %s752_s12 = smov (!%p194_p4, %s538_s12), 1 }
   0xf   : > { %s498_s16 = sshll.u32 %s752_s12, 8 }
  0x10   : > { %s594_s21 = scalar_lea.vmem %s743_s0, %s498_s16  ;;  %s622_s26 = scalar_lea.vmem %s746_s3, %s498_s16 }
  0x11   : > { %v215_v2 = vld [vmem:[%s594_s21] sm:$0xff]  ;;  %v216_v3 = vld [vmem:[%s594_s21 + $0x8] sm:$0xff]  ;;  %v217_v4 = vld [vmem:[%s594_s21 + $0x10] sm:$0xff] }
  0x12   : > { %v254_v5 = vmul.f32 %v589_v0, %v215_v2  ;;  %v255_v6 = vmul.f32 %v589_v0, %v216_v3  ;;  %v256_v7 = vmul.f32 %v589_v0, %v217_v4  ;;  %v218_v8 = vld [vmem:[%s594_s21 + $0x18] sm:$0xff]  ;;  %v219_v9 = vld [vmem:[%s594_s21 + $0x20] sm:$0xff]  ;;  %v220_v10 = vld [vmem:[%s594_s21 + $0x28] sm:$0xff] }
  0x13   : > { %v257_v11 = vmul.f32 %v589_v0, %v218_v8  ;;  %v258_v12 = vmul.f32 %v589_v0, %v219_v9  ;;  %v259_v13 = vmul.f32 %v589_v0, %v220_v10  ;;  %v221_v14 = vld [vmem:[%s594_s21 + $0x30] sm:$0xff]  ;;  %v222_v15 = vld [vmem:[%s594_s21 + $0x38] sm:$0xff]  ;;  %v223_v24 = vld [vmem:[%s594_s21 + $0x40] sm:$0xff] }
  0x14   : > { %v293_v16 = vadd.f32 %v599_v1, %v254_v5  ;;  %v294_v17 = vadd.f32 %v599_v1, %v255_v6  ;;  %v295_v18 = vadd.f32 %v599_v1, %v256_v7  ;;  %v260_v19 = vmul.f32 %v589_v0, %v221_v14  ;;  %v224_v25 = vld [vmem:[%s594_s21 + $0x48] sm:$0xff]  ;;  %v225_v26 = vld [vmem:[%s594_s21 + $0x50] sm:$0xff]  ;;  %v226_v31 = vld [vmem:[%s594_s21 + $0x58] sm:$0xff] }
  0x15   : > { %v296_v20 = vadd.f32 %v599_v1, %v257_v11  ;;  %v297_v21 = vadd.f32 %v599_v1, %v258_v12  ;;  %v298_v22 = vadd.f32 %v599_v1, %v259_v13  ;;  %v261_v23 = vmul.f32 %v589_v0, %v222_v15  ;;  %v227_v32 = vld [vmem:[%s594_s21 + $0x60] sm:$0xff]  ;;  %v228_v33 = vld [vmem:[%s594_s21 + $0x68] sm:$0xff]  ;;  %v229_v38 = vld [vmem:[%s594_s21 + $0x70] sm:$0xff] }
  0x16   : > { %v325_v27 = vmax.f32 %v293_v16, 0.0  ;;  %v326_v28 = vmax.f32 %v294_v17, 0.0  ;;  %v327_v29 = vmax.f32 %v295_v18, 0.0  ;;  %v299_v30 = vadd.f32 %v599_v1, %v260_v19  ;;  %v230_v43 = vld [vmem:[%s594_s21 + $0x78] sm:$0xff]  ;;  %v231_v56 = vld [vmem:[%s594_s21 + $0x80] sm:$0xff]  ;;  %v232_v57 = vld [vmem:[%s594_s21 + $0x88] sm:$0xff] }
  0x17   : > { %v328_v34 = vmax.f32 %v296_v20, 0.0  ;;  %v329_v35 = vmax.f32 %v297_v21, 0.0  ;;  %v330_v36 = vmax.f32 %v298_v22, 0.0  ;;  %v300_v37 = vadd.f32 %v599_v1, %v261_v23  ;;  %v233_v58 = vld [vmem:[%s594_s21 + $0x90] sm:$0xff]  ;;  %v234_v63 = vld [vmem:[%s594_s21 + $0x98] sm:$0xff]  ;;  %v235_v2 = vld [vmem:[%s594_s21 + $0xa0] sm:$0xff] }
  0x18   : > { %357 = vst [vmem:[%s622_s26] sm:$0xff] %v325_v27  ;;  %358 = vst [vmem:[%s622_s26 + $0x8] sm:$0xff] %v326_v28  ;;  %v331_v39 = vmax.f32 %v299_v30, 0.0  ;;  %v262_v40 = vmul.f32 %v589_v0, %v223_v24  ;;  %v263_v41 = vmul.f32 %v589_v0, %v224_v25  ;;  %v264_v42 = vmul.f32 %v589_v0, %v225_v26  ;;  %v236_v3 = vld [vmem:[%s594_s21 + $0xa8] sm:$0xff]  ;;  %v237_v8 = vld [vmem:[%s594_s21 + $0xb0] sm:$0xff] }
  0x19   : > { %359 = vst [vmem:[%s622_s26 + $0x10] sm:$0xff] %v327_v29  ;;  %360 = vst [vmem:[%s622_s26 + $0x18] sm:$0xff] %v328_v34  ;;  %v332_v44 = vmax.f32 %v300_v37, 0.0  ;;  %v265_v45 = vmul.f32 %v589_v0, %v226_v31  ;;  %v266_v46 = vmul.f32 %v589_v0, %v227_v32  ;;  %v267_v47 = vmul.f32 %v589_v0, %v228_v33  ;;  %v238_v13 = vld [vmem:[%s594_s21 + $0xb8] sm:$0xff]  ;;  %v239_v26 = vld [vmem:[%s594_s21 + $0xc0] sm:$0xff] }
  0x1a   : > { %361 = vst [vmem:[%s622_s26 + $0x20] sm:$0xff] %v329_v35  ;;  %362 = vst [vmem:[%s622_s26 + $0x28] sm:$0xff] %v330_v36  ;;  %v301_v48 = vadd.f32 %v599_v1, %v262_v40  ;;  %v302_v49 = vadd.f32 %v599_v1, %v263_v41  ;;  %v303_v50 = vadd.f32 %v599_v1, %v264_v42  ;;  %v240_v27 = vld [vmem:[%s594_s21 + $0xc8] sm:$0xff]  ;;  %v241_v28 = vld [vmem:[%s594_s21 + $0xd0] sm:$0xff] }
  0x1b   : > { %363 = vst [vmem:[%s622_s26 + $0x30] sm:$0xff] %v331_v39  ;;  %v268_v51 = vmul.f32 %v589_v0, %v229_v38  ;;  %364 = vst [vmem:[%s622_s26 + $0x38] sm:$0xff] %v332_v44  ;;  %v304_v52 = vadd.f32 %v599_v1, %v265_v45  ;;  %v305_v53 = vadd.f32 %v599_v1, %v266_v46  ;;  %v242_v33 = vld [vmem:[%s594_s21 + $0xd8] sm:$0xff]  ;;  %v243_v34 = vld [vmem:[%s594_s21 + $0xe0] sm:$0xff] }
  0x1c   : > { %v306_v54 = vadd.f32 %v599_v1, %v267_v47  ;;  %v269_v55 = vmul.f32 %v589_v0, %v230_v43  ;;  %v333_v59 = vmax.f32 %v301_v48, 0.0  ;;  %v334_v60 = vmax.f32 %v302_v49, 0.0  ;;  %v244_v35 = vld [vmem:[%s594_s21 + $0xe8] sm:$0xff]  ;;  %v245_v40 = vld [vmem:[%s594_s21 + $0xf0] sm:$0xff]  ;;  %v246_v45 = vld [vmem:[%s594_s21 + $0xf8] sm:$0xff] }
  0x1d   : > { %v335_v61 = vmax.f32 %v303_v50, 0.0  ;;  %v307_v62 = vadd.f32 %v599_v1, %v268_v51  ;;  %v336_v4 = vmax.f32 %v304_v52, 0.0  ;;  %v337_v5 = vmax.f32 %v305_v53, 0.0 }
  0x1e   : > { %v338_v6 = vmax.f32 %v306_v54, 0.0  ;;  %v308_v7 = vadd.f32 %v599_v1, %v269_v55  ;;  %365 = vst [vmem:[%s622_s26 + $0x40] sm:$0xff] %v333_v59  ;;  %366 = vst [vmem:[%s622_s26 + $0x48] sm:$0xff] %v334_v60  ;;  %v270_v10 = vmul.f32 %v589_v0, %v231_v56  ;;  %v271_v11 = vmul.f32 %v589_v0, %v232_v57 }
  0x1f   : > { %367 = vst [vmem:[%s622_s26 + $0x50] sm:$0xff] %v335_v61  ;;  %v339_v9 = vmax.f32 %v307_v62, 0.0  ;;  %v272_v12 = vmul.f32 %v589_v0, %v233_v58  ;;  %368 = vst [vmem:[%s622_s26 + $0x58] sm:$0xff] %v336_v4  ;;  %v273_v15 = vmul.f32 %v589_v0, %v234_v63  ;;  %v274_v16 = vmul.f32 %v589_v0, %v235_v2 }
  0x20   : > { %369 = vst [vmem:[%s622_s26 + $0x60] sm:$0xff] %v337_v5  ;;  %370 = vst [vmem:[%s622_s26 + $0x68] sm:$0xff] %v338_v6  ;;  %v340_v14 = vmax.f32 %v308_v7, 0.0  ;;  %v275_v17 = vmul.f32 %v589_v0, %v236_v3  ;;  %v309_v18 = vadd.f32 %v599_v1, %v270_v10  ;;  %v310_v19 = vadd.f32 %v599_v1, %v271_v11 }
  0x21   : > { %371 = vst [vmem:[%s622_s26 + $0x70] sm:$0xff] %v339_v9  ;;  %v311_v20 = vadd.f32 %v599_v1, %v272_v12  ;;  %v276_v21 = vmul.f32 %v589_v0, %v237_v8  ;;  %v312_v22 = vadd.f32 %v599_v1, %v273_v15  ;;  %v313_v23 = vadd.f32 %v599_v1, %v274_v16 }
  0x22   : > { %372 = vst [vmem:[%s622_s26 + $0x78] sm:$0xff] %v340_v14  ;;  %v314_v24 = vadd.f32 %v599_v1, %v275_v17  ;;  %v277_v25 = vmul.f32 %v589_v0, %v238_v13  ;;  %v341_v29 = vmax.f32 %v309_v18, 0.0  ;;  %v342_v30 = vmax.f32 %v310_v19, 0.0 }
  0x23   : > { %v343_v31 = vmax.f32 %v311_v20, 0.0  ;;  %v315_v32 = vadd.f32 %v599_v1, %v276_v21  ;;  %v344_v36 = vmax.f32 %v312_v22, 0.0  ;;  %v345_v37 = vmax.f32 %v313_v23, 0.0 }
  0x24   : > { %v346_v38 = vmax.f32 %v314_v24, 0.0  ;;  %v316_v39 = vadd.f32 %v599_v1, %v277_v25  ;;  %373 = vst [vmem:[%s622_s26 + $0x80] sm:$0xff] %v341_v29  ;;  %374 = vst [vmem:[%s622_s26 + $0x88] sm:$0xff] %v342_v30  ;;  %v278_v42 = vmul.f32 %v589_v0, %v239_v26  ;;  %v279_v43 = vmul.f32 %v589_v0, %v240_v27 }
  0x25   : > { %375 = vst [vmem:[%s622_s26 + $0x90] sm:$0xff] %v343_v31  ;;  %v347_v41 = vmax.f32 %v315_v32, 0.0  ;;  %v280_v44 = vmul.f32 %v589_v0, %v241_v28  ;;  %376 = vst [vmem:[%s622_s26 + $0x98] sm:$0xff] %v344_v36  ;;  %v281_v47 = vmul.f32 %v589_v0, %v242_v33  ;;  %v282_v48 = vmul.f32 %v589_v0, %v243_v34 }
  0x26   : > { %377 = vst [vmem:[%s622_s26 + $0xa0] sm:$0xff] %v345_v37  ;;  %378 = vst [vmem:[%s622_s26 + $0xa8] sm:$0xff] %v346_v38  ;;  %v348_v46 = vmax.f32 %v316_v39, 0.0  ;;  %v283_v49 = vmul.f32 %v589_v0, %v244_v35  ;;  %v317_v50 = vadd.f32 %v599_v1, %v278_v42  ;;  %v318_v51 = vadd.f32 %v599_v1, %v279_v43 }
  0x27   : > { %379 = vst [vmem:[%s622_s26 + $0xb0] sm:$0xff] %v347_v41  ;;  %v319_v52 = vadd.f32 %v599_v1, %v280_v44  ;;  %v284_v53 = vmul.f32 %v589_v0, %v245_v40  ;;  %v320_v54 = vadd.f32 %v599_v1, %v281_v47  ;;  %v321_v55 = vadd.f32 %v599_v1, %v282_v48 }
  0x28   : > { %380 = vst [vmem:[%s622_s26 + $0xb8] sm:$0xff] %v348_v46  ;;  %v322_v56 = vadd.f32 %v599_v1, %v283_v49  ;;  %v285_v57 = vmul.f32 %v589_v0, %v246_v45  ;;  %v349_v58 = vmax.f32 %v317_v50, 0.0  ;;  %v350_v59 = vmax.f32 %v318_v51, 0.0 }
  0x29   : > { %v351_v60 = vmax.f32 %v319_v52, 0.0  ;;  %v323_v61 = vadd.f32 %v599_v1, %v284_v53  ;;  %v352_v62 = vmax.f32 %v320_v54, 0.0  ;;  %v353_v63 = vmax.f32 %v321_v55, 0.0 }
  0x2a   : > { %v354_v2 = vmax.f32 %v322_v56, 0.0  ;;  %v324_v3 = vadd.f32 %v599_v1, %v285_v57  ;;  %381 = vst [vmem:[%s622_s26 + $0xc0] sm:$0xff] %v349_v58  ;;  %382 = vst [vmem:[%s622_s26 + $0xc8] sm:$0xff] %v350_v59 }
  0x2b   : > { %383 = vst [vmem:[%s622_s26 + $0xd0] sm:$0xff] %v351_v60  ;;  %v355_v4 = vmax.f32 %v323_v61, 0.0  ;;  %384 = vst [vmem:[%s622_s26 + $0xd8] sm:$0xff] %v352_v62 }
  0x2c   : > { %385 = vst [vmem:[%s622_s26 + $0xe0] sm:$0xff] %v353_v63  ;;  %386 = vst [vmem:[%s622_s26 + $0xe8] sm:$0xff] %v354_v2  ;;  %v356_v0 = vmax.f32 %v324_v3, 0.0 }
  0x2d   : > { %387 = vst [vmem:[%s622_s26 + $0xf0] sm:$0xff] %v355_v4 }
  0x2e   : > { %388 = vst [vmem:[%s622_s26 + $0xf8] sm:$0xff] %v356_v0 }
  0x2f PF: > { %s13_s14 = sadd.s32 1, %s546_s14   ;;  %s747_s12 = smov %s542_s13 }
  0x30   : > { %p10_p5 = scmp.ge.s32.totalorder %s13_s14, 4   ;;  %s748_s13 = smov %s750_s15 }
  0x32   :  { %12 = sbr.rel (!%p10_p5) target bundleno = 2 (0x2), region = 62 }

// kernel: conv_block_forward.3
= control target key start
LH: loop header
LB: loop body
LE: loop exit
PB: predicated region body
PF: predicated region fallthrough
CT: control target
= control target key end

     0   :  { %s5417_s21 = smov 0   ;;  %s5419_s0 = smov 0   ;;  %s6456_s0 = inlined_call_operand.vmem [shape: f32[1,128], index: 0, kind: input, shape index: {}]   ;;  %s6457_s1 = inlined_call_operand.vmem [shape: f32[1,128], index: 1, kind: input, shape index: {}]   ;;  %s6458_s2 = inlined_call_operand.vmem [shape: f32[9,128,128], index: 2, kind: input, shape index: {}]   ;;  %s6459_s3 = inlined_call_operand.vmem [shape: f32[1,128], index: 3, kind: input, shape index: {}]   ;;  %s6460_s4 = inlined_call_operand.vmem [shape: f32[2,18,18,128], index: 4, kind: input, shape index: {}]   ;;  %s6461_s5 = inlined_call_operand.vmem [shape: f32[2,16,16,128], index: 5, kind: output, shape index: {0}]   ;;  %s6462_s6 = inlined_call_operand.vmem [shape: f32[2,1,2,128], index: 6, kind: output, shape index: {1}]  }
   0x1   :  { %s5421_s1 = smov 0  }
   0x2 LB: > { %s29_s22 = sadd.s32 1, %s5376_s0  ;;  %p3465_p0 = scmp.ge.s32.totalorder %s5380_s1, 1  ;;  %s5380_s1 = sphi %s5421_s1, %s17_s1   ;;  %s5376_s0 = sphi %s5419_s0, %s6564_s0   ;;  %s5372_s21 = sphi %s5417_s21, %s6563_s21  }
   0x3   : > { %p31_p1 = scmp.ge.s32.totalorder %s29_s22, 2  ;;  %p197_p2 = scmp.lt.s32.totalorder %s5380_s1, 3 }
   0x5   : > { %s6566_s22 = smov (%p31_p1, %s29_s22), 0  ;;  %p198_p3 = pnand %p3465_p0, %p197_p2 }
   0x7   : > { %201 = sbr.rel (%p198_p3) target bundleno = 607 (0x25f), region = 36 }
   0xe   : > { %p233_p4 = scmp.lt.s32.totalorder %s5372_s21, 1  ;;  %s252_s23 = smul.u32 432, %s5372_s21 }
  0x10   : > { %s6568_s21 = smov (!%p233_p4, %s5372_s21), 1  ;;  %s5438_s26 = scalar_lea.vmem %s6460_s4, %s252_s23 }
  0x11   : > { %s3619_s27 = sshll.u32 %s6568_s21, 8  ;;  %s3468_s28 = sshll.u32 %s6568_s21, 1  ;;  %v326_v0 = vld [vmem:[%s5438_s26] sm:$0xff]  ;;  %v328_v1 = vld [vmem:[%s5438_s26 + $0x8] sm:$0xff]  ;;  %v330_v2 = vld [vmem:[%s5438_s26 + $0x18] sm:$0xff] }
  0x12   : > { %s5446_s7 = scalar_lea.vmem %s6461_s5, %s3619_s27  ;;  %s5451_s10 = scalar_lea.vmem %s6462_s6, %s3468_s28  ;;  %327 = vst [vmem:[#allocation2] sm:$0xff] %v326_v0  ;;  %329 = vst [vmem:[#allocation2 + $0x8] sm:$0xff] %v328_v1  ;;  %v332_v3 = vld [vmem:[%s5438_s26 + $0x20] sm:$0xff]  ;;  %v334_v4 = vld [vmem:[%s5438_s26 + $0x30] sm:$0xff] }
  0x13   : > { %331 = vst [vmem:[#allocation2 + $0x18] sm:$0xff] %v330_v2  ;;  %v336_v5 = vld [vmem:[%s5438_s26 + $0x38] sm:$0xff]  ;;  %333 = vst [vmem:[#allocation2 + $0x20] sm:$0xff] %v332_v3  ;;  %v338_v6 = vld [vmem:[%s5438_s26 + $0x48] sm:$0xff] }
  0x14   : > { %335 = vst [vmem:[#allocation2 + $0x30] sm:$0xff] %v334_v4  ;;  %337 = vst [vmem:[#allocation2 + $0x38] sm:$0xff] %v336_v5  ;;  %v340_v7 = vld [vmem:[%s5438_s26 + $0x50] sm:$0xff]  ;;  %v342_v8 = vld [vmem:[%s5438_s26 + $0x60] sm:$0xff] }
  0x15   : > { %339 = vst [vmem:[#allocation2 + $0x48] sm:$0xff] %v338_v6  ;;  %341 = vst [vmem:[#allocation2 + $0x50] sm:$0xff] %v340_v7  ;;  %v344_v9 = vld [vmem:[%s5438_s26 + $0x68] sm:$0xff]  ;;  %v346_v10 = vld [vmem:[%s5438_s26 + $0x78] sm:$0xff] }
  0x16   : > { %343 = vst [vmem:[#allocation2 + $0x60] sm:$0xff] %v342_v8  ;;  %v348_v11 = vld [vmem:[%s5438_s26 + $0x80] sm:$0xff]  ;;  %345 = vst [vmem:[#allocation2 + $0x68] sm:$0xff] %v344_v9  ;;  %v350_v12 = vld [vmem:[%s5438_s26 + $0x90] sm:$0xff] }
  0x17   : > { %347 = vst [vmem:[#allocation2 + $0x78] sm:$0xff] %v346_v10  ;;  %349 = vst [vmem:[#allocation2 + $0x80] sm:$0xff] %v348_v11  ;;  %v352_v13 = vld [vmem:[%s5438_s26 + $0x98] sm:$0xff]  ;;  %v354_v14 = vld [vmem:[%s5438_s26 + $0xa8] sm:$0xff] }
  0x18   : > { %351 = vst [vmem:[#allocation2 + $0x90] sm:$0xff] %v350_v12  ;;  %353 = vst [vmem:[#allocation2 + $0x98] sm:$0xff] %v352_v13  ;;  %v356_v15 = vld [vmem:[%s5438_s26 + $0xb0] sm:$0xff]  ;;  %v358_v16 = vld [vmem:[%s5438_s26 + $0xc0] sm:$0xff] }
  0x19   : > { %355 = vst [vmem:[#allocation2 + $0xa8] sm:$0xff] %v354_v14  ;;  %v360_v17 = vld [vmem:[%s5438_s26 + $0xc8] sm:$0xff]  ;;  %357 = vst [vmem:[#allocation2 + $0xb0] sm:$0xff] %v356_v15  ;;  %v362_v18 = vld [vmem:[%s5438_s26 + $0xd8] sm:$0xff] }
  0x1a   : > { %359 = vst [vmem:[#allocation2 + $0xc0] sm:$0xff] %v358_v16  ;;  %361 = vst [vmem:[#allocation2 + $0xc8] sm:$0xff] %v360_v17  ;;  %v364_v19 = vld [vmem:[%s5438_s26 + $0xe0] sm:$0xff]  ;;  %v366_v20 = vld [vmem:[%s5438_s26 + $0xf0] sm:$0xff] }
  0x1b   : > { %363 = vst [vmem:[#allocation2 + $0xd8] sm:$0xff] %v362_v18  ;;  %365 = vst [vmem:[#allocation2 + $0xe0] sm:$0xff] %v364_v19  ;;  %v368_v21 = vld [vmem:[%s5438_s26 + $0xf8] sm:$0xff]  ;;  %v370_v22 = vld [vmem:[%s5438_s26 + $0x108] sm:$0xff] }
  0x1c   : > { %367 = vst [vmem:[#allocation2 + $0xf0] sm:$0xff] %v366_v20  ;;  %v372_v23 = vld [vmem:[%s5438_s26 + $0x110] sm:$0xff]  ;;  %369 = vst [vmem:[#allocation2 + $0xf8] sm:$0xff] %v368_v21  ;;  %v374_v24 = vld [vmem:[%s5438_s26 + $0x120] sm:$0xff] }
  0x1d   : > { %371 = vst [vmem:[#allocation2 + $0x108] sm:$0xff] %v370_v22  ;;  %373 = vst [vmem:[#allocation2 + $0x110] sm:$0xff] %v372_v23  ;;  %v376_v25 = vld [vmem:[%s5438_s26 + $0x128] sm:$0xff]  ;;  %v378_v26 = vld [vmem:[%s5438_s26 + $0x138] sm:$0xff] }
  0x1e   : > { %375 = vst [vmem:[#allocation2 + $0x120] sm:$0xff] %v374_v24  ;;  %377 = vst [vmem:[#allocation2 + $0x128] sm:$0xff] %v376_v25  ;;  %v380_v27 = vld [vmem:[%s5438_s26 + $0x140] sm:$0xff]  ;;  %v382_v28 = vld [vmem:[%s5438_s26 + $0x150] sm:$0xff] }
  0x1f   : > { %379 = vst [vmem:[#allocation2 + $0x138] sm:$0xff] %v378_v26  ;;  %v384_v29 = vld [vmem:[%s5438_s26 + $0x158] sm:$0xff]  ;;  %381 = vst [vmem:[#allocation2 + $0x140] sm:$0xff] %v380_v27  ;;  %v386_v30 = vld [vmem:[%s5438_s26 + $0x168] sm:$0xff] }
  0x20   : > { %383 = vst [vmem:[#allocation2 + $0x150] sm:$0xff] %v382_v28  ;;  %385 = vst [vmem:[#allocation2 + $0x158] sm:$0xff] %v384_v29  ;;  %v388_v31 = vld [vmem:[%s5438_s26 + $0x170] sm:$0xff]  ;;  %v390_v32 = vld [vmem:[%s5438_s26 + $0x180] sm:$0xff] }
  0x21   : > { %387 = vst [vmem:[#allocation2 + $0x168] sm:$0xff] %v386_v30  ;;  %389 = vst [vmem:[#allocation2 + $0x170] sm:$0xff] %v388_v31  ;;  %v392_v33 = vld [vmem:[%s5438_s26 + $0x188] sm:$0xff]  ;;  %v394_v34 = vld [vmem:[%s5438_s26 + $0x198] sm:$0xff] }
  0x22   : > { %391 = vst [vmem:[#allocation2 + $0x180] sm:$0xff] %v390_v32  ;;  %v396_v35 = vld [vmem:[%s5438_s26 + $0x1a0] sm:$0xff]  ;;  %393 = vst [vmem:[#allocation2 + $0x188] sm:$0xff] %v392_v33  ;;  %v3469_v36 = vld [vmem:[%s5438_s26 + $0x10] sm:$0x3] }
  0x23   : > { %395 = vst [vmem:[#allocation2 + $0x198] sm:$0xff] %v394_v34  ;;  %397 = vst [vmem:[#allocation2 + $0x1a0] sm:$0xff] %v396_v35  ;;  %v3470_v37 = vld [vmem:[%s5438_s26 + $0x28] sm:$0x3]  ;;  %v3471_v38 = vld [vmem:[%s5438_s26 + $0x40] sm:$0x3] }
  0x24   : > { %408 = vst [vmem:[#allocation2 + $0x10] sm:$0x3] %v3469_v36  ;;  %410 = vst [vmem:[#allocation2 + $0x28] sm:$0x3] %v3470_v37  ;;  %v3472_v39 = vld [vmem:[%s5438_s26 + $0x58] sm:$0x3] }
  0x25   : > { %412 = vst [vmem:[#allocation2 + $0x40] sm:$0x3] %v3471_v38  ;;  %v3473_v40 = vld [vmem:[%s5438_s26 + $0x70] sm:$0x3]  ;;  %v3474_v41 = vld [vmem:[%s5438_s26 + $0x88] sm:$0x3] }
  0x26   : > { %414 = vst [vmem:[#allocation2 + $0x58] sm:$0x3] %v3472_v39  ;;  %416 = vst [vmem:[#allocation2 + $0x70] sm:$0x3] %v3473_v40  ;;  %v3475_v42 = vld [vmem:[%s5438_s26 + $0xa0] sm:$0x3] }
  0x27   : > { %418 = vst [vmem:[#allocation2 + $0x88] sm:$0x3] %v3474_v41  ;;  %v3476_v43 = vld [vmem:[%s5438_s26 + $0xb8] sm:$0x3]  ;;  %v3477_v44 = vld [vmem:[%s5438_s26 + $0xd0] sm:$0x3] }
  0x28   : > { %420 = vst [vmem:[#allocation2 + $0xa0] sm:$0x3] %v3475_v42  ;;  %422 = vst [vmem:[#allocation2 + $0xb8] sm:$0x3] %v3476_v43  ;;  %v3478_v45 = vld [vmem:[%s5438_s26 + $0xe8] sm:$0x3] }
  0x29   : > { %424 = vst [vmem:[#allocation2 + $0xd0] sm:$0x3] %v3477_v44  ;;  %v3479_v46 = vld [vmem:[%s5438_s26 + $0x100] sm:$0x3]  ;;  %v3480_v47 = vld [vmem:[%s5438_s26 + $0x118] sm:$0x3] }
  0x2a   : > { %426 = vst [vmem:[#allocation2 + $0xe8] sm:$0x3] %v3478_v45  ;;  %428 = vst [vmem:[#allocation2 + $0x100] sm:$0x3] %v3479_v46  ;;  %v3481_v48 = vld [vmem:[%s5438_s26 + $0x130] sm:$0x3] }
  0x2b   : > { %430 = vst [vmem:[#allocation2 + $0x118] sm:$0x3] %v3480_v47  ;;  %v3482_v49 = vld [vmem:[%s5438_s26 + $0x148] sm:$0x3]  ;;  %v3483_v50 = vld [vmem:[%s5438_s26 + $0x160] sm:$0x3] }
  0x2c   : > { %432 = vst [vmem:[#allocation2 + $0x130] sm:$0x3] %v3481_v48  ;;  %434 = vst [vmem:[#allocation2 + $0x148] sm:$0x3] %v3482_v49  ;;  %v3484_v51 = vld [vmem:[%s5438_s26 + $0x178] sm:$0x3] }
  0x2d   : > { %436 = vst [vmem:[#allocation2 + $0x160] sm:$0x3] %v3483_v50  ;;  %v3485_v52 = vld [vmem:[%s5438_s26 + $0x190] sm:$0x3]  ;;  %v3486_v53 = vld [vmem:[%s5438_s26 + $0x1a8] sm:$0x3] }
  0x2e   : > { %438 = vst [vmem:[#allocation2 + $0x178] sm:$0x3] %v3484_v51  ;;  %440 = vst [vmem:[#allocation2 + $0x190] sm:$0x3] %v3485_v52 }
  0x2f   : > { %442 = vst [vmem:[#allocation2 + $0x1a8] sm:$0x3] %v3486_v53 }
  0x30   : > { %446 = vsyncadd [#allocation3], 5184 }
  0x31   : > { %5368 = dma.done.wait [#allocation3], 5184 }
  0x32   : > { %5369 = vsyncadd [#allocation3], 4294962112  ;;  %v3487_v54 = vld [vmem:[%s6458_s2 + $0x80] sm:$0xff]  ;;  %v3488_v55 = vld [vmem:[%s6458_s2 + $0x88] sm:$0xff]  ;;  %vm3319_vm0 = vcmask 1040384  }
  0x33   : > { %v3535_v56 = vld [vmem:[%s6458_s2 + $0x200] sm:$0xff]  ;;  %v4772_v57 = vpack.c.bf16 %v3488_v55, %v3487_v54  ;;  %v3536_v58 = vld [vmem:[%s6458_s2 + $0x208] sm:$0xff]  ;;  %v3489_v59 = vld [vmem:[%s6458_s2 + $0x90] sm:$0xff] }
  0x34   : > { %v3490_v60 = vld [vmem:[%s6458_s2 + $0x98] sm:$0xff]  ;;  %v5522_v61 = vpack.c.bf16 %v3536_v58, %v3535_v56  ;;  %v3537_v63 = vld [vmem:[%s6458_s2 + $0x210] sm:$0xff]  ;;  %v3491_v1 = vld [vmem:[%s6458_s2 + $0xa0] sm:$0xff] }
  0x35   : > { %v4776_v62 = vpack.c.bf16 %v3490_v60, %v3489_v59  ;;  %v3538_v0 = vld [vmem:[%s6458_s2 + $0x218] sm:$0xff]  ;;  %4773 = vmatprep.subr.bf16.mxu1 %v4772_v57  ;;  %v3492_v3 = vld [vmem:[%s6458_s2 + $0xa8] sm:$0xff]  ;;  %v3539_v4 = vld [vmem:[%s6458_s2 + $0x220] sm:$0xff] }
  0x36   : > { %v5533_v2 = vpack.c.bf16 %v3538_v0, %v3537_v63  ;;  %v3540_v5 = vld [vmem:[%s6458_s2 + $0x228] sm:$0xff]  ;;  %4901 = vmatprep.subr.bf16.mxu0 %v5522_v61  ;;  %4775 = vmatpush3.bf16.msra.mxu1 %v4772_v57  ;;  %v4780_v6 = vpack.c.bf16 %v3492_v3, %v3491_v1  ;;  %v3493_v8 = vld [vmem:[%s6458_s2 + $0xb0] sm:$0xff]  ;;  %v3494_v9 = vld [vmem:[%s6458_s2 + $0xb8] sm:$0xff] }
  0x37   : > { %4903 = vmatpush3.bf16.msra.mxu0 %v5522_v61  ;;  %4777 = vmatprep.subr.bf16.mxu1 %v4776_v62  ;;  %v5547_v7 = vpack.c.bf16 %v3540_v5, %v3539_v4  ;;  %v3541_v10 = vld [vmem:[%s6458_s2 + $0x230] sm:$0xff]  ;;  %v3542_v11 = vld [vmem:[%s6458_s2 + $0x238] sm:$0xff]  ;;  %v4784_v12 = vpack.c.bf16 %v3494_v9, %v3493_v8  ;;  %v3495_v14 = vld [vmem:[%s6458_s2 + $0xc0] sm:$0xff] }
  0x38   : > { %6501 = vst [vmem:[#allocation6_spill] sm:$0xff] %v5533_v2  ;;  %4905 = vmatprep.subr.bf16.mxu0 %v5533_v2  ;;  %v5563_v13 = vpack.c.bf16 %v3542_v11, %v3541_v10  ;;  %v3496_v15 = vld [vmem:[%s6458_s2 + $0xc8] sm:$0xff]  ;;  %v3543_v17 = vld [vmem:[%s6458_s2 + $0x240] sm:$0xff]  ;;  %v3497_v22 = vld [vmem:[%s6458_s2 + $0xd0] sm:$0xff] }
  0x39   : > { %6502 = vst [vmem:[#allocation7_spill] sm:$0xff] %v5547_v7  ;;  %v499_v16 = vld [vmem:[#allocation2 + $0x1] sm:$0xff]  ;;  %v5577_v19 = vld [vmem:[#allocation2 + $0x19] sm:$0xff]  ;;  %v4788_v20 = vpack.c.bf16 %v3496_v15, %v3495_v14  ;;  %v3545_v24 = vld [vmem:[%s6458_s2 + $0x250] sm:$0xff] }
  0x3a   : > { %4779 = vmatpush3.bf16.msra.mxu1 %v4776_v62  ;;  %6503 = vst [vmem:[#allocation8_spill] sm:$0xff] %v5563_v13  ;;  %v3544_v18 = vld [vmem:[%s6458_s2 + $0x248] sm:$0xff]  ;;  %4084 = vmatprep.mubr.f32.mxu1 %v499_v16  ;;  %v3498_v23 = vld [vmem:[%s6458_s2 + $0xd8] sm:$0xff]  ;;  %v3499_v28 = vld [vmem:[%s6458_s2 + $0xe0] sm:$0xff] }
  0x3b   : > { %4907 = vmatpush3.bf16.msra.mxu0 %v5533_v2  ;;  %4781 = vmatprep.subr.bf16.mxu1 %v4780_v6  ;;  %v5582_v21 = vpack.c.bf16 %v3544_v18, %v3543_v17  ;;  %v3546_v25 = vld [vmem:[%s6458_s2 + $0x258] sm:$0xff]  ;;  %v4792_v26 = vpack.c.bf16 %v3498_v23, %v3497_v22  ;;  %v3500_v29 = vld [vmem:[%s6458_s2 + $0xe8] sm:$0xff]  ;;  %v3547_v30 = vld [vmem:[%s6458_s2 + $0x260] sm:$0xff] }
  0x3c   : > { %4909 = vmatprep.subr.bf16.mxu0 %v5547_v7  ;;  %4404 = vmatprep.mubr.f32.mxu0 %v5577_v19  ;;  %v5598_v27 = vpack.c.bf16 %v3546_v25, %v3545_v24  ;;  %v3548_v31 = vld [vmem:[%s6458_s2 + $0x268] sm:$0xff]  ;;  %v4796_v32 = vpack.c.bf16 %v3500_v29, %v3499_v28  ;;  %v3501_v34 = vld [vmem:[%s6458_s2 + $0xf0] sm:$0xff]  ;;  %v3502_v35 = vld [vmem:[%s6458_s2 + $0xf8] sm:$0xff] }
  0x3d   : > { %6504 = vst [vmem:[#allocation9_spill] sm:$0xff] %v5582_v21  ;;  %v5614_v33 = vpack.c.bf16 %v3548_v31, %v3547_v30  ;;  %v3549_v36 = vld [vmem:[%s6458_s2 + $0x270] sm:$0xff]  ;;  %v3550_v37 = vld [vmem:[%s6458_s2 + $0x278] sm:$0xff]  ;;  %v4800_v38 = vpack.c.bf16 %v3502_v35, %v3501_v34  ;;  %v483_v40 = vld [vmem:[%s6458_s2] sm:$0xff] }
  0x3e   : > { %4783 = vmatpush3.bf16.msra.mxu1 %v4780_v6  ;;  %6505 = vst [vmem:[#allocation10_spill] sm:$0xff] %v5598_v27  ;;  %v5630_v39 = vpack.c.bf16 %v3550_v37, %v3549_v36  ;;  %v484_v41 = vld [vmem:[%s6458_s2 + $0x8] sm:$0xff]  ;;  %v3551_v42 = vld [vmem:[%s6458_s2 + $0x280] sm:$0xff]  ;;  %v3553_v46 = vld [vmem:[%s6458_s2 + $0x290] sm:$0xff] }
  0x3f   : > { %4911 = vmatpush3.bf16.msra.mxu0 %v5547_v7  ;;  %4785 = vmatprep.subr.bf16.mxu1 %v4784_v12  ;;  %6506 = vst [vmem:[#allocation11_spill] sm:$0xff] %v5614_v33  ;;  %v3552_v43 = vld [vmem:[%s6458_s2 + $0x288] sm:$0xff]  ;;  %v4804_v44 = vpack.c.bf16 %v484_v41, %v483_v40  ;;  %v3554_v47 = vld [vmem:[%s6458_s2 + $0x298] sm:$0xff]  ;;  %v485_v49 = vld [vmem:[%s6458_s2 + $0x10] sm:$0xff] }
  0x40   : > { %4913 = vmatprep.subr.bf16.mxu0 %v5563_v13  ;;  %6507 = vst [vmem:[#allocation12_spill] sm:$0xff] %v5630_v39  ;;  %v4932_v45 = vpack.c.bf16 %v3552_v43, %v3551_v42  ;;  %v500_v48 = vld [vmem:[#allocation2 + $0x9] sm:$0xff]  ;;  %v486_v50 = vld [vmem:[%s6458_s2 + $0x18] sm:$0xff]  ;;  %v1612_v51 = vld [vmem:[#allocation2 + $0x21] sm:$0xff]  ;;  %v4936_v52 = vpack.c.bf16 %v3554_v47, %v3553_v46 }
  0x41   : > { %v1613_v53 = vld [vmem:[#allocation2 + $0x31] sm:$0xff]  ;;  %v4808_v54 = vpack.c.bf16 %v486_v50, %v485_v49  ;;  %v3555_v55 = vld [vmem:[%s6458_s2 + $0x2a0] sm:$0xff]  ;;  %v3556_v56 = vld [vmem:[%s6458_s2 + $0x2a8] sm:$0xff] }
  0x42   : > { %4787 = vmatpush3.bf16.msra.mxu1 %v4784_v12  ;;  %v487_v57 = vld [vmem:[%s6458_s2 + $0x20] sm:$0xff]  ;;  %v488_v58 = vld [vmem:[%s6458_s2 + $0x28] sm:$0xff]  ;;  %v4940_v62 = vpack.c.bf16 %v3556_v56, %v3555_v55  ;;  %v3557_v63 = vld [vmem:[%s6458_s2 + $0x2b0] sm:$0xff] }
  0x43   : > { %4915 = vmatpush3.bf16.msra.mxu0 %v5563_v13  ;;  %4789 = vmatprep.subr.bf16.mxu1 %v4788_v20  ;;  %v1614_v59 = vld [vmem:[#allocation2 + $0x39] sm:$0xff]  ;;  %v1615_v60 = vld [vmem:[#allocation2 + $0x49] sm:$0xff]  ;;  %v4812_v1 = vpack.c.bf16 %v488_v58, %v487_v57  ;;  %v1616_v5 = vld [vmem:[#allocation2 + $0x51] sm:$0xff] }
  0x44   : > { %4917 = vmatprep.subr.bf16.mxu0 %v5582_v21  ;;  %v3558_v0 = vld [vmem:[%s6458_s2 + $0x2b8] sm:$0xff]  ;;  %v489_v3 = vld [vmem:[%s6458_s2 + $0x30] sm:$0xff]  ;;  %v1617_v6 = vld [vmem:[#allocation2 + $0x61] sm:$0xff] }
  0x45   : > { %v490_v4 = vld [vmem:[%s6458_s2 + $0x38] sm:$0xff]  ;;  %v4944_v8 = vpack.c.bf16 %v3558_v0, %v3557_v63  ;;  %v3559_v9 = vld [vmem:[%s6458_s2 + $0x2c0] sm:$0xff]  ;;  %v3560_v10 = vld [vmem:[%s6458_s2 + $0x2c8] sm:$0xff] }
  0x46   : > { %4791 = vmatpush3.bf16.msra.mxu1 %v4788_v20  ;;  %v4816_v11 = vpack.c.bf16 %v490_v4, %v489_v3  ;;  %v491_v12 = vld [vmem:[%s6458_s2 + $0x40] sm:$0xff]  ;;  %v492_v14 = vld [vmem:[%s6458_s2 + $0x48] sm:$0xff]  ;;  %v4948_v17 = vpack.c.bf16 %v3560_v10, %v3559_v9  ;;  %v3561_v18 = vld [vmem:[%s6458_s2 + $0x2d0] sm:$0xff] }
  0x47   : > { %4919 = vmatpush3.bf16.msra.mxu0 %v5582_v21  ;;  %4793 = vmatprep.subr.bf16.mxu1 %v4792_v26  ;;  %v1618_v15 = vld [vmem:[#allocation2 + $0x69] sm:$0xff]  ;;  %v1619_v16 = vld [vmem:[#allocation2 + $0x79] sm:$0xff]  ;;  %v4820_v20 = vpack.c.bf16 %v492_v14, %v491_v12  ;;  %v1620_v24 = vld [vmem:[#allocation2 + $0x81] sm:$0xff] }
  0x48   : > { %4921 = vmatprep.subr.bf16.mxu0 %v5598_v27  ;;  %v493_v22 = vld [vmem:[%s6458_s2 + $0x50] sm:$0xff]  ;;  %v494_v23 = vld [vmem:[%s6458_s2 + $0x58] sm:$0xff]  ;;  %v3563_v28 = vld [vmem:[%s6458_s2 + $0x2e0] sm:$0xff] }
  0x49   : > { %v5708_v25 = vld [vmem:[#allocation2 + $0x91] sm:$0xff]  ;;  %v3564_v29 = vld [vmem:[%s6458_s2 + $0x2e8] sm:$0xff]  ;;  %v4824_v30 = vpack.c.bf16 %v494_v23, %v493_v22  ;;  %v495_v31 = vld [vmem:[%s6458_s2 + $0x60] sm:$0xff] }
  0x4a   : > { %4795 = vmatpush3.bf16.msra.mxu1 %v4792_v26  ;;  %v1622_v34 = vld [vmem:[#allocation2 + $0x99] sm:$0xff]  ;;  %v1623_v35 = vld [vmem:[#allocation2 + $0xa9] sm:$0xff]  ;;  %v4956_v36 = vpack.c.bf16 %v3564_v29, %v3563_v28  ;;  %v1624_v43 = vld [vmem:[#allocation2 + $0xb1] sm:$0xff] }
  0x4b   : > { %4923 = vmatpush3.bf16.msra.mxu0 %v5598_v27  ;;  %4797 = vmatprep.subr.bf16.mxu1 %v4796_v32  ;;  %v3565_v37 = vld [vmem:[%s6458_s2 + $0x2f0] sm:$0xff]  ;;  %v498_v42 = vld [vmem:[%s6458_s2 + $0x78] sm:$0xff]  ;;  %v3567_v46 = vld [vmem:[%s6458_s2 + $0x300] sm:$0xff] }
  0x4c   : > { %4925 = vmatprep.subr.bf16.mxu0 %v5614_v33  ;;  %v497_v41 = vld [vmem:[%s6458_s2 + $0x70] sm:$0xff]  ;;  %v3568_v47 = vld [vmem:[%s6458_s2 + $0x308] sm:$0xff]  ;;  %v3503_v49 = vld [vmem:[%s6458_s2 + $0x100] sm:$0xff] }
  0x4d   : > { %v3504_v50 = vld [vmem:[%s6458_s2 + $0x108] sm:$0xff]  ;;  %v3570_v55 = vld [vmem:[%s6458_s2 + $0x318] sm:$0xff]  ;;  %v3577_v23 = vld [vmem:[%s6458_s2 + $0x350] sm:$0xff] }
  0x4e   : > { %4799 = vmatpush3.bf16.msra.mxu1 %v4796_v32  ;;  %v496_v32 = vld [vmem:[%s6458_s2 + $0x68] sm:$0xff]  ;;  %v5761_v56 = vpack.c.bf16 %v3504_v50, %v3503_v49  ;;  %v5768_v58 = vld [vmem:[#allocation2 + $0xd9] sm:$0xff]  ;;  %v5787_v3 = vld [vmem:[#allocation2 + $0xf1] sm:$0xff] }
  0x4f   : > { %4927 = vmatpush3.bf16.msra.mxu0 %v5614_v33  ;;  %4801 = vmatprep.subr.bf16.mxu1 %v4800_v38  ;;  %v4828_v40 = vpack.c.bf16 %v496_v32, %v495_v31  ;;  %v5766_v57 = vld [vmem:[#allocation2 + $0x22] sm:$0xff]  ;;  %v5789_v4 = vld [vmem:[#allocation2 + $0x4a] sm:$0xff]  ;;  %v5800_v9 = vld [vmem:[#allocation2 + $0xf9] sm:$0xff] }
  0x50   : > { %4929 = vmatprep.subr.bf16.mxu0 %v5630_v39  ;;  %v3572_v63 = vld [vmem:[%s6458_s2 + $0x328] sm:$0xff]  ;;  %v5803_v10 = vld [vmem:[#allocation2 + $0x52] sm:$0xff]  ;;  %v3579_v32 = vld [vmem:[%s6458_s2 + $0x360] sm:$0xff] }
  0x51   : > { %v5782_v0 = vld [vmem:[#allocation2 + $0xe1] sm:$0xff]  ;;  %v5841_v29 = vld [vmem:[#allocation2 + $0x139] sm:$0xff] }
  0x52   : > { %4803 = vmatpush3.bf16.msra.mxu1 %v4800_v38  ;;  %v3566_v38 = vld [vmem:[%s6458_s2 + $0x2f8] sm:$0xff]  ;;  %v5807_v12 = vld [vmem:[#allocation2 + $0x62] sm:$0xff]  ;;  %6512 = vst [vmem:[#allocation17_spill] sm:$0xff] %v5841_v29 }
  0x53   : > { %4931 = vmatpush3.bf16.msra.mxu0 %v5630_v39  ;;  %4805 = vmatprep.subr.bf16.mxu1 %v4804_v44  ;;  %v5839_v28 = vld [vmem:[#allocation2 + $0x82] sm:$0xff]  ;;  %v3514_v39 = vld [vmem:[%s6458_s2 + $0x158] sm:$0xff] }
  0x54   : > { %4933 = vmatprep.subr.bf16.mxu0 %v4932_v45  ;;  %v3583_v49 = vld [vmem:[%s6458_s2 + $0x380] sm:$0xff]  ;;  %v3584_v50 = vld [vmem:[%s6458_s2 + $0x388] sm:$0xff]  ;;  %v6014_v13 = vld [vmem:[#allocation2 + $0x98] sm:$0xff] }
  0x55   : > { %4085 = vmatmul.mubr.f32.vlgmr.msra.gmra.mrb[0].mxu1 %v500_v48  ;;  %v4832_v48 = vpack.c.bf16 %v498_v42, %v497_v41  ;;  %v3581_v41 = vld [vmem:[%s6458_s2 + $0x370] sm:$0xff]  ;;  %v3582_v42 = vld [vmem:[%s6458_s2 + $0x378] sm:$0xff]  ;;  %v5978_v33 = vld [vmem:[#allocation2 + $0x68] sm:$0xff]  ;;  %6527 = vst [vmem:[#allocation32_spill] sm:$0xff] %v6014_v13 }
  0x56   : > { %4405 = vmatmul.mubr.f32.vlgmr.msra.gmra.mrb[0].mxu0 %v1612_v51  ;;  %4807 = vmatpush3.bf16.msra.mxu1 %v4804_v44  ;;  %v5736_v44 = vld [vmem:[#allocation2 + $0xc1] sm:$0xff]  ;;  %6523 = vst [vmem:[#allocation28_spill] sm:$0xff] %v5978_v33  ;;  %v3586_v2 = vld [vmem:[%s6458_s2 + $0x398] sm:$0xff] }
  0x57   : > { %4935 = vmatpush3.bf16.msra.mxu0 %v4932_v45  ;;  %4087 = vmatprep.mubr.f32.mxu1 %v5577_v19  ;;  %v3562_v19 = vld [vmem:[%s6458_s2 + $0x2d8] sm:$0xff]  ;;  %v4960_v45 = vpack.c.bf16 %v3566_v38, %v3565_v37  ;;  %v5861_v38 = vld [vmem:[#allocation2 + $0xaa] sm:$0xff]  ;;  %v3515_v27 = vld [vmem:[%s6458_s2 + $0x160] sm:$0xff] }
  0x58   : > { %4407 = vmatprep.mubr.f32.mxu0 %v1613_v53  ;;  %4937 = vmatprep.subr.bf16.mxu0 %v4936_v52  ;;  %v4952_v26 = vpack.c.bf16 %v3562_v19, %v3561_v18  ;;  %v5821_v18 = vld [vmem:[#allocation2 + $0x6a] sm:$0xff]  ;;  %v5823_v19 = vld [vmem:[#allocation2 + $0x121] sm:$0xff] }
  0x59   : > { %4088 = vmatmul.mubr.f32.gmra.mrb[2].mxu1 %v1612_v51  ;;  %4809 = vmatprep.subr.bf16.mxu1 %v4808_v54  ;;  %v5751_v51 = vld [vmem:[#allocation2 + $0xc9] sm:$0xff]  ;;  %6510 = vst [vmem:[#allocation15_spill] sm:$0xff] %v5823_v19  ;;  %v5859_v37 = vld [vmem:[#allocation2 + $0x151] sm:$0xff] }
  0x5a   : > { %4408 = vmatmul.mubr.f32.gmra.mrb[2].mxu0 %v1614_v59  ;;  %4090 = vmatprep.mubr.f32.mxu1 %v1613_v53  ;;  %v4964_v53 = vpack.c.bf16 %v3568_v47, %v3567_v46  ;;  %6514 = vst [vmem:[#allocation19_spill] sm:$0xff] %v5859_v37  ;;  %v5877_v46 = vld [vmem:[#allocation2 + $0x169] sm:$0xff] }
  0x5b   : > { %4939 = vmatpush3.bf16.msra.mxu0 %v4936_v52  ;;  %4410 = vmatprep.mubr.f32.mxu0 %v1615_v60  ;;  %v5753_v52 = vld [vmem:[#allocation2 + $0x1a] sm:$0xff]  ;;  %6516 = vst [vmem:[#allocation21_spill] sm:$0xff] %v5877_v46  ;;  %v5879_v47 = vld [vmem:[#allocation2 + $0xc2] sm:$0xff] }
  0x5c   : > { %4941 = vmatprep.subr.bf16.mxu0 %v4940_v62  ;;  %4811 = vmatpush3.bf16.msra.mxu1 %v4808_v54  ;;  %v3569_v54 = vld [vmem:[%s6458_s2 + $0x310] sm:$0xff]  ;;  %v3520_v7 = vld [vmem:[%s6458_s2 + $0x188] sm:$0xff] }
  0x5d   : > { %4091 = vmatmul.mubr.f32.gmra.mrb[4].mxu1 %v1614_v59  ;;  %4813 = vmatprep.subr.bf16.mxu1 %v4812_v1  ;;  %v5770_v59 = vld [vmem:[#allocation2 + $0x32] sm:$0xff] }
  0x5e   : > { %4411 = vmatmul.mubr.f32.gmra.mrb[4].mxu0 %v1616_v5  ;;  %4093 = vmatprep.mubr.f32.mxu1 %v1615_v60  ;;  %v4968_v60 = vpack.c.bf16 %v3570_v55, %v3569_v54  ;;  %v5893_v54 = vld [vmem:[#allocation2 + $0xca] sm:$0xff]  ;;  %v451_v55 = vld [vmem:[#allocation2] sm:$0xff] }
  0x5f   : > { %4943 = vmatpush3.bf16.msra.mxu0 %v4940_v62  ;;  %4413 = vmatprep.mubr.f32.mxu0 %v1617_v6  ;;  %v3571_v62 = vld [vmem:[%s6458_s2 + $0x320] sm:$0xff] }
  0x60   : > { %4945 = vmatprep.subr.bf16.mxu0 %v4944_v8  ;;  %4815 = vmatpush3.bf16.msra.mxu1 %v4812_v1  ;;  %v5785_v1 = vld [vmem:[#allocation2 + $0x3a] sm:$0xff] }
  0x61   : > { %4094 = vmatmul.mubr.f32.gmra.mrb[6].mxu1 %v1616_v5  ;;  %4817 = vmatprep.subr.bf16.mxu1 %v4816_v11  ;;  %v4972_v5 = vpack.c.bf16 %v3572_v63, %v3571_v62  ;;  %v5897_v62 = vpack.c.bf16 %v3584_v50, %v3583_v49  ;;  %v3505_v63 = vld [vmem:[%s6458_s2 + $0x110] sm:$0xff]  ;;  %v5947_v49 = vld [vmem:[#allocation2 + $0x48] sm:$0xff] }
  0x62   : > { %4414 = vmatmul.mubr.f32.gmra.mrb[6].mxu0 %v1618_v15  ;;  %4096 = vmatprep.mubr.f32.mxu1 %v1617_v6  ;;  %v3573_v6 = vld [vmem:[%s6458_s2 + $0x330] sm:$0xff]  ;;  %6520 = vst [vmem:[#allocation25_spill] sm:$0xff] %v5947_v49  ;;  %v5949_v50 = vld [vmem:[#allocation2 + $0x122] sm:$0xff] }
  0x63   : > { %4947 = vmatpush3.bf16.msra.mxu0 %v4944_v8  ;;  %4416 = vmatprep.mubr.f32.mxu0 %v1619_v16  ;;  %v3574_v8 = vld [vmem:[%s6458_s2 + $0x338] sm:$0xff] }
  0x64   : > { %4949 = vmatprep.subr.bf16.mxu0 %v4948_v17  ;;  %4819 = vmatpush3.bf16.msra.mxu1 %v4816_v11  ;;  %v5805_v11 = vld [vmem:[#allocation2 + $0x109] sm:$0xff]  ;;  %v4976_v14 = vpack.c.bf16 %v3574_v8, %v3573_v6 }
  0x65   : > { %4097 = vmatmul.mubr.f32.gmra.mrb[8].mxu1 %v1618_v15  ;;  %4821 = vmatprep.subr.bf16.mxu1 %v4820_v20  ;;  %6508 = vst [vmem:[#allocation13_spill] sm:$0xff] %v5805_v11  ;;  %v3575_v15 = vld [vmem:[%s6458_s2 + $0x340] sm:$0xff]  ;;  %v452_v6 = vld [vmem:[#allocation2 + $0x8] sm:$0xff] }
  0x66   : > { %4417 = vmatmul.mubr.f32.gmra.mrb[8].mxu0 %v1620_v24  ;;  %4099 = vmatprep.mubr.f32.mxu1 %v1619_v16  ;;  %v3576_v16 = vld [vmem:[%s6458_s2 + $0x348] sm:$0xff] }
  0x67   : > { %4951 = vmatpush3.bf16.msra.mxu0 %v4948_v17  ;;  %4419 = vmatprep.mubr.f32.mxu0 %v5708_v25  ;;  %v5818_v17 = vld [vmem:[#allocation2 + $0x111] sm:$0xff]  ;;  %v4980_v22 = vpack.c.bf16 %v3576_v16, %v3575_v15  ;;  %v5908_v8 = vld [vmem:[#allocation2 + $0xe2] sm:$0xff] }
  0x68   : > { %4953 = vmatprep.subr.bf16.mxu0 %v4952_v26  ;;  %4823 = vmatpush3.bf16.msra.mxu1 %v4820_v20  ;;  %6509 = vst [vmem:[#allocation14_spill] sm:$0xff] %v5818_v17  ;;  %v5825_v20 = vld [vmem:[#allocation2 + $0x7a] sm:$0xff]  ;;  %v5912_v15 = vld [vmem:[#allocation2 + $0xf2] sm:$0xff] }
  0x69   : > { %4100 = vmatmul.mubr.f32.gmra.mrb[10].mxu1 %v1620_v24  ;;  %4825 = vmatprep.subr.bf16.mxu1 %v4824_v30  ;;  %v3578_v24 = vld [vmem:[%s6458_s2 + $0x358] sm:$0xff] }
  0x6a   : > { %4420 = vmatmul.mubr.f32.gmra.mrb[10].mxu0 %v1622_v34  ;;  %4102 = vmatprep.mubr.f32.mxu1 %v5708_v25  ;;  %v4984_v31 = vpack.c.bf16 %v3578_v24, %v3577_v23  ;;  %v3508_v23 = vld [vmem:[%s6458_s2 + $0x128] sm:$0xff]  ;;  %v5923_v24 = vld [vmem:[#allocation2 + $0x20] sm:$0xff] }
  0x6b   : > { %4955 = vmatpush3.bf16.msra.mxu0 %v4952_v26  ;;  %4422 = vmatprep.mubr.f32.mxu0 %v1623_v35  ;;  %v5836_v26 = vld [vmem:[#allocation2 + $0x129] sm:$0xff] }
  0x6c   : > { %4957 = vmatprep.subr.bf16.mxu0 %v4956_v36  ;;  %4827 = vmatpush3.bf16.msra.mxu1 %v4824_v30  ;;  %6511 = vst [vmem:[#allocation16_spill] sm:$0xff] %v5836_v26  ;;  %v5843_v30 = vld [vmem:[#allocation2 + $0x92] sm:$0xff] }
  0x6d   : > { %4103 = vmatmul.mubr.f32.gmra.mrb[12].mxu1 %v1622_v34  ;;  %4829 = vmatprep.subr.bf16.mxu1 %v4828_v40  ;;  %v3580_v34 = vld [vmem:[%s6458_s2 + $0x368] sm:$0xff] }
  0x6e   : > { %4423 = vmatmul.mubr.f32.gmra.mrb[12].mxu0 %v1624_v43  ;;  %4105 = vmatprep.mubr.f32.mxu1 %v1623_v35  ;;  %v5854_v35 = vld [vmem:[#allocation2 + $0x141] sm:$0xff] }
  0x6f   : > { %4959 = vmatpush3.bf16.msra.mxu0 %v4956_v36  ;;  %4425 = vmatprep.mubr.f32.mxu0 %v5736_v44  ;;  %6513 = vst [vmem:[#allocation18_spill] sm:$0xff] %v5854_v35  ;;  %v5857_v36 = vld [vmem:[#allocation2 + $0x9a] sm:$0xff] }
  0x70   : > { %4961 = vmatprep.subr.bf16.mxu0 %v4960_v45  ;;  %4831 = vmatpush3.bf16.msra.mxu1 %v4828_v40  ;;  %v4988_v40 = vpack.c.bf16 %v3580_v34, %v3579_v32  ;;  %v5929_v32 = vld [vmem:[#allocation2 + $0x30] sm:$0xff] }
  0x71   : > { %4106 = vmatmul.mubr.f32.gmra.mrb[14].mxu1 %v1624_v43  ;;  %4833 = vmatprep.subr.bf16.mxu1 %v4832_v48  ;;  %v5872_v43 = vld [vmem:[#allocation2 + $0x159] sm:$0xff]  ;;  %6518 = vst [vmem:[#allocation23_spill] sm:$0xff] %v5929_v32  ;;  %v5931_v34 = vld [vmem:[#allocation2 + $0x10a] sm:$0xff] }
  0x72   : > { %4426 = vmatmul.mubr.f32.gmra.mrb[14].mxu0 %v5751_v51  ;;  %4108 = vmatprep.mubr.f32.mxu1 %v5736_v44  ;;  %6515 = vst [vmem:[#allocation20_spill] sm:$0xff] %v5872_v43 }
  0x73   : > { %4963 = vmatpush3.bf16.msra.mxu0 %v4960_v45  ;;  %4484 = vmatprep.mubr.f32.mxu0 %v5753_v52  ;;  %v5875_v45 = vld [vmem:[#allocation2 + $0xb2] sm:$0xff] }
  0x74   : > { %4965 = vmatprep.subr.bf16.mxu0 %v4964_v53  ;;  %4835 = vmatpush3.bf16.msra.mxu1 %v4832_v48  ;;  %v4992_v48 = vpack.c.bf16 %v3582_v42, %v3581_v41  ;;  %v3510_v41 = vld [vmem:[%s6458_s2 + $0x138] sm:$0xff] }
  0x75   : > { %4109 = vmatmul.mubr.f32.gmra.mrb[16].mxu1 %v5751_v51  ;;  %4837 = vmatprep.subr.bf16.mxu1 %v5761_v56  ;;  %v5942_v42 = vld [vmem:[#allocation2 + $0x38] sm:$0xff] }
  0x76   : > { %4485 = vmatmul.mubr.f32.vlgmr.msra.gmra.mrb[0].mxu0 %v5766_v57  ;;  %4111 = vmatprep.mubr.f32.mxu1 %v5768_v58  ;;  %6519 = vst [vmem:[#allocation24_spill] sm:$0xff] %v5942_v42 }
  0x77   : > { %4967 = vmatpush3.bf16.msra.mxu0 %v4964_v53  ;;  %4487 = vmatprep.mubr.f32.mxu0 %v5770_v59  ;;  %v5890_v53 = vld [vmem:[#allocation2 + $0x171] sm:$0xff] }
  0x78   : > { %4969 = vmatprep.subr.bf16.mxu0 %v4968_v60  ;;  %6517 = vst [vmem:[#allocation22_spill] sm:$0xff] %v5890_v53 }
  0x79   : > { %4112 = vmatmul.mubr.f32.gmra.mrb[18].mxu1 %v5782_v0 }
  0x7a   : > { %4488 = vmatmul.mubr.f32.gmra.mrb[2].mxu0 %v5785_v1  ;;  %4114 = vmatprep.mubr.f32.mxu1 %v5787_v3 }
  0x7b   : > { %4490 = vmatprep.mubr.f32.mxu0 %v5789_v4  ;;  %4971 = vmatpush3.bf16.msra.mxu0 %v4968_v60  ;;  %v5895_v60 = vld [vmem:[#allocation2 + $0xda] sm:$0xff] }
  0x7c   : > { %4973 = vmatprep.subr.bf16.mxu0 %v4972_v5 }
  0x7d   : > { %4115 = vmatmul.mubr.f32.gmra.mrb[20].mxu1 %v5800_v9 }
  0x7e   : > { %4491 = vmatmul.mubr.f32.gmra.mrb[4].mxu0 %v5803_v10  ;;  %4117 = vmatprep.mubr.f32.mxu1 %v5805_v11  ;;  %v6059_v11 = vld [vmem:[#allocation2 + $0xe0] sm:$0xff] }
  0x7f   : > { %4493 = vmatprep.mubr.f32.mxu0 %v5807_v12  ;;  %4975 = vmatpush3.bf16.msra.mxu0 %v4972_v5  ;;  %v3506_v5 = vld [vmem:[%s6458_s2 + $0x118] sm:$0xff] }
  0x80   : > { %4977 = vmatprep.subr.bf16.mxu0 %v4976_v14  ;;  %v4840_v16 = vpack.c.bf16 %v3506_v5, %v3505_v63  ;;  %v3511_v63 = vld [vmem:[%s6458_s2 + $0x140] sm:$0xff]  ;;  %v3512_v5 = vld [vmem:[%s6458_s2 + $0x148] sm:$0xff] }
  0x81   : > { %4118 = vmatmul.mubr.f32.gmra.mrb[22].mxu1 %v5818_v17  ;;  %v6032_v17 = vld [vmem:[#allocation2 + $0xc0] sm:$0xff] }
  0x82   : > { %4494 = vmatmul.mubr.f32.gmra.mrb[6].mxu0 %v5821_v18  ;;  %4120 = vmatprep.mubr.f32.mxu1 %v5823_v19  ;;  %v6030_v19 = vld [vmem:[#allocation2 + $0xb0] sm:$0xff]  ;;  %6530 = vst [vmem:[#allocation35_spill] sm:$0xff] %v6032_v17 }
  0x83   : > { %4496 = vmatprep.mubr.f32.mxu0 %v5825_v20  ;;  %4979 = vmatpush3.bf16.msra.mxu0 %v4976_v14  ;;  %v5910_v14 = vld [vmem:[#allocation2 + $0x18] sm:$0xff]  ;;  %6529 = vst [vmem:[#allocation34_spill] sm:$0xff] %v6030_v19 }
  0x84   : > { %4981 = vmatprep.subr.bf16.mxu0 %v4980_v22 }
  0x85   : > { %4121 = vmatmul.mubr.f32.gmra.mrb[24].mxu1 %v5836_v26  ;;  %v3519_v26 = vld [vmem:[%s6458_s2 + $0x180] sm:$0xff] }
  0x86   : > { %4497 = vmatmul.mubr.f32.gmra.mrb[8].mxu0 %v5839_v28  ;;  %4123 = vmatprep.mubr.f32.mxu1 %v5841_v29 }
  0x87   : > { %4499 = vmatprep.mubr.f32.mxu0 %v5843_v30  ;;  %4983 = vmatpush3.bf16.msra.mxu0 %v4980_v22  ;;  %v3507_v22 = vld [vmem:[%s6458_s2 + $0x120] sm:$0xff] }
  0x88   : > { %4985 = vmatprep.subr.bf16.mxu0 %v4984_v31 }
  0x89   : > { %4124 = vmatmul.mubr.f32.gmra.mrb[26].mxu1 %v5854_v35  ;;  %v3518_v35 = vld [vmem:[%s6458_s2 + $0x178] sm:$0xff] }
  0x8a   : > { %4500 = vmatmul.mubr.f32.gmra.mrb[10].mxu0 %v5857_v36  ;;  %4126 = vmatprep.mubr.f32.mxu1 %v5859_v37  ;;  %v3517_v37 = vld [vmem:[%s6458_s2 + $0x170] sm:$0xff] }
  0x8b   : > { %4502 = vmatprep.mubr.f32.mxu0 %v5861_v38  ;;  %4987 = vmatpush3.bf16.msra.mxu0 %v4984_v31  ;;  %v5927_v31 = vld [vmem:[#allocation2 + $0xfa] sm:$0xff]  ;;  %v4864_v29 = vpack.c.bf16 %v3518_v35, %v3517_v37  ;;  %v6034_v35 = vpack.c.bf16 %v3520_v7, %v3519_v26  ;;  %v3585_v37 = vld [vmem:[%s6458_s2 + $0x390] sm:$0xff] }
  0x8c   : > { %4989 = vmatprep.subr.bf16.mxu0 %v4988_v40  ;;  %v5000_v7 = vpack.c.bf16 %v3586_v2, %v3585_v37  ;;  %v3587_v26 = vld [vmem:[%s6458_s2 + $0x3a0] sm:$0xff]  ;;  %v6063_v2 = vld [vmem:[#allocation2 + $0xf0] sm:$0xff] }
  0x8d   : > { %4127 = vmatmul.mubr.f32.gmra.mrb[28].mxu1 %v5872_v43  ;;  %v5996_v43 = vld [vmem:[#allocation2 + $0x80] sm:$0xff]  ;;  %v3589_v37 = vld [vmem:[%s6458_s2 + $0x3b0] sm:$0xff] }
  0x8e   : > { %4503 = vmatmul.mubr.f32.gmra.mrb[12].mxu0 %v5875_v45  ;;  %4129 = vmatprep.mubr.f32.mxu1 %v5877_v46  ;;  %v3516_v46 = vld [vmem:[%s6458_s2 + $0x168] sm:$0xff]  ;;  %6525 = vst [vmem:[#allocation30_spill] sm:$0xff] %v5996_v43 }
  0x8f   : > { %4505 = vmatprep.mubr.f32.mxu0 %v5879_v47  ;;  %4991 = vmatpush3.bf16.msra.mxu0 %v4988_v40  ;;  %v4844_v40 = vpack.c.bf16 %v3508_v23, %v3507_v22  ;;  %v5965_v22 = vld [vmem:[#allocation2 + $0x60] sm:$0xff]  ;;  %v4860_v21 = vpack.c.bf16 %v3516_v46, %v3515_v27  ;;  %v6019_v27 = vld [vmem:[#allocation2 + $0xa8] sm:$0xff] }
  0x90   : > { %4993 = vmatprep.subr.bf16.mxu0 %v4992_v48  ;;  %6522 = vst [vmem:[#allocation27_spill] sm:$0xff] %v5965_v22  ;;  %v5967_v23 = vld [vmem:[#allocation2 + $0x13a] sm:$0xff]  ;;  %6528 = vst [vmem:[#allocation33_spill] sm:$0xff] %v6019_v27  ;;  %v1947_v46 = vld [vmem:[#allocation2 + $0x182] sm:$0xff] }
  0x91   : > { %4130 = vmatmul.mubr.f32.gmra.mrb[30].mxu1 %v5890_v53 }
  0x92   : > { %4506 = vmatmul.mubr.f32.gmra.mrb[14].mxu0 %v5893_v54  ;;  %4164 = vmatprep.mubr.f32.mxu1 %v451_v55 }
  0x93   : > { %4508 = vmatprep.mubr.f32.mxu0 %v5895_v60  ;;  %4995 = vmatpush3.bf16.msra.mxu0 %v4992_v48  ;;  %v5945_v48 = vld [vmem:[#allocation2 + $0x112] sm:$0xff] }
  0x94   : > { %4997 = vmatprep.subr.bf16.mxu0 %v5897_v62 }
  0x95   : > { %4165 = vmatmul.mubr.f32.vlgmr.msra.gmra.mrb[0].mxu1 %v452_v6  ;;  %v5960_v6 = vld [vmem:[#allocation2 + $0x50] sm:$0xff] }
  0x96   : > { %4509 = vmatmul.mubr.f32.gmra.mrb[16].mxu0 %v5908_v8  ;;  %4839 = vmatpush3.bf16.msra.mxu1 %v5761_v56  ;;  %v3509_v56 = vld [vmem:[%s6458_s2 + $0x130] sm:$0xff]  ;;  %6521 = vst [vmem:[#allocation26_spill] sm:$0xff] %v5960_v6 }
  0x97   : > { %4167 = vmatprep.mubr.f32.mxu1 %v5910_v14  ;;  %4511 = vmatprep.mubr.f32.mxu0 %v5912_v15  ;;  %v4848_v55 = vpack.c.bf16 %v3510_v41, %v3509_v56  ;;  %v4852_v56 = vpack.c.bf16 %v3512_v5, %v3511_v63  ;;  %v3513_v41 = vld [vmem:[%s6458_s2 + $0x150] sm:$0xff]  ;;  %v5983_v63 = vld [vmem:[#allocation2 + $0x78] sm:$0xff] }
  0x98   : > { %4841 = vmatprep.subr.bf16.mxu1 %v4840_v16  ;;  %6524 = vst [vmem:[#allocation29_spill] sm:$0xff] %v5983_v63  ;;  %v5985_v5 = vld [vmem:[#allocation2 + $0x152] sm:$0xff]  ;;  %v4856_v53 = vpack.c.bf16 %v3514_v39, %v3513_v41  ;;  %v6003_v41 = vld [vmem:[#allocation2 + $0x16a] sm:$0xff] }
  0x99   : > { %4168 = vmatmul.mubr.f32.gmra.mrb[2].mxu1 %v5923_v24  ;;  %v6001_v39 = vld [vmem:[#allocation2 + $0x90] sm:$0xff] }
  0x9a   : > { %4512 = vmatmul.mubr.f32.gmra.mrb[18].mxu0 %v5927_v31  ;;  %4170 = vmatprep.mubr.f32.mxu1 %v5929_v32  ;;  %6526 = vst [vmem:[#allocation31_spill] sm:$0xff] %v6001_v39 }
  0x9b   : > { %4514 = vmatprep.mubr.f32.mxu0 %v5931_v34  ;;  %4843 = vmatpush3.bf16.msra.mxu1 %v4840_v16  ;;  %v5963_v16 = vld [vmem:[#allocation2 + $0x12a] sm:$0xff] }
  0x9c   : > { %4845 = vmatprep.subr.bf16.mxu1 %v4844_v40 }
  0x9d   : > { %4171 = vmatmul.mubr.f32.gmra.mrb[4].mxu1 %v5942_v42 }
  0x9e   : > { %4515 = vmatmul.mubr.f32.gmra.mrb[20].mxu0 %v5945_v48  ;;  %4173 = vmatprep.mubr.f32.mxu1 %v5947_v49 }
  0x9f   : > { %4517 = vmatprep.mubr.f32.mxu0 %v5949_v50  ;;  %4847 = vmatpush3.bf16.msra.mxu1 %v4844_v40  ;;  %v5981_v40 = vld [vmem:[#allocation2 + $0x142] sm:$0xff] }
  0xa0   : > { %4849 = vmatprep.subr.bf16.mxu1 %v4848_v55 }
  0xa1   : > { %4174 = vmatmul.mubr.f32.gmra.mrb[6].mxu1 %v5960_v6 }
  0xa2   : > { %4518 = vmatmul.mubr.f32.gmra.mrb[22].mxu0 %v5963_v16  ;;  %4176 = vmatprep.mubr.f32.mxu1 %v5965_v22 }
  0xa3   : > { %4520 = vmatprep.mubr.f32.mxu0 %v5967_v23  ;;  %4851 = vmatpush3.bf16.msra.mxu1 %v4848_v55  ;;  %v5999_v55 = vld [vmem:[#allocation2 + $0x15a] sm:$0xff] }
  0xa4   : > { %4853 = vmatprep.subr.bf16.mxu1 %v4852_v56 }
  0xa5   : > { %4177 = vmatmul.mubr.f32.gmra.mrb[8].mxu1 %v5978_v33 }
  0xa6   : > { %4521 = vmatmul.mubr.f32.gmra.mrb[24].mxu0 %v5981_v40  ;;  %4179 = vmatprep.mubr.f32.mxu1 %v5983_v63 }
  0xa7   : > { %4523 = vmatprep.mubr.f32.mxu0 %v5985_v5  ;;  %4855 = vmatpush3.bf16.msra.mxu1 %v4852_v56  ;;  %v6017_v56 = vld [vmem:[#allocation2 + $0x172] sm:$0xff] }
  0xa8   : > { %4857 = vmatprep.subr.bf16.mxu1 %v4856_v53 }
  0xa9   : > { %4180 = vmatmul.mubr.f32.gmra.mrb[10].mxu1 %v5996_v43 }
  0xaa   : > { %4524 = vmatmul.mubr.f32.gmra.mrb[26].mxu0 %v5999_v55  ;;  %4182 = vmatprep.mubr.f32.mxu1 %v6001_v39 }
  0xab   : > { %4526 = vmatprep.mubr.f32.mxu0 %v6003_v41  ;;  %4859 = vmatpush3.bf16.msra.mxu1 %v4856_v53  ;;  %v1948_v53 = vld [vmem:[#allocation2 + $0x18a] sm:$0xff] }
  0xac   : > { %4861 = vmatprep.subr.bf16.mxu1 %v4860_v21 }
  0xad   : > { %4183 = vmatmul.mubr.f32.gmra.mrb[12].mxu1 %v6014_v13 }
  0xae   : > { %4527 = vmatmul.mubr.f32.gmra.mrb[28].mxu0 %v6017_v56  ;;  %4185 = vmatprep.mubr.f32.mxu1 %v6019_v27 }
  0xaf   : > { %4529 = vmatprep.mubr.f32.mxu0 %v1947_v46  ;;  %4863 = vmatpush3.bf16.msra.mxu1 %v4860_v21  ;;  %v6044_v46 = vld [vmem:[#allocation2 + $0xc8] sm:$0xff]  ;;  %v6047_v21 = vld [vmem:[#allocation2 + $0xd8] sm:$0xff] }
  0xb0   : > { %4865 = vmatprep.subr.bf16.mxu1 %v4864_v29  ;;  %6531 = vst [vmem:[#allocation36_spill] sm:$0xff] %v6044_v46 }
  0xb1   : > { %4186 = vmatmul.mubr.f32.gmra.mrb[14].mxu1 %v6030_v19 }
  0xb2   : > { %4530 = vmatmul.mubr.f32.gmra.mrb[30].mxu0 %v1948_v53  ;;  %4188 = vmatprep.mubr.f32.mxu1 %v6032_v17  ;;  %v3588_v53 = vld [vmem:[%s6458_s2 + $0x3a8] sm:$0xff] }
  0xb3   : > { %4564 = vmatprep.mubr.f32.mxu0 %v5929_v32  ;;  %4867 = vmatpush3.bf16.msra.mxu1 %v4864_v29  ;;  %v5004_v29 = vpack.c.bf16 %v3588_v53, %v3587_v26  ;;  %v6077_v26 = vld [vmem:[#allocation2 + $0x108] sm:$0xff] }
  0xb4   : > { %4869 = vmatprep.subr.bf16.mxu1 %v6034_v35  ;;  %v999_v32 = vld [vmem:[#allocation2 + $0xa] sm:$0xff] }
  0xb5   : > { %4189 = vmatmul.mubr.f32.gmra.mrb[16].mxu1 %v6044_v46 }
  0xb6   : > { %4565 = vmatmul.mubr.f32.vlgmr.msra.gmra.mrb[0].mxu0 %v5942_v42  ;;  %4191 = vmatprep.mubr.f32.mxu1 %v6047_v21  ;;  %v3590_v42 = vld [vmem:[%s6458_s2 + $0x3b8] sm:$0xff] }
  0xb7   : > { %4999 = vmatpush3.bf16.msra.mxu0 %v5897_v62  ;;  %4567 = vmatprep.mubr.f32.mxu0 %v5947_v49  ;;  %v6074_v62 = vld [vmem:[#allocation2 + $0xf8] sm:$0xff]  ;;  %v5008_v53 = vpack.c.bf16 %v3590_v42, %v3589_v37  ;;  %v3591_v49 = vld [vmem:[%s6458_s2 + $0x3c0] sm:$0xff]  ;;  %v3593_v37 = vld [vmem:[%s6458_s2 + $0x3d0] sm:$0xff] }
  0xb8   : > { %5001 = vmatprep.subr.bf16.mxu0 %v5000_v7 }
  0xb9   : > { %4192 = vmatmul.mubr.f32.gmra.mrb[18].mxu1 %v6059_v11 }
  0xba   : > { %4568 = vmatmul.mubr.f32.gmra.mrb[2].mxu0 %v5960_v6  ;;  %4194 = vmatprep.mubr.f32.mxu1 %v6063_v2  ;;  %v3592_v6 = vld [vmem:[%s6458_s2 + $0x3c8] sm:$0xff] }
  0xbb   : > { %4570 = vmatprep.mubr.f32.mxu0 %v5965_v22  ;;  %5003 = vmatpush3.bf16.msra.mxu0 %v5000_v7  ;;  %v6088_v22 = vld [vmem:[#allocation2 + $0x110] sm:$0xff]  ;;  %v6091_v7 = vld [vmem:[#allocation2 + $0x120] sm:$0xff]  ;;  %v5012_v42 = vpack.c.bf16 %v3592_v6, %v3591_v49 }
  0xbc   : > { %5005 = vmatprep.subr.bf16.mxu0 %v5004_v29  ;;  %v3595_v6 = vld [vmem:[%s6458_s2 + $0x3e0] sm:$0xff] }
  0xbd   : > { %4195 = vmatmul.mubr.f32.gmra.mrb[20].mxu1 %v6074_v62 }
  0xbe   : > { %4571 = vmatmul.mubr.f32.gmra.mrb[4].mxu0 %v5978_v33  ;;  %4197 = vmatprep.mubr.f32.mxu1 %v6077_v26  ;;  %v3594_v33 = vld [vmem:[%s6458_s2 + $0x3d8] sm:$0xff] }
  0xbf   : > { %4573 = vmatprep.mubr.f32.mxu0 %v5983_v63  ;;  %5007 = vmatpush3.bf16.msra.mxu0 %v5004_v29  ;;  %v6102_v63 = vld [vmem:[#allocation2 + $0x128] sm:$0xff]  ;;  %v6105_v29 = vld [vmem:[#allocation2 + $0x138] sm:$0xff]  ;;  %v5016_v49 = vpack.c.bf16 %v3594_v33, %v3593_v37  ;;  %v3597_v37 = vld [vmem:[%s6458_s2 + $0x3f0] sm:$0xff] }
  0xc0   : > { %5009 = vmatprep.subr.bf16.mxu0 %v5008_v53 }
  0xc1   : > { %4198 = vmatmul.mubr.f32.gmra.mrb[22].mxu1 %v6088_v22 }
  0xc2   : > { %4574 = vmatmul.mubr.f32.gmra.mrb[6].mxu0 %v5996_v43  ;;  %4200 = vmatprep.mubr.f32.mxu1 %v6091_v7  ;;  %v3596_v43 = vld [vmem:[%s6458_s2 + $0x3e8] sm:$0xff] }
  0xc3   : > { %4576 = vmatprep.mubr.f32.mxu0 %v6001_v39  ;;  %5011 = vmatpush3.bf16.msra.mxu0 %v5008_v53  ;;  %v6116_v39 = vld [vmem:[#allocation2 + $0x140] sm:$0xff]  ;;  %v6119_v53 = vld [vmem:[#allocation2 + $0x150] sm:$0xff]  ;;  %v5020_v33 = vpack.c.bf16 %v3596_v43, %v3595_v6 }
  0xc4   : > { %5013 = vmatprep.subr.bf16.mxu0 %v5012_v42  ;;  %v3599_v6 = vld [vmem:[%s6458_s2 + $0x400] sm:$0xff] }
  0xc5   : > { %4201 = vmatmul.mubr.f32.gmra.mrb[24].mxu1 %v6102_v63 }
  0xc6   : > { %4577 = vmatmul.mubr.f32.gmra.mrb[8].mxu0 %v6014_v13  ;;  %4203 = vmatprep.mubr.f32.mxu1 %v6105_v29  ;;  %v3598_v13 = vld [vmem:[%s6458_s2 + $0x3f8] sm:$0xff] }
  0xc7   : > { %4579 = vmatprep.mubr.f32.mxu0 %v6019_v27  ;;  %5015 = vmatpush3.bf16.msra.mxu0 %v5012_v42  ;;  %v6130_v27 = vld [vmem:[#allocation2 + $0x158] sm:$0xff]  ;;  %v6133_v42 = vld [vmem:[#allocation2 + $0x168] sm:$0xff]  ;;  %v5024_v43 = vpack.c.bf16 %v3598_v13, %v3597_v37  ;;  %v3521_v37 = vld [vmem:[%s6458_s2 + $0x190] sm:$0xff] }
  0xc8   : > { %5017 = vmatprep.subr.bf16.mxu0 %v5016_v49 }
  0xc9   : > { %4204 = vmatmul.mubr.f32.gmra.mrb[26].mxu1 %v6116_v39 }
  0xca   : > { %4580 = vmatmul.mubr.f32.gmra.mrb[10].mxu0 %v6030_v19  ;;  %4206 = vmatprep.mubr.f32.mxu1 %v6119_v53  ;;  %v3600_v19 = vld [vmem:[%s6458_s2 + $0x408] sm:$0xff] }
  0xcb   : > { %4582 = vmatprep.mubr.f32.mxu0 %v6032_v17  ;;  %5019 = vmatpush3.bf16.msra.mxu0 %v5016_v49  ;;  %v6144_v17 = vld [vmem:[#allocation2 + $0x170] sm:$0xff]  ;;  %v998_v49 = vld [vmem:[#allocation2 + $0x2] sm:$0xff]  ;;  %v6147_v13 = vpack.c.bf16 %v3600_v19, %v3599_v6 }
  0xcc   : > { %5021 = vmatprep.subr.bf16.mxu0 %v5020_v33  ;;  %v3523_v19 = vld [vmem:[%s6458_s2 + $0x1a0] sm:$0xff]  ;;  %v3524_v6 = vld [vmem:[%s6458_s2 + $0x1a8] sm:$0xff] }
  0xcd   : > { %4207 = vmatmul.mubr.f32.gmra.mrb[28].mxu1 %v6130_v27 }
  0xce   : > { %4583 = vmatmul.mubr.f32.gmra.mrb[12].mxu0 %v6044_v46  ;;  %4209 = vmatprep.mubr.f32.mxu1 %v6133_v42  ;;  %v3522_v46 = vld [vmem:[%s6458_s2 + $0x198] sm:$0xff] }
  0xcf   : > { %4585 = vmatprep.mubr.f32.mxu0 %v6047_v21  ;;  %5023 = vmatpush3.bf16.msra.mxu0 %v5020_v33  ;;  %v4872_v33 = vpack.c.bf16 %v3522_v46, %v3521_v37  ;;  %v4876_v46 = vpack.c.bf16 %v3524_v6, %v3523_v19  ;;  %v3532_v37 = vld [vmem:[%s6458_s2 + $0x1e8] sm:$0xff]  ;;  %v3534_v19 = vld [vmem:[%s6458_s2 + $0x1f8] sm:$0xff] }
  0xd0   : > { %5025 = vmatprep.subr.bf16.mxu0 %v5024_v43  ;;  %v2254_v6 = vld [vmem:[#allocation2 + $0x198] sm:$0xff] }
  0xd1   : > { %4210 = vmatmul.mubr.f32.gmra.mrb[30].mxu1 %v6144_v17 }
  0xd2   : > { %4586 = vmatmul.mubr.f32.gmra.mrb[14].mxu0 %v6059_v11  ;;  %4244 = vmatprep.mubr.f32.mxu1 %v998_v49  ;;  %v3530_v49 = vld [vmem:[%s6458_s2 + $0x1d8] sm:$0xff] }
  0xd3   : > { %4588 = vmatprep.mubr.f32.mxu0 %v6063_v2  ;;  %5027 = vmatpush3.bf16.msra.mxu0 %v5024_v43  ;;  %v3526_v43 = vld [vmem:[%s6458_s2 + $0x1b8] sm:$0xff] }
  0xd4   : > { %5029 = vmatprep.subr.bf16.mxu0 %v6147_v13 }
  0xd5   : > { %4245 = vmatmul.mubr.f32.vlgmr.msra.gmra.mrb[0].mxu1 %v999_v32  ;;  %v3525_v32 = vld [vmem:[%s6458_s2 + $0x1b0] sm:$0xff] }
  0xd6   : > { %4589 = vmatmul.mubr.f32.gmra.mrb[16].mxu0 %v6074_v62  ;;  %4871 = vmatpush3.bf16.msra.mxu1 %v6034_v35  ;;  %v3528_v35 = vld [vmem:[%s6458_s2 + $0x1c8] sm:$0xff] }
  0xd7   : > { %4247 = vmatprep.mubr.f32.mxu1 %v5753_v52  ;;  %4591 = vmatprep.mubr.f32.mxu0 %v6077_v26  ;;  %v4880_v52 = vpack.c.bf16 %v3526_v43, %v3525_v32  ;;  %v2530_v32 = vld [vmem:[#allocation2 + $0x31] sm:$0xff] }
  0xd8   : > { %4873 = vmatprep.subr.bf16.mxu1 %v4872_v33  ;;  %v3602_v43 = vld [vmem:[%s6458_s2 + $0x418] sm:$0xff] }
  0xd9   : > { %4248 = vmatmul.mubr.f32.gmra.mrb[2].mxu1 %v5766_v57  ;;  %v3527_v57 = vld [vmem:[%s6458_s2 + $0x1c0] sm:$0xff] }
  0xda   : > { %4592 = vmatmul.mubr.f32.gmra.mrb[18].mxu0 %v6088_v22  ;;  %4250 = vmatprep.mubr.f32.mxu1 %v5770_v59  ;;  %v4884_v59 = vpack.c.bf16 %v3528_v35, %v3527_v57  ;;  %v3604_v57 = vld [vmem:[%s6458_s2 + $0x428] sm:$0xff] }
  0xdb   : > { %4594 = vmatprep.mubr.f32.mxu0 %v6091_v7  ;;  %4875 = vmatpush3.bf16.msra.mxu1 %v4872_v33  ;;  %v2534_v35 = vld [vmem:[#allocation2 + $0x61] sm:$0xff] }
  0xdc   : > { %4877 = vmatprep.subr.bf16.mxu1 %v4876_v46 }
  0xdd   : > { %4251 = vmatmul.mubr.f32.gmra.mrb[4].mxu1 %v5785_v1  ;;  %v3529_v1 = vld [vmem:[%s6458_s2 + $0x1d0] sm:$0xff] }
  0xde   : > { %4595 = vmatmul.mubr.f32.gmra.mrb[20].mxu0 %v6102_v63  ;;  %4253 = vmatprep.mubr.f32.mxu1 %v5789_v4  ;;  %v4888_v4 = vpack.c.bf16 %v3530_v49, %v3529_v1  ;;  %v3606_v1 = vld [vmem:[%s6458_s2 + $0x438] sm:$0xff] }
  0xdf   : > { %4597 = vmatprep.mubr.f32.mxu0 %v6105_v29  ;;  %4879 = vmatpush3.bf16.msra.mxu1 %v4876_v46  ;;  %v2255_v46 = vld [vmem:[#allocation2 + $0x1a0] sm:$0xff] }
  0xe0   : > { %4881 = vmatprep.subr.bf16.mxu1 %v4880_v52 }
  0xe1   : > { %4254 = vmatmul.mubr.f32.gmra.mrb[6].mxu1 %v5803_v10  ;;  %v3531_v10 = vld [vmem:[%s6458_s2 + $0x1e0] sm:$0xff] }
  0xe2   : > { %4598 = vmatmul.mubr.f32.gmra.mrb[22].mxu0 %v6116_v39  ;;  %4256 = vmatprep.mubr.f32.mxu1 %v5807_v12  ;;  %v6209_v12 = vld [vmem:[#allocation2 + $0x180] sm:$0xff]  ;;  %v4892_v33 = vpack.c.bf16 %v3532_v37, %v3531_v10  ;;  %v3610_v37 = vld [vmem:[%s6458_s2 + $0x458] sm:$0xff] }
  0xe3   : > { %4600 = vmatprep.mubr.f32.mxu0 %v6119_v53  ;;  %4883 = vmatpush3.bf16.msra.mxu1 %v4880_v52 }
  0xe4   : > { %4885 = vmatprep.subr.bf16.mxu1 %v4884_v59 }
  0xe5   : > { %4257 = vmatmul.mubr.f32.gmra.mrb[8].mxu1 %v5821_v18  ;;  %v3533_v18 = vld [vmem:[%s6458_s2 + $0x1f0] sm:$0xff] }
  0xe6   : > { %4601 = vmatmul.mubr.f32.gmra.mrb[24].mxu0 %v6130_v27  ;;  %4259 = vmatprep.mubr.f32.mxu1 %v5825_v20  ;;  %v6221_v20 = vld [vmem:[#allocation2 + $0x188] sm:$0xff] }
  0xe7   : > { %4603 = vmatprep.mubr.f32.mxu0 %v6133_v42  ;;  %4887 = vmatpush3.bf16.msra.mxu1 %v4884_v59 }
  0xe8   : > { %4889 = vmatprep.subr.bf16.mxu1 %v4888_v4 }
  0xe9   : > { %4260 = vmatmul.mubr.f32.gmra.mrb[10].mxu1 %v5839_v28  ;;  %v4896_v28 = vpack.c.bf16 %v3534_v19, %v3533_v18  ;;  %v3612_v19 = vld [vmem:[%s6458_s2 + $0x468] sm:$0xff] }
  0xea   : > { %4604 = vmatmul.mubr.f32.gmra.mrb[26].mxu0 %v6144_v17  ;;  %4262 = vmatprep.mubr.f32.mxu1 %v5843_v30  ;;  %v3601_v30 = vld [vmem:[%s6458_s2 + $0x410] sm:$0xff] }
  0xeb   : > { %4606 = vmatprep.mubr.f32.mxu0 %v6209_v12  ;;  %4891 = vmatpush3.bf16.msra.mxu1 %v4888_v4  ;;  %v5032_v52 = vpack.c.bf16 %v3602_v43, %v3601_v30  ;;  %v3608_v4 = vld [vmem:[%s6458_s2 + $0x448] sm:$0xff]  ;;  %v6550_v43 = vld [vmem:[#allocation30_spill] sm:$0xff] }
  0xec   : > { %4893 = vmatprep.subr.bf16.mxu1 %v4892_v33  ;;  %v6549_v30 = vld [vmem:[#allocation9_spill] sm:$0xff] }
  0xed   : > { %4263 = vmatmul.mubr.f32.gmra.mrb[12].mxu1 %v5857_v36  ;;  %v2531_v36 = vld [vmem:[#allocation2 + $0x39] sm:$0xff] }
  0xee   : > { %4607 = vmatmul.mubr.f32.gmra.mrb[28].mxu0 %v6221_v20  ;;  %4265 = vmatprep.mubr.f32.mxu1 %v5861_v38  ;;  %v2532_v38 = vld [vmem:[#allocation2 + $0x49] sm:$0xff] }
  0xef   : > { %4609 = vmatprep.mubr.f32.mxu0 %v2254_v6  ;;  %4895 = vmatpush3.bf16.msra.mxu1 %v4892_v33  ;;  %v2540_v33 = vld [vmem:[#allocation2 + $0xa9] sm:$0xff]  ;;  %v3614_v6 = vld [vmem:[%s6458_s2 + $0x478] sm:$0xff] }
  0xf0   : > { %4897 = vmatprep.subr.bf16.mxu1 %v4896_v28 }
  0xf1   : > { %4266 = vmatmul.mubr.f32.gmra.mrb[14].mxu1 %v5875_v45  ;;  %v3603_v45 = vld [vmem:[%s6458_s2 + $0x420] sm:$0xff] }
  0xf2   : > { %4610 = vmatmul.mubr.f32.gmra.mrb[30].mxu0 %v2255_v46  ;;  %4268 = vmatprep.mubr.f32.mxu1 %v5879_v47  ;;  %v2533_v47 = vld [vmem:[#allocation2 + $0x51] sm:$0xff]  ;;  %v5036_v59 = vpack.c.bf16 %v3604_v57, %v3603_v45  ;;  %v6547_v46 = vld [vmem:[#allocation29_spill] sm:$0xff] }
  0xf3   : > { %4644 = vmatprep.mubr.f32.mxu0 %v2530_v32  ;;  %4899 = vmatpush3.bf16.msra.mxu1 %v4896_v28  ;;  %v6546_v28 = vld [vmem:[#allocation18_spill] sm:$0xff]  ;;  %v6548_v32 = vld [vmem:[#allocation19_spill] sm:$0xff]  ;;  %v6323_v45 = vld [vmem:[#allocation2 + $0x181] sm:$0xff] }
  0xf4   : > { %5060 = vmatprep.subr.bf16.mxu1 %v5522_v61  ;;  %v6554_v57 = vld [vmem:[#allocation10_spill] sm:$0xff] }
  0xf5   : > { %4269 = vmatmul.mubr.f32.gmra.mrb[16].mxu1 %v5893_v54  ;;  %v3605_v54 = vld [vmem:[%s6458_s2 + $0x430] sm:$0xff] }
  0xf6   : > { %4645 = vmatmul.mubr.f32.vlgmr.msra.gmra.mrb[0].mxu0 %v2531_v36  ;;  %4271 = vmatprep.mubr.f32.mxu1 %v5895_v60  ;;  %v2535_v60 = vld [vmem:[#allocation2 + $0x69] sm:$0xff]  ;;  %v5040_v49 = vpack.c.bf16 %v3606_v1, %v3605_v54  ;;  %v6551_v36 = vld [vmem:[#allocation20_spill] sm:$0xff] }
  0xf7   : > { %5031 = vmatpush3.bf16.msra.mxu0 %v6147_v13  ;;  %4647 = vmatprep.mubr.f32.mxu0 %v2532_v38  ;;  %v2536_v13 = vld [vmem:[#allocation2 + $0x79] sm:$0xff]  ;;  %v6330_v54 = vld [vmem:[#allocation2 + $0x189] sm:$0xff] }
  0xf8   : > { %5033 = vmatprep.subr.bf16.mxu0 %v5032_v52  ;;  %v6552_v38 = vld [vmem:[#allocation31_spill] sm:$0xff] }
  0xf9   : > { %4272 = vmatmul.mubr.f32.gmra.mrb[18].mxu1 %v5908_v8  ;;  %v3607_v8 = vld [vmem:[%s6458_s2 + $0x440] sm:$0xff] }
  0xfa   : > { %4648 = vmatmul.mubr.f32.gmra.mrb[2].mxu0 %v2533_v47  ;;  %4274 = vmatprep.mubr.f32.mxu1 %v5912_v15  ;;  %v2537_v15 = vld [vmem:[#allocation2 + $0x81] sm:$0xff]  ;;  %v5044_v10 = vpack.c.bf16 %v3608_v4, %v3607_v8  ;;  %v2560_v1 = vld [vmem:[#allocation2 + $0x199] sm:$0xff] }
  0xfb   : > { %4650 = vmatprep.mubr.f32.mxu0 %v2534_v35  ;;  %5035 = vmatpush3.bf16.msra.mxu0 %v5032_v52  ;;  %v6553_v52 = vld [vmem:[#allocation21_spill] sm:$0xff]  ;;  %v6555_v47 = vld [vmem:[#allocation32_spill] sm:$0xff]  ;;  %v6556_v35 = vld [vmem:[#allocation22_spill] sm:$0xff] }
  0xfc   : > { %5037 = vmatprep.subr.bf16.mxu0 %v5036_v59  ;;  %v2561_v8 = vld [vmem:[#allocation2 + $0x1a1] sm:$0xff]  ;;  %v2836_v4 = vld [vmem:[#allocation2 + $0x32] sm:$0xff] }
  0xfd   : > { %4275 = vmatmul.mubr.f32.gmra.mrb[20].mxu1 %v5927_v31  ;;  %v3609_v31 = vld [vmem:[%s6458_s2 + $0x450] sm:$0xff] }
  0xfe   : > { %4651 = vmatmul.mubr.f32.gmra.mrb[4].mxu0 %v2535_v60  ;;  %4277 = vmatprep.mubr.f32.mxu1 %v5931_v34  ;;  %v2539_v34 = vld [vmem:[#allocation2 + $0x99] sm:$0xff]  ;;  %v5048_v18 = vpack.c.bf16 %v3610_v37, %v3609_v31  ;;  %v2838_v37 = vld [vmem:[#allocation2 + $0x4a] sm:$0xff] }
  0xff   : > { %4653 = vmatprep.mubr.f32.mxu0 %v2536_v13  ;;  %5039 = vmatpush3.bf16.msra.mxu0 %v5036_v59  ;;  %v6557_v59 = vld [vmem:[#allocation33_spill] sm:$0xff]  ;;  %v6558_v60 = vld [vmem:[#allocation11_spill] sm:$0xff]  ;;  %v6559_v13 = vld [vmem:[#allocation34_spill] sm:$0xff] }
 0x100   : > { %5041 = vmatprep.subr.bf16.mxu0 %v5040_v49  ;;  %v2837_v31 = vld [vmem:[#allocation2 + $0x3a] sm:$0xff] }
 0x101   : > { %4278 = vmatmul.mubr.f32.gmra.mrb[22].mxu1 %v5945_v48  ;;  %v3611_v48 = vld [vmem:[%s6458_s2 + $0x460] sm:$0xff] }
 0x102   : > { %4654 = vmatmul.mubr.f32.gmra.mrb[6].mxu0 %v2537_v15  ;;  %4280 = vmatprep.mubr.f32.mxu1 %v5949_v50  ;;  %v5052_v50 = vpack.c.bf16 %v3612_v19, %v3611_v48  ;;  %v6561_v15 = vld [vmem:[#allocation12_spill] sm:$0xff]  ;;  %v2844_v48 = vld [vmem:[#allocation2 + $0x92] sm:$0xff] }
 0x103   : > { %4656 = vmatprep.mubr.f32.mxu0 %v5708_v25  ;;  %5043 = vmatpush3.bf16.msra.mxu0 %v5040_v49  ;;  %v2541_v25 = vld [vmem:[#allocation2 + $0xb1] sm:$0xff]  ;;  %v2853_v19 = vld [vmem:[#allocation2 + $0xfa] sm:$0xff] }
 0x104   : > { %5045 = vmatprep.subr.bf16.mxu0 %v5044_v10  ;;  %v6560_v49 = vld [vmem:[#allocation35_spill] sm:$0xff] }
 0x105   : > { %4281 = vmatmul.mubr.f32.gmra.mrb[24].mxu1 %v5963_v16  ;;  %v3613_v16 = vld [vmem:[%s6458_s2 + $0x470] sm:$0xff] }
 0x106   : > { %4657 = vmatmul.mubr.f32.gmra.mrb[8].mxu0 %v2539_v34  ;;  %4283 = vmatprep.mubr.f32.mxu1 %v5967_v23  ;;  %v5056_v23 = vpack.c.bf16 %v3614_v6, %v3613_v16  ;;  %v2839_v34 = vld [vmem:[#allocation2 + $0x52] sm:$0xff]  ;;  %v2856_v16 = vld [vmem:[#allocation2 + $0x122] sm:$0xff] }
 0x107   : > { %4659 = vmatprep.mubr.f32.mxu0 %v2540_v33  ;;  %5047 = vmatpush3.bf16.msra.mxu0 %v5044_v10  ;;  %v6562_v10 = vld [vmem:[#allocation36_spill] sm:$0xff]  ;;  %v1632_v6 = vld [vmem:[#allocation2 + $0x111] sm:$0xff] }
 0x108   : > { %5049 = vmatprep.subr.bf16.mxu0 %v5048_v18  ;;  %v2840_v33 = vld [vmem:[#allocation2 + $0x62] sm:$0xff] }
 0x109   : > { %4284 = vmatmul.mubr.f32.gmra.mrb[26].mxu1 %v5981_v40  ;;  %v6535_v40 = vld [vmem:[#allocation24_spill] sm:$0xff] }
 0x10a   : > { %4660 = vmatmul.mubr.f32.gmra.mrb[10].mxu0 %v2541_v25  ;;  %4286 = vmatprep.mubr.f32.mxu1 %v5985_v5  ;;  %v6542_v5 = vld [vmem:[#allocation27_spill] sm:$0xff]  ;;  %v2854_v25 = vld [vmem:[#allocation2 + $0x10a] sm:$0xff] }
 0x10b   : > { %4662 = vmatprep.mubr.f32.mxu0 %v5736_v44  ;;  %5051 = vmatpush3.bf16.msra.mxu0 %v5048_v18  ;;  %v6532_v44 = vld [vmem:[#allocation23_spill] sm:$0xff] }
 0x10c   : > { %5053 = vmatprep.subr.bf16.mxu0 %v5052_v50  ;;  %v2842_v18 = vld [vmem:[#allocation2 + $0x7a] sm:$0xff] }
 0x10d   : > { %4287 = vmatmul.mubr.f32.gmra.mrb[28].mxu1 %v5999_v55  ;;  %v6543_v55 = vld [vmem:[#allocation17_spill] sm:$0xff] }
 0x10e   : > { %4663 = vmatmul.mubr.f32.gmra.mrb[12].mxu0 %v5751_v51  ;;  %4289 = vmatprep.mubr.f32.mxu1 %v6003_v41  ;;  %v6533_v51 = vld [vmem:[#allocation13_spill] sm:$0xff]  ;;  %v6544_v41 = vld [vmem:[#allocation8_spill] sm:$0xff] }
 0x10f   : > { %4665 = vmatprep.mubr.f32.mxu0 %v5768_v58  ;;  %5055 = vmatpush3.bf16.msra.mxu0 %v5052_v50  ;;  %v6534_v58 = vld [vmem:[#allocation6_spill] sm:$0xff] }
 0x110   : > { %5057 = vmatprep.subr.bf16.mxu0 %v5056_v23  ;;  %v2855_v50 = vld [vmem:[#allocation2 + $0x112] sm:$0xff] }
 0x111   : > { %4290 = vmatmul.mubr.f32.gmra.mrb[30].mxu1 %v6017_v56  ;;  %v6545_v56 = vld [vmem:[#allocation28_spill] sm:$0xff] }
 0x112   : > { %4666 = vmatmul.mubr.f32.gmra.mrb[14].mxu0 %v5782_v0  ;;  %4324 = vmatprep.mubr.f32.mxu1 %v5910_v14  ;;  %v6536_v0 = vld [vmem:[#allocation14_spill] sm:$0xff]  ;;  %v6537_v14 = vld [vmem:[#allocation25_spill] sm:$0xff] }
 0x113   : > { %4668 = vmatprep.mubr.f32.mxu0 %v5787_v3  ;;  %5059 = vmatpush3.bf16.msra.mxu0 %v5056_v23  ;;  %v6538_v3 = vld [vmem:[#allocation15_spill] sm:$0xff]  ;;  %v1633_v23 = vld [vmem:[#allocation2 + $0x121] sm:$0xff] }
 0x115   : > { %4325 = vmatmul.mubr.f32.vlgmr.msra.gmra.mrb[0].mxu1 %v5923_v24  ;;  %v6539_v24 = vld [vmem:[#allocation7_spill] sm:$0xff] }
 0x116   : > { %4669 = vmatmul.mubr.f32.gmra.mrb[16].mxu0 %v5800_v9  ;;  %5068 = vmatpush3.bf16.msra.mxu1 %v5522_v61  ;;  %v6540_v9 = vld [vmem:[#allocation26_spill] sm:$0xff]  ;;  %v6541_v61 = vld [vmem:[#allocation16_spill] sm:$0xff] }
 0x117   : > { %4327 = vmatprep.mubr.f32.mxu1 %v6532_v44  ;;  %4671 = vmatprep.mubr.f32.mxu0 %v6533_v51  ;;  %v2858_v44 = vld [vmem:[#allocation2 + $0x13a] sm:$0xff]  ;;  %v1634_v51 = vld [vmem:[#allocation2 + $0x129] sm:$0xff] }
 0x118   : > { %5061 = vmatprep.subr.bf16.mxu1 %v6534_v58 }
 0x119   : > { %4328 = vmatmul.mubr.f32.gmra.mrb[2].mxu1 %v6535_v40  ;;  %v1635_v40 = vld [vmem:[#allocation2 + $0x139] sm:$0xff] }
 0x11a   : > { %4672 = vmatmul.mubr.f32.gmra.mrb[18].mxu0 %v6536_v0  ;;  %4330 = vmatprep.mubr.f32.mxu1 %v6537_v14  ;;  %v2860_v0 = vld [vmem:[#allocation2 + $0x152] sm:$0xff]  ;;  %v1636_v14 = vld [vmem:[#allocation2 + $0x141] sm:$0xff] }
 0x11b   : > { %4674 = vmatprep.mubr.f32.mxu0 %v6538_v3  ;;  %5069 = vmatpush3.bf16.msra.mxu1 %v6534_v58  ;;  %v2859_v58 = vld [vmem:[#allocation2 + $0x142] sm:$0xff]  ;;  %v2861_v3 = vld [vmem:[#allocation2 + $0x15a] sm:$0xff] }
 0x11c   : > { %5062 = vmatprep.subr.bf16.mxu1 %v6539_v24 }
 0x11d   : > { %4331 = vmatmul.mubr.f32.gmra.mrb[4].mxu1 %v6540_v9  ;;  %v2862_v9 = vld [vmem:[#allocation2 + $0x16a] sm:$0xff] }
 0x11e   : > { %4675 = vmatmul.mubr.f32.gmra.mrb[20].mxu0 %v6541_v61  ;;  %4333 = vmatprep.mubr.f32.mxu1 %v6542_v5  ;;  %v1638_v61 = vld [vmem:[#allocation2 + $0x159] sm:$0xff] }
 0x11f   : > { %4677 = vmatprep.mubr.f32.mxu0 %v6543_v55  ;;  %5070 = vmatpush3.bf16.msra.mxu1 %v6539_v24  ;;  %v1637_v24 = vld [vmem:[#allocation2 + $0x151] sm:$0xff]  ;;  %v1639_v55 = vld [vmem:[#allocation2 + $0x169] sm:$0xff] }
 0x120   : > { %5063 = vmatprep.subr.bf16.mxu1 %v6544_v41  ;;  %v2863_v5 = vld [vmem:[#allocation2 + $0x172] sm:$0xff] }
 0x121   : > { %4334 = vmatmul.mubr.f32.gmra.mrb[6].mxu1 %v6545_v56  ;;  %v1640_v56 = vld [vmem:[#allocation2 + $0x171] sm:$0xff] }
 0x122   : > { %4678 = vmatmul.mubr.f32.gmra.mrb[22].mxu0 %v6546_v28  ;;  %4336 = vmatprep.mubr.f32.mxu1 %v6547_v46  ;;  %v2865_v28 = vld [vmem:[#allocation2 + $0x18a] sm:$0xff]  ;;  %v2866_v46 = vld [vmem:[#allocation2 + $0x19a] sm:$0xff] }
 0x123   : > { %4680 = vmatprep.mubr.f32.mxu0 %v6548_v32  ;;  %5071 = vmatpush3.bf16.msra.mxu1 %v6544_v41  ;;  %v2864_v41 = vld [vmem:[#allocation2 + $0x182] sm:$0xff] }
 0x124   : > { %5064 = vmatprep.subr.bf16.mxu1 %v6549_v30  ;;  %v2867_v32 = vld [vmem:[#allocation2 + $0x1a2] sm:$0xff] }
 0x125   : > { %4337 = vmatmul.mubr.f32.gmra.mrb[8].mxu1 %v6550_v43 }
 0x126   : > { %4681 = vmatmul.mubr.f32.gmra.mrb[24].mxu0 %v6551_v36  ;;  %4339 = vmatprep.mubr.f32.mxu1 %v6552_v38 }
 0x127   : > { %4683 = vmatprep.mubr.f32.mxu0 %v6553_v52  ;;  %5072 = vmatpush3.bf16.msra.mxu1 %v6549_v30 }
 0x128   : > { %5065 = vmatprep.subr.bf16.mxu1 %v6554_v57 }
 0x129   : > { %4340 = vmatmul.mubr.f32.gmra.mrb[10].mxu1 %v6555_v47 }
 0x12a   : > { %4684 = vmatmul.mubr.f32.gmra.mrb[26].mxu0 %v6556_v35  ;;  %4342 = vmatprep.mubr.f32.mxu1 %v6557_v59 }
 0x12b   : > { %4686 = vmatprep.mubr.f32.mxu0 %v6323_v45  ;;  %5073 = vmatpush3.bf16.msra.mxu1 %v6554_v57 }
 0x12c   : > { %5066 = vmatprep.subr.bf16.mxu1 %v6558_v60 }
 0x12d   : > { %4343 = vmatmul.mubr.f32.gmra.mrb[12].mxu1 %v6559_v13 }
 0x12e   : > { %4687 = vmatmul.mubr.f32.gmra.mrb[28].mxu0 %v6330_v54  ;;  %4345 = vmatprep.mubr.f32.mxu1 %v6560_v49 }
 0x12f   : > { %4689 = vmatprep.mubr.f32.mxu0 %v2560_v1  ;;  %5074 = vmatpush3.bf16.msra.mxu1 %v6558_v60 }
 0x130   : > { %5067 = vmatprep.subr.bf16.mxu1 %v6561_v15 }
 0x131   : > { %4346 = vmatmul.mubr.f32.gmra.mrb[14].mxu1 %v6562_v10 }
 0x132   : > { %4690 = vmatmul.mubr.f32.gmra.mrb[30].mxu0 %v2561_v8  ;;  %4348 = vmatprep.mubr.f32.mxu1 %v6047_v21  ;;  %v2841_v21 = vld [vmem:[#allocation2 + $0x6a] sm:$0xff] }
 0x133   : > { %4724 = vmatprep.mubr.f32.mxu0 %v2836_v4  ;;  %5075 = vmatpush3.bf16.msra.mxu1 %v6561_v15  ;;  %v6374_v15 = vld [vmem:[%s6459_s3] ss:$0 sm:$0xff] }
 0x135   : > { %4349 = vmatmul.mubr.f32.gmra.mrb[16].mxu1 %v6059_v11  ;;  %v2843_v11 = vld [vmem:[#allocation2 + $0x82] sm:$0xff] }
 0x136   : > { %4725 = vmatmul.mubr.f32.vlgmr.msra.gmra.mrb[0].mxu0 %v2837_v31  ;;  %4351 = vmatprep.mubr.f32.mxu1 %v6063_v2  ;;  %v2845_v2 = vld [vmem:[#allocation2 + $0x9a] sm:$0xff] }
 0x137   : > { %4727 = vmatprep.mubr.f32.mxu0 %v2838_v37 }
 0x139   : > { %4352 = vmatmul.mubr.f32.gmra.mrb[18].mxu1 %v6074_v62  ;;  %v2846_v62 = vld [vmem:[#allocation2 + $0xaa] sm:$0xff] }
 0x13a   : > { %4728 = vmatmul.mubr.f32.gmra.mrb[2].mxu0 %v2839_v34  ;;  %4354 = vmatprep.mubr.f32.mxu1 %v6077_v26  ;;  %v2848_v26 = vld [vmem:[#allocation2 + $0xc2] sm:$0xff] }
 0x13b   : > { %4730 = vmatprep.mubr.f32.mxu0 %v2840_v33 }
 0x13d   : > { %4355 = vmatmul.mubr.f32.gmra.mrb[20].mxu1 %v6088_v22  ;;  %v2847_v22 = vld [vmem:[#allocation2 + $0xb2] sm:$0xff] }
 0x13e   : > { %4731 = vmatmul.mubr.f32.gmra.mrb[4].mxu0 %v2841_v21  ;;  %4357 = vmatprep.mubr.f32.mxu1 %v6091_v7  ;;  %v2850_v7 = vld [vmem:[#allocation2 + $0xda] sm:$0xff] }
 0x13f   : > { %4733 = vmatprep.mubr.f32.mxu0 %v2842_v18 }
 0x141   : > { %4358 = vmatmul.mubr.f32.gmra.mrb[22].mxu1 %v6102_v63  ;;  %v2849_v63 = vld [vmem:[#allocation2 + $0xca] sm:$0xff] }
 0x142   : > { %4734 = vmatmul.mubr.f32.gmra.mrb[6].mxu0 %v2843_v11  ;;  %4360 = vmatprep.mubr.f32.mxu1 %v6105_v29  ;;  %v1627_v29 = vld [vmem:[#allocation2 + $0xd9] sm:$0xff] }
 0x143   : > { %4736 = vmatprep.mubr.f32.mxu0 %v2844_v48 }
 0x145   : > { %4361 = vmatmul.mubr.f32.gmra.mrb[24].mxu1 %v6116_v39  ;;  %v2851_v39 = vld [vmem:[#allocation2 + $0xe2] sm:$0xff] }
 0x146   : > { %4737 = vmatmul.mubr.f32.gmra.mrb[8].mxu0 %v2845_v2  ;;  %4363 = vmatprep.mubr.f32.mxu1 %v6119_v53  ;;  %v2852_v53 = vld [vmem:[#allocation2 + $0xf2] sm:$0xff] }
 0x147   : > { %4739 = vmatprep.mubr.f32.mxu0 %v2846_v62 }
 0x149   : > { %4364 = vmatmul.mubr.f32.gmra.mrb[26].mxu1 %v6130_v27  ;;  %v1628_v27 = vld [vmem:[#allocation2 + $0xe1] sm:$0xff] }
 0x14a   : > { %4740 = vmatmul.mubr.f32.gmra.mrb[10].mxu0 %v2847_v22  ;;  %4366 = vmatprep.mubr.f32.mxu1 %v6133_v42  ;;  %v1629_v42 = vld [vmem:[#allocation2 + $0xf1] sm:$0xff] }
 0x14b   : > { %4742 = vmatprep.mubr.f32.mxu0 %v2848_v26 }
 0x14d   : > { %4367 = vmatmul.mubr.f32.gmra.mrb[28].mxu1 %v6144_v17  ;;  %v1630_v17 = vld [vmem:[#allocation2 + $0xf9] sm:$0xff] }
 0x14e   : > { %4743 = vmatmul.mubr.f32.gmra.mrb[12].mxu0 %v2849_v63  ;;  %4369 = vmatprep.mubr.f32.mxu1 %v6209_v12  ;;  %v1631_v12 = vld [vmem:[#allocation2 + $0x109] sm:$0xff] }
 0x14f   : > { %4745 = vmatprep.mubr.f32.mxu0 %v2850_v7 }
 0x151   : > { %4370 = vmatmul.mubr.f32.gmra.mrb[30].mxu1 %v6221_v20  ;;  %v2857_v20 = vld [vmem:[#allocation2 + $0x12a] sm:$0xff] }
 0x152   : > { %4746 = vmatmul.mubr.f32.gmra.mrb[14].mxu0 %v2851_v39  ;;  %4428 = vmatprep.mubr.f32.mxu1 %v1627_v29 }
 0x153   : > { %4748 = vmatprep.mubr.f32.mxu0 %v2852_v53 }
 0x155   : > { %4429 = vmatmul.mubr.f32.vlgmr.msra.gmra.mrb[16].mxu1 %v1628_v27 }
 0x156   : > { %4749 = vmatmul.mubr.f32.gmra.mrb[16].mxu0 %v2853_v19  ;;  %4431 = vmatprep.mubr.f32.mxu1 %v1629_v42 }
 0x157   : > { %4751 = vmatprep.mubr.f32.mxu0 %v2854_v25 }
 0x159   : > { %4432 = vmatmul.mubr.f32.gmra.mrb[18].mxu1 %v1630_v17 }
 0x15a   : > { %4752 = vmatmul.mubr.f32.gmra.mrb[18].mxu0 %v2855_v50  ;;  %4434 = vmatprep.mubr.f32.mxu1 %v1631_v12 }
 0x15b   : > { %4754 = vmatprep.mubr.f32.mxu0 %v2856_v16 }
 0x15d   : > { %4435 = vmatmul.mubr.f32.gmra.mrb[20].mxu1 %v1632_v6 }
 0x15e   : > { %4755 = vmatmul.mubr.f32.gmra.mrb[20].mxu0 %v2857_v20  ;;  %4437 = vmatprep.mubr.f32.mxu1 %v1633_v23 }
 0x15f   : > { %4757 = vmatprep.mubr.f32.mxu0 %v2858_v44 }
 0x161   : > { %4438 = vmatmul.mubr.f32.gmra.mrb[22].mxu1 %v1634_v51 }
 0x162   : > { %4758 = vmatmul.mubr.f32.gmra.mrb[22].mxu0 %v2859_v58  ;;  %4440 = vmatprep.mubr.f32.mxu1 %v1635_v40 }
 0x163   : > { %4760 = vmatprep.mubr.f32.mxu0 %v2860_v0 }
 0x165   : > { %4441 = vmatmul.mubr.f32.gmra.mrb[24].mxu1 %v1636_v14 }
 0x166   : > { %4761 = vmatmul.mubr.f32.gmra.mrb[24].mxu0 %v2861_v3  ;;  %4443 = vmatprep.mubr.f32.mxu1 %v1637_v24 }
 0x167   : > { %4763 = vmatprep.mubr.f32.mxu0 %v2862_v9 }
 0x169   : > { %4444 = vmatmul.mubr.f32.gmra.mrb[26].mxu1 %v1638_v61 }
 0x16a   : > { %4764 = vmatmul.mubr.f32.gmra.mrb[26].mxu0 %v2863_v5  ;;  %4446 = vmatprep.mubr.f32.mxu1 %v1639_v55 }
 0x16b   : > { %4766 = vmatprep.mubr.f32.mxu0 %v2864_v41 }
 0x16d   : > { %4447 = vmatmul.mubr.f32.gmra.mrb[28].mxu1 %v1640_v56 }
 0x16e   : > { %4767 = vmatmul.mubr.f32.gmra.mrb[28].mxu0 %v2865_v28  ;;  %4449 = vmatprep.mubr.f32.mxu1 %v6323_v45 }
 0x16f   : > { %4769 = vmatprep.mubr.f32.mxu0 %v2866_v46 }
 0x171   : > { %4450 = vmatmul.mubr.f32.gmra.mrb[30].mxu1 %v6330_v54 }
 0x172   : > { %4770 = vmatmul.mubr.f32.gmra.mrb[30].mxu0 %v2867_v32 }
 0x1e8   : > { %v4326_v30 = vpop.f32.mrb[0].mxu1 }
 0x1e9   : > { %v1420_v43 = vpop.f32.mrb[1].mxu1 }
 0x1ec   : > { %v4329_v36 = vpop.f32.mrb[2].mxu1 }
 0x1ed   : > { %v1430_v38 = vpop.f32.mrb[3].mxu1 }
 0x1f0   : > { %v4332_v52 = vpop.f32.mrb[4].mxu1 }
 0x1f1   : > { %v1440_v57 = vpop.f32.mrb[5].mxu1 }
 0x1f4   : > { %v4335_v47 = vpop.f32.mrb[6].mxu1 }
 0x1f5   : > { %v1450_v35 = vpop.f32.mrb[7].mxu1 }
 0x1f8   : > { %v4338_v59 = vpop.f32.mrb[8].mxu1 }
 0x1f9   : > { %v1460_v1 = vpop.f32.mrb[9].mxu1 }
 0x1fc   : > { %v6359_v60 = vpop.f32.mrb[10].mxu1 }
 0x1fd   : > { %v6361_v13 = vpop.f32.mrb[11].mxu1 }
 0x200   : > { %v6363_v45 = vpop.f32.mrb[12].mxu1 }
 0x201   : > { %v6365_v54 = vpop.f32.mrb[13].mxu1 }
 0x204   : > { %v6367_v49 = vpop.f32.mrb[14].mxu1 }
 0x205   : > { %v6369_v8 = vpop.f32.mrb[15].mxu1 }
 0x209   : > { %v4726_v4 = vpop.f32.mrb[0].mxu0 }
 0x20a   : > { %v5076_v10 = vadd.f32 %v4726_v4, %v4326_v30  ;;  %v2951_v31 = vpop.f32.mrb[1].mxu0 }
 0x20b   : > { %v5077_v37 = vadd.f32 %v2951_v31, %v1420_v43 }
 0x20c   : > { %v3150_v34 = vadd.f32 %v5076_v10, %v6374_v15 }
 0x20d   : > { %v3149_v33 = vadd.f32 %v5077_v37, %v6374_v15  ;;  %v4729_v21 = vpop.f32.mrb[2].mxu0 }
 0x20e   : > { %3182 = vst [vmem:[%s5446_s7 + $0x8] sm:$0xff] %v3150_v34  ;;  %v3251_v18 = vmul.f32 %v3150_v34, %v3150_v34  ;;  %v5078_v11 = vadd.f32 %v4729_v21, %v4329_v36  ;;  %v2961_v48 = vpop.f32.mrb[3].mxu0 }
 0x20f   : > { %3181 = vst [vmem:[%s5446_s7] sm:$0xff] %v3149_v33  ;;  %v3213_v2 = vadd.f32 %v3150_v34, %v3149_v33  ;;  %v3250_v62 = vmul.f32 %v3149_v33, %v3149_v33  ;;  %v5079_v22 = vadd.f32 %v2961_v48, %v1430_v38 }
 0x210   : > { %v3152_v26 = vadd.f32 %v5078_v11, %v6374_v15 }
 0x211   : > { %v3282_v63 = vadd.f32 %v3251_v18, %v3250_v62  ;;  %v3151_v7 = vadd.f32 %v5079_v22, %v6374_v15  ;;  %v4732_v39 = vpop.f32.mrb[4].mxu0 }
 0x212   : > { %3184 = vst [vmem:[%s5446_s7 + $0x18] sm:$0xff] %v3152_v26  ;;  %v5080_v29 = vadd.f32 %v4732_v39, %v4332_v52  ;;  %v2971_v53 = vpop.f32.mrb[5].mxu0  ;;  %v3253_v17 = vmul.f32 %v3152_v26, %v3152_v26 }
 0x213   : > { %3183 = vst [vmem:[%s5446_s7 + $0x10] sm:$0xff] %v3151_v7  ;;  %v3214_v27 = vadd.f32 %v3213_v2, %v3151_v7  ;;  %v3252_v19 = vmul.f32 %v3151_v7, %v3151_v7  ;;  %v5081_v42 = vadd.f32 %v2971_v53, %v1440_v57 }
 0x214   : > { %v3154_v25 = vadd.f32 %v5080_v29, %v6374_v15 }
 0x215   : > { %v3283_v50 = vadd.f32 %v3282_v63, %v3252_v19  ;;  %v3153_v12 = vadd.f32 %v5081_v42, %v6374_v15  ;;  %v3215_v16 = vadd.f32 %v3214_v27, %v3152_v26  ;;  %v4735_v6 = vpop.f32.mrb[6].mxu0 }
 0x216   : > { %3186 = vst [vmem:[%s5446_s7 + $0x28] sm:$0xff] %v3154_v25  ;;  %v5082_v20 = vadd.f32 %v4735_v6, %v4335_v47  ;;  %v2981_v23 = vpop.f32.mrb[7].mxu0  ;;  %v3255_v14 = vmul.f32 %v3154_v25, %v3154_v25 }
 0x217   : > { %3185 = vst [vmem:[%s5446_s7 + $0x20] sm:$0xff] %v3153_v12  ;;  %v3216_v44 = vadd.f32 %v3215_v16, %v3153_v12  ;;  %v3254_v51 = vmul.f32 %v3153_v12, %v3153_v12  ;;  %v3284_v58 = vadd.f32 %v3283_v50, %v3253_v17  ;;  %v5083_v40 = vadd.f32 %v2981_v23, %v1450_v35 }
 0x218   : > { %v3156_v0 = vadd.f32 %v5082_v20, %v6374_v15 }
 0x219   : > { %v3285_v3 = vadd.f32 %v3284_v58, %v3254_v51  ;;  %v3155_v24 = vadd.f32 %v5083_v40, %v6374_v15  ;;  %v3217_v9 = vadd.f32 %v3216_v44, %v3154_v25  ;;  %v4738_v61 = vpop.f32.mrb[8].mxu0 }
 0x21a   : > { %3188 = vst [vmem:[%s5446_s7 + $0x38] sm:$0xff] %v3156_v0  ;;  %v5084_v5 = vadd.f32 %v4738_v61, %v4338_v59  ;;  %v2991_v55 = vpop.f32.mrb[9].mxu0  ;;  %v3257_v30 = vmul.f32 %v3156_v0, %v3156_v0 }
 0x21b   : > { %3187 = vst [vmem:[%s5446_s7 + $0x30] sm:$0xff] %v3155_v24  ;;  %v3218_v41 = vadd.f32 %v3217_v9, %v3155_v24  ;;  %v3256_v56 = vmul.f32 %v3155_v24, %v3155_v24  ;;  %v3286_v28 = vadd.f32 %v3285_v3, %v3255_v14  ;;  %v5085_v46 = vadd.f32 %v2991_v55, %v1460_v1 }
 0x21c   : > { %v3158_v32 = vadd.f32 %v5084_v5, %v6374_v15 }
 0x21d   : > { %v3287_v43 = vadd.f32 %v3286_v28, %v3256_v56  ;;  %v3157_v36 = vadd.f32 %v5085_v46, %v6374_v15  ;;  %v3219_v38 = vadd.f32 %v3218_v41, %v3156_v0  ;;  %v4741_v52 = vpop.f32.mrb[10].mxu0 }
 0x21e   : > { %3190 = vst [vmem:[%s5446_s7 + $0x48] sm:$0xff] %v3158_v32  ;;  %v5086_v57 = vadd.f32 %v4741_v52, %v6359_v60  ;;  %v3001_v47 = vpop.f32.mrb[11].mxu0  ;;  %v3259_v31 = vmul.f32 %v3158_v32, %v3158_v32 }
 0x21f   : > { %3189 = vst [vmem:[%s5446_s7 + $0x40] sm:$0xff] %v3157_v36  ;;  %v3220_v35 = vadd.f32 %v3219_v38, %v3157_v36  ;;  %v3258_v59 = vmul.f32 %v3157_v36, %v3157_v36  ;;  %v3288_v4 = vadd.f32 %v3287_v43, %v3257_v30  ;;  %v5087_v1 = vadd.f32 %v3001_v47, %v6361_v13 }
 0x220   : > { %v3160_v10 = vadd.f32 %v5086_v57, %v6374_v15 }
 0x221   : > { %v3289_v37 = vadd.f32 %v3288_v4, %v3258_v59  ;;  %v3159_v34 = vadd.f32 %v5087_v1, %v6374_v15  ;;  %v3221_v33 = vadd.f32 %v3220_v35, %v3158_v32  ;;  %v4744_v21 = vpop.f32.mrb[12].mxu0 }
 0x222   : > { %3192 = vst [vmem:[%s5446_s7 + $0x58] sm:$0xff] %v3160_v10  ;;  %v5088_v60 = vadd.f32 %v4744_v21, %v6363_v45  ;;  %v3011_v18 = vpop.f32.mrb[13].mxu0  ;;  %v3261_v22 = vmul.f32 %v3160_v10, %v3160_v10 }
 0x223   : > { %3191 = vst [vmem:[%s5446_s7 + $0x50] sm:$0xff] %v3159_v34  ;;  %v3222_v11 = vadd.f32 %v3221_v33, %v3159_v34  ;;  %v3260_v48 = vmul.f32 %v3159_v34, %v3159_v34  ;;  %v3290_v2 = vadd.f32 %v3289_v37, %v3259_v31  ;;  %v5089_v13 = vadd.f32 %v3011_v18, %v6365_v54 }
 0x224   : > { %v3162_v62 = vadd.f32 %v5088_v60, %v6374_v15 }
 0x225   : > { %v3291_v26 = vadd.f32 %v3290_v2, %v3260_v48  ;;  %v3161_v63 = vadd.f32 %v5089_v13, %v6374_v15  ;;  %v3223_v7 = vadd.f32 %v3222_v11, %v3160_v10  ;;  %v4747_v39 = vpop.f32.mrb[14].mxu0 }
 0x226   : > { %3194 = vst [vmem:[%s5446_s7 + $0x68] sm:$0xff] %v3162_v62  ;;  %v5090_v45 = vadd.f32 %v4747_v39, %v6367_v49  ;;  %v3021_v29 = vpop.f32.mrb[15].mxu0  ;;  %v3263_v17 = vmul.f32 %v3162_v62, %v3162_v62 }
 0x227   : > { %3193 = vst [vmem:[%s5446_s7 + $0x60] sm:$0xff] %v3161_v63  ;;  %v3224_v53 = vadd.f32 %v3223_v7, %v3161_v63  ;;  %v3262_v27 = vmul.f32 %v3161_v63, %v3161_v63  ;;  %v3292_v19 = vadd.f32 %v3291_v26, %v3261_v22  ;;  %v5091_v54 = vadd.f32 %v3021_v29, %v6369_v8 }
 0x228   : > { %v3164_v42 = vadd.f32 %v5090_v45, %v6374_v15  ;;  %v4430_v25 = vpop.f32.mrb[16].mxu1 }
 0x229   : > { %v3293_v50 = vadd.f32 %v3292_v19, %v3262_v27  ;;  %v3163_v12 = vadd.f32 %v5091_v54, %v6374_v15  ;;  %v3225_v16 = vadd.f32 %v3224_v53, %v3162_v62  ;;  %v4750_v6 = vpop.f32.mrb[16].mxu0  ;;  %v1806_v20 = vpop.f32.mrb[17].mxu1 }
 0x22a   : > { %3196 = vst [vmem:[%s5446_s7 + $0x78] sm:$0xff] %v3164_v42  ;;  %v5092_v49 = vadd.f32 %v4750_v6, %v4430_v25  ;;  %v3031_v23 = vpop.f32.mrb[17].mxu0  ;;  %v3265_v14 = vmul.f32 %v3164_v42, %v3164_v42 }
 0x22b   : > { %3195 = vst [vmem:[%s5446_s7 + $0x70] sm:$0xff] %v3163_v12  ;;  %v3226_v44 = vadd.f32 %v3225_v16, %v3163_v12  ;;  %v3264_v51 = vmul.f32 %v3163_v12, %v3163_v12  ;;  %v3294_v58 = vadd.f32 %v3293_v50, %v3263_v17  ;;  %v5093_v8 = vadd.f32 %v3031_v23, %v1806_v20 }
 0x22c   : > { %v3166_v40 = vadd.f32 %v5092_v49, %v6374_v15  ;;  %v4433_v0 = vpop.f32.mrb[18].mxu1 }
 0x22d   : > { %v3295_v3 = vadd.f32 %v3294_v58, %v3264_v51  ;;  %v3165_v24 = vadd.f32 %v5093_v8, %v6374_v15  ;;  %v3227_v9 = vadd.f32 %v3226_v44, %v3164_v42  ;;  %v4753_v61 = vpop.f32.mrb[18].mxu0  ;;  %v1816_v5 = vpop.f32.mrb[19].mxu1 }
 0x22e   : > { %3198 = vst [vmem:[%s5446_s7 + $0x88] sm:$0xff] %v3166_v40  ;;  %v5094_v55 = vadd.f32 %v4753_v61, %v4433_v0  ;;  %v3041_v41 = vpop.f32.mrb[19].mxu0  ;;  %v3267_v36 = vmul.f32 %v3166_v40, %v3166_v40 }
 0x22f   : > { %3197 = vst [vmem:[%s5446_s7 + $0x80] sm:$0xff] %v3165_v24  ;;  %v3228_v56 = vadd.f32 %v3227_v9, %v3165_v24  ;;  %v3266_v28 = vmul.f32 %v3165_v24, %v3165_v24  ;;  %v3296_v46 = vadd.f32 %v3295_v3, %v3265_v14  ;;  %v5095_v32 = vadd.f32 %v3041_v41, %v1816_v5 }
 0x230   : > { %v3168_v30 = vadd.f32 %v5094_v55, %v6374_v15  ;;  %v4436_v43 = vpop.f32.mrb[20].mxu1 }
 0x231   : > { %v3297_v38 = vadd.f32 %v3296_v46, %v3266_v28  ;;  %v3167_v52 = vadd.f32 %v5095_v32, %v6374_v15  ;;  %v3229_v57 = vadd.f32 %v3228_v56, %v3166_v40  ;;  %v4756_v47 = vpop.f32.mrb[20].mxu0  ;;  %v1826_v35 = vpop.f32.mrb[21].mxu1 }
 0x232   : > { %3200 = vst [vmem:[%s5446_s7 + $0x98] sm:$0xff] %v3168_v30  ;;  %v5096_v59 = vadd.f32 %v4756_v47, %v4436_v43  ;;  %v3051_v4 = vpop.f32.mrb[21].mxu0  ;;  %v3269_v21 = vmul.f32 %v3168_v30, %v3168_v30 }
 0x233   : > { %3199 = vst [vmem:[%s5446_s7 + $0x90] sm:$0xff] %v3167_v52  ;;  %v3230_v1 = vadd.f32 %v3229_v57, %v3167_v52  ;;  %v3268_v10 = vmul.f32 %v3167_v52, %v3167_v52  ;;  %v3298_v31 = vadd.f32 %v3297_v38, %v3267_v36  ;;  %v5097_v37 = vadd.f32 %v3051_v4, %v1826_v35 }
 0x234   : > { %v3170_v34 = vadd.f32 %v5096_v59, %v6374_v15  ;;  %v4439_v33 = vpop.f32.mrb[22].mxu1 }
 0x235   : > { %v3299_v60 = vadd.f32 %v3298_v31, %v3268_v10  ;;  %v3169_v18 = vadd.f32 %v5097_v37, %v6374_v15  ;;  %v3231_v11 = vadd.f32 %v3230_v1, %v3168_v30  ;;  %v4759_v48 = vpop.f32.mrb[22].mxu0  ;;  %v1836_v2 = vpop.f32.mrb[23].mxu1 }
 0x236   : > { %3202 = vst [vmem:[%s5446_s7 + $0xa8] sm:$0xff] %v3170_v34  ;;  %v5098_v13 = vadd.f32 %v4759_v48, %v4439_v33  ;;  %v3061_v62 = vpop.f32.mrb[23].mxu0  ;;  %v3271_v29 = vmul.f32 %v3170_v34, %v3170_v34 }
 0x237   : > { %3201 = vst [vmem:[%s5446_s7 + $0xa0] sm:$0xff] %v3169_v18  ;;  %v3232_v22 = vadd.f32 %v3231_v11, %v3169_v18  ;;  %v3270_v26 = vmul.f32 %v3169_v18, %v3169_v18  ;;  %v3300_v63 = vadd.f32 %v3299_v60, %v3269_v21  ;;  %v5099_v7 = vadd.f32 %v3061_v62, %v1836_v2 }
 0x238   : > { %v3172_v39 = vadd.f32 %v5098_v13, %v6374_v15  ;;  %v4442_v45 = vpop.f32.mrb[24].mxu1 }
 0x239   : > { %v3301_v53 = vadd.f32 %v3300_v63, %v3270_v26  ;;  %v3171_v27 = vadd.f32 %v5099_v7, %v6374_v15  ;;  %v3233_v19 = vadd.f32 %v3232_v22, %v3170_v34  ;;  %v4762_v54 = vpop.f32.mrb[24].mxu0  ;;  %v1846_v42 = vpop.f32.mrb[25].mxu1 }
 0x23a   : > { %3204 = vst [vmem:[%s5446_s7 + $0xb8] sm:$0xff] %v3172_v39  ;;  %v5100_v25 = vadd.f32 %v4762_v54, %v4442_v45  ;;  %v3071_v17 = vpop.f32.mrb[25].mxu0  ;;  %v3273_v23 = vmul.f32 %v3172_v39, %v3172_v39 }
 0x23b   : > { %3203 = vst [vmem:[%s5446_s7 + $0xb0] sm:$0xff] %v3171_v27  ;;  %v3234_v50 = vadd.f32 %v3233_v19, %v3171_v27  ;;  %v3272_v12 = vmul.f32 %v3171_v27, %v3171_v27  ;;  %v3302_v16 = vadd.f32 %v3301_v53, %v3271_v29  ;;  %v5101_v6 = vadd.f32 %v3071_v17, %v1846_v42 }
 0x23c   : > { %v3174_v20 = vadd.f32 %v5100_v25, %v6374_v15  ;;  %v4445_v49 = vpop.f32.mrb[26].mxu1 }
 0x23d   : > { %v3303_v44 = vadd.f32 %v3302_v16, %v3272_v12  ;;  %v3173_v51 = vadd.f32 %v5101_v6, %v6374_v15  ;;  %v3235_v58 = vadd.f32 %v3234_v50, %v3172_v39  ;;  %v4765_v8 = vpop.f32.mrb[26].mxu0  ;;  %v1856_v40 = vpop.f32.mrb[27].mxu1 }
 0x23e   : > { %3206 = vst [vmem:[%s5446_s7 + $0xc8] sm:$0xff] %v3174_v20  ;;  %v5102_v0 = vadd.f32 %v4765_v8, %v4445_v49  ;;  %v3081_v14 = vpop.f32.mrb[27].mxu0  ;;  %v3275_v41 = vmul.f32 %v3174_v20, %v3174_v20 }
 0x23f   : > { %3205 = vst [vmem:[%s5446_s7 + $0xc0] sm:$0xff] %v3173_v51  ;;  %v3236_v3 = vadd.f32 %v3235_v58, %v3173_v51  ;;  %v3274_v24 = vmul.f32 %v3173_v51, %v3173_v51  ;;  %v3304_v9 = vadd.f32 %v3303_v44, %v3273_v23  ;;  %v5103_v61 = vadd.f32 %v3081_v14, %v1856_v40 }
 0x240   : > { %v3176_v5 = vadd.f32 %v5102_v0, %v6374_v15  ;;  %v4448_v55 = vpop.f32.mrb[28].mxu1 }
 0x241   : > { %v3305_v56 = vadd.f32 %v3304_v9, %v3274_v24  ;;  %v3175_v28 = vadd.f32 %v5103_v61, %v6374_v15  ;;  %v3237_v46 = vadd.f32 %v3236_v3, %v3174_v20  ;;  %v4768_v32 = vpop.f32.mrb[28].mxu0  ;;  %v1866_v30 = vpop.f32.mrb[29].mxu1 }
 0x242   : > { %3208 = vst [vmem:[%s5446_s7 + $0xd8] sm:$0xff] %v3176_v5  ;;  %v5104_v43 = vadd.f32 %v4768_v32, %v4448_v55  ;;  %v3091_v36 = vpop.f32.mrb[29].mxu0  ;;  %v3277_v4 = vmul.f32 %v3176_v5, %v3176_v5 }
 0x243   : > { %3207 = vst [vmem:[%s5446_s7 + $0xd0] sm:$0xff] %v3175_v28  ;;  %v3238_v38 = vadd.f32 %v3237_v46, %v3175_v28  ;;  %v3276_v52 = vmul.f32 %v3175_v28, %v3175_v28  ;;  %v3306_v57 = vadd.f32 %v3305_v56, %v3275_v41  ;;  %v5105_v47 = vadd.f32 %v3091_v36, %v1866_v30 }
 0x244   : > { %v3178_v35 = vadd.f32 %v5104_v43, %v6374_v15  ;;  %v4451_v59 = vpop.f32.mrb[30].mxu1 }
 0x245   : > { %v3307_v1 = vadd.f32 %v3306_v57, %v3276_v52  ;;  %v3177_v10 = vadd.f32 %v5105_v47, %v6374_v15  ;;  %v3239_v31 = vadd.f32 %v3238_v38, %v3176_v5  ;;  %v4771_v37 = vpop.f32.mrb[30].mxu0  ;;  %v1876_v34 = vpop.f32.mrb[31].mxu1 }
 0x246   : > { %3210 = vst [vmem:[%s5446_s7 + $0xe8] sm:$0xff] %v3178_v35  ;;  %v5106_v33 = vadd.f32 %v4771_v37, %v4451_v59  ;;  %v3101_v21 = vpop.f32.mrb[31].mxu0  ;;  %v3279_v13 = vmul.f32 %v3178_v35, %v3178_v35 }
 0x247   : > { %3209 = vst [vmem:[%s5446_s7 + $0xe0] sm:$0xff] %v3177_v10  ;;  %v3240_v60 = vadd.f32 %v3239_v31, %v3177_v10  ;;  %v3278_v18 = vmul.f32 %v3177_v10, %v3177_v10  ;;  %v3308_v11 = vadd.f32 %v3307_v1, %v3277_v4  ;;  %v5107_v48 = vadd.f32 %v3101_v21, %v1876_v34 }
 0x248   : > { %v3180_v2 = vadd.f32 %v5106_v33, %v6374_v15 }
 0x249   : > { %v3309_v62 = vadd.f32 %v3308_v11, %v3278_v18  ;;  %v3179_v22 = vadd.f32 %v5107_v48, %v6374_v15  ;;  %v3241_v26 = vadd.f32 %v3240_v60, %v3178_v35 }
 0x24a   : > { %3212 = vst [vmem:[%s5446_s7 + $0xf8] sm:$0xff] %v3180_v2  ;;  %v3281_v45 = vmul.f32 %v3180_v2, %v3180_v2 }
 0x24b   : > { %3211 = vst [vmem:[%s5446_s7 + $0xf0] sm:$0xff] %v3179_v22  ;;  %v3242_v63 = vadd.f32 %v3241_v26, %v3179_v22  ;;  %v3280_v7 = vmul.f32 %v3179_v22, %v3179_v22  ;;  %v3310_v39 = vadd.f32 %v3309_v62, %v3279_v13 }
 0x24d   : > { %v3243_v29 = vadd.f32 %v3242_v63, %v3180_v2  ;;  %v3311_v53 = vadd.f32 %v3310_v39, %v3280_v7 }
 0x24f   : > { %v3244_v27 = vrot.slane %v3243_v29, 4  ;;  %v3312_v19 = vadd.f32 %v3311_v53, %v3281_v45 }
 0x251   : > { %v3245_v54 = vadd.f32 %v3244_v27, %v3243_v29  ;;  %v3313_v42 = vrot.slane %v3312_v19, 4 }
 0x253   : > { %v3246_v25 = vrot.slane %v3245_v54, 2  ;;  %v3314_v17 = vadd.f32 %v3313_v42, %v3312_v19 }
 0x255   : > { %v3247_v50 = vadd.f32 %v3246_v25, %v3245_v54  ;;  %v3315_v12 = vrot.slane %v3314_v17, 2 }
 0x257   : > { %v3248_v16 = vrot.slane %v3247_v50, 1  ;;  %v3316_v15 = vadd.f32 %v3315_v12, %v3314_v17 }
 0x259   : > { %v3317_v6 = vrot.slane %v3316_v15, 1  ;;  %v3249_v20 = vadd.f32 %v3248_v16, %v3247_v50 }
 0x25b   : > { %v3318_v49 = vadd.f32 %v3317_v6, %v3316_v15 }
 0x25d   : > { %v3320_v23 = vsel %vm3319_vm0, %v3249_v20, %v3318_v49 }
 0x25e   : > { %3321 = vst [vmem:[%s5451_s10] sm:$0x3] %v3320_v23 }
 0x25f PF: > { %s17_s1 = sadd.s32 1, %s5380_s1   ;;  %s6563_s21 = smov %s5376_s0 }
 0x260   : > { %p14_p5 = scmp.ge.s32.totalorder %s17_s1, 4   ;;  %s6564_s0 = smov %s6566_s22 }
 0x262   :  { %16 = sbr.rel (!%p14_p5) target bundleno = 2 (0x2), region = 137 }
 0x269   :  { %3374 = vsyncmov [#allocation3] }
 0x26c   :  { %s3375_s7 = vpop.sfrf %3374 }
 0x26d   :  { %p3618_p6 = scmp.ne.s32.totalorder %s3375_s7, 0 }
 0x26f   :  { %3379 = shalt.err (%p3618_p6)  }

// kernel: conv_block_forward.4
= control target key start
LH: loop header
LB: loop body
LE: loop exit
PB: predicated region body
PF: predicated region fallthrough
CT: control target
= control target key end

     0   :  { %s6101_s21 = smov 0   ;;  %s6103_s22 = smov 0   ;;  %s7397_s0 = inlined_call_operand.vmem [shape: f32[1,128], index: 0, kind: input, shape index: {}]   ;;  %s7398_s1 = inlined_call_operand.vmem [shape: f32[1,128], index: 1, kind: input, shape index: {}]   ;;  %s7399_s2 = inlined_call_operand.vmem [shape: f32[9,128,128], index: 2, kind: input, shape index: {}]   ;;  %s7400_s3 = inlined_call_operand.vmem [shape: f32[1,128], index: 3, kind: input, shape index: {}]   ;;  %s7401_s4 = inlined_call_operand.vmem [shape: f32[2,18,18,128], index: 4, kind: input, shape index: {}]   ;;  %s7402_s5 = inlined_call_operand.vmem [shape: f32[2,16,16,128], index: 5, kind: output, shape index: {0}]   ;;  %s7403_s6 = inlined_call_operand.vmem [shape: f32[2,1,2,128], index: 6, kind: output, shape index: {1}]  }
   0x1   :  { %s6105_s23 = smov 0  }
   0x2 LB: > { %s29_s24 = sadd.s32 1, %s6059_s22  ;;  %p4101_p0 = scmp.ge.s32.totalorder %s6063_s23, 1  ;;  %s6063_s23 = sphi %s6105_s23, %s17_s23   ;;  %s6059_s22 = sphi %s6103_s22, %s7461_s22   ;;  %s6055_s21 = sphi %s6101_s21, %s7460_s21  }
   0x3   : > { %p31_p1 = scmp.ge.s32.totalorder %s29_s24, 2  ;;  %p197_p2 = scmp.lt.s32.totalorder %s6063_s23, 3 }
   0x5   : > { %s7463_s24 = smov (%p31_p1, %s29_s24), 0  ;;  %p198_p3 = pnand %p4101_p0, %p197_p2 }
   0x7   : > { %201 = sbr.rel (%p198_p3) target bundleno = 611 (0x263), region = 36 }
   0xe   : > { %p233_p4 = scmp.lt.s32.totalorder %s6055_s21, 1  ;;  %s252_s25 = smul.u32 432, %s6055_s21 }
  0x10   : > { %s7465_s21 = smov (!%p233_p4, %s6055_s21), 1  ;;  %s6122_s28 = scalar_lea.vmem %s7401_s4, %s252_s25 }
  0x11   : > { %s4289_s29 = sshll.u32 %s7465_s21, 8  ;;  %s4104_s30 = sshll.u32 %s7465_s21, 1  ;;  %v326_v0 = vld [vmem:[%s6122_s28] sm:$0xff]  ;;  %v328_v1 = vld [vmem:[%s6122_s28 + $0x8] sm:$0xff]  ;;  %v330_v2 = vld [vmem:[%s6122_s28 + $0x18] sm:$0xff] }
  0x12   : > { %s6130_s9 = scalar_lea.vmem %s7402_s5, %s4289_s29  ;;  %s6135_s12 = scalar_lea.vmem %s7403_s6, %s4104_s30  ;;  %327 = vst [vmem:[#allocation2] sm:$0xff] %v326_v0  ;;  %329 = vst [vmem:[#allocation2 + $0x8] sm:$0xff] %v328_v1  ;;  %v332_v3 = vld [vmem:[%s6122_s28 + $0x20] sm:$0xff]  ;;  %v334_v4 = vld [vmem:[%s6122_s28 + $0x30] sm:$0xff] }
  0x13   : > { %331 = vst [vmem:[#allocation2 + $0x18] sm:$0xff] %v330_v2  ;;  %v336_v5 = vld [vmem:[%s6122_s28 + $0x38] sm:$0xff]  ;;  %333 = vst [vmem:[#allocation2 + $0x20] sm:$0xff] %v332_v3  ;;  %v338_v6 = vld [vmem:[%s6122_s28 + $0x48] sm:$0xff] }
  0x14   : > { %335 = vst [vmem:[#allocation2 + $0x30] sm:$0xff] %v334_v4  ;;  %337 = vst [vmem:[#allocation2 + $0x38] sm:$0xff] %v336_v5  ;;  %v340_v7 = vld [vmem:[%s6122_s28 + $0x50] sm:$0xff]  ;;  %v342_v8 = vld [vmem:[%s6122_s28 + $0x60] sm:$0xff] }
  0x15   : > { %339 = vst [vmem:[#allocation2 + $0x48] sm:$0xff] %v338_v6  ;;  %341 = vst [vmem:[#allocation2 + $0x50] sm:$0xff] %v340_v7  ;;  %v344_v9 = vld [vmem:[%s6122_s28 + $0x68] sm:$0xff]  ;;  %v346_v10 = vld [vmem:[%s6122_s28 + $0x78] sm:$0xff] }
  0x16   : > { %343 = vst [vmem:[#allocation2 + $0x60] sm:$0xff] %v342_v8  ;;  %v348_v11 = vld [vmem:[%s6122_s28 + $0x80] sm:$0xff]  ;;  %345 = vst [vmem:[#allocation2 + $0x68] sm:$0xff] %v344_v9  ;;  %v350_v12 = vld [vmem:[%s6122_s28 + $0x90] sm:$0xff] }
  0x17   : > { %347 = vst [vmem:[#allocation2 + $0x78] sm:$0xff] %v346_v10  ;;  %349 = vst [vmem:[#allocation2 + $0x80] sm:$0xff] %v348_v11  ;;  %v352_v13 = vld [vmem:[%s6122_s28 + $0x98] sm:$0xff]  ;;  %v354_v14 = vld [vmem:[%s6122_s28 + $0xa8] sm:$0xff] }
  0x18   : > { %351 = vst [vmem:[#allocation2 + $0x90] sm:$0xff] %v350_v12  ;;  %353 = vst [vmem:[#allocation2 + $0x98] sm:$0xff] %v352_v13  ;;  %v356_v15 = vld [vmem:[%s6122_s28 + $0xb0] sm:$0xff]  ;;  %v358_v16 = vld [vmem:[%s6122_s28 + $0xc0] sm:$0xff] }
  0x19   : > { %355 = vst [vmem:[#allocation2 + $0xa8] sm:$0xff] %v354_v14  ;;  %v360_v17 = vld [vmem:[%s6122_s28 + $0xc8] sm:$0xff]  ;;  %357 = vst [vmem:[#allocation2 + $0xb0] sm:$0xff] %v356_v15  ;;  %v362_v18 = vld [vmem:[%s6122_s28 + $0xd8] sm:$0xff] }
  0x1a   : > { %359 = vst [vmem:[#allocation2 + $0xc0] sm:$0xff] %v358_v16  ;;  %361 = vst [vmem:[#allocation2 + $0xc8] sm:$0xff] %v360_v17  ;;  %v364_v19 = vld [vmem:[%s6122_s28 + $0xe0] sm:$0xff]  ;;  %v366_v20 = vld [vmem:[%s6122_s28 + $0xf0] sm:$0xff] }
  0x1b   : > { %363 = vst [vmem:[#allocation2 + $0xd8] sm:$0xff] %v362_v18  ;;  %365 = vst [vmem:[#allocation2 + $0xe0] sm:$0xff] %v364_v19  ;;  %v368_v21 = vld [vmem:[%s6122_s28 + $0xf8] sm:$0xff]  ;;  %v370_v22 = vld [vmem:[%s6122_s28 + $0x108] sm:$0xff] }
  0x1c   : > { %367 = vst [vmem:[#allocation2 + $0xf0] sm:$0xff] %v366_v20  ;;  %v372_v23 = vld [vmem:[%s6122_s28 + $0x110] sm:$0xff]  ;;  %369 = vst [vmem:[#allocation2 + $0xf8] sm:$0xff] %v368_v21  ;;  %v374_v24 = vld [vmem:[%s6122_s28 + $0x120] sm:$0xff] }
  0x1d   : > { %371 = vst [vmem:[#allocation2 + $0x108] sm:$0xff] %v370_v22  ;;  %373 = vst [vmem:[#allocation2 + $0x110] sm:$0xff] %v372_v23  ;;  %v376_v25 = vld [vmem:[%s6122_s28 + $0x128] sm:$0xff]  ;;  %v378_v26 = vld [vmem:[%s6122_s28 + $0x138] sm:$0xff] }
  0x1e   : > { %375 = vst [vmem:[#allocation2 + $0x120] sm:$0xff] %v374_v24  ;;  %377 = vst [vmem:[#allocation2 + $0x128] sm:$0xff] %v376_v25  ;;  %v380_v27 = vld [vmem:[%s6122_s28 + $0x140] sm:$0xff]  ;;  %v382_v28 = vld [vmem:[%s6122_s28 + $0x150] sm:$0xff] }
  0x1f   : > { %379 = vst [vmem:[#allocation2 + $0x138] sm:$0xff] %v378_v26  ;;  %v384_v29 = vld [vmem:[%s6122_s28 + $0x158] sm:$0xff]  ;;  %381 = vst [vmem:[#allocation2 + $0x140] sm:$0xff] %v380_v27  ;;  %v386_v30 = vld [vmem:[%s6122_s28 + $0x168] sm:$0xff] }
  0x20   : > { %383 = vst [vmem:[#allocation2 + $0x150] sm:$0xff] %v382_v28  ;;  %385 = vst [vmem:[#allocation2 + $0x158] sm:$0xff] %v384_v29  ;;  %v388_v31 = vld [vmem:[%s6122_s28 + $0x170] sm:$0xff]  ;;  %v390_v32 = vld [vmem:[%s6122_s28 + $0x180] sm:$0xff] }
  0x21   : > { %387 = vst [vmem:[#allocation2 + $0x168] sm:$0xff] %v386_v30  ;;  %389 = vst [vmem:[#allocation2 + $0x170] sm:$0xff] %v388_v31  ;;  %v392_v33 = vld [vmem:[%s6122_s28 + $0x188] sm:$0xff]  ;;  %v394_v34 = vld [vmem:[%s6122_s28 + $0x198] sm:$0xff] }
  0x22   : > { %391 = vst [vmem:[#allocation2 + $0x180] sm:$0xff] %v390_v32  ;;  %v396_v35 = vld [vmem:[%s6122_s28 + $0x1a0] sm:$0xff]  ;;  %393 = vst [vmem:[#allocation2 + $0x188] sm:$0xff] %v392_v33  ;;  %v4105_v36 = vld [vmem:[%s6122_s28 + $0x10] sm:$0x3] }
  0x23   : > { %395 = vst [vmem:[#allocation2 + $0x198] sm:$0xff] %v394_v34  ;;  %397 = vst [vmem:[#allocation2 + $0x1a0] sm:$0xff] %v396_v35  ;;  %v4106_v37 = vld [vmem:[%s6122_s28 + $0x28] sm:$0x3]  ;;  %v4107_v38 = vld [vmem:[%s6122_s28 + $0x40] sm:$0x3] }
  0x24   : > { %408 = vst [vmem:[#allocation2 + $0x10] sm:$0x3] %v4105_v36  ;;  %410 = vst [vmem:[#allocation2 + $0x28] sm:$0x3] %v4106_v37  ;;  %v4108_v39 = vld [vmem:[%s6122_s28 + $0x58] sm:$0x3] }
  0x25   : > { %412 = vst [vmem:[#allocation2 + $0x40] sm:$0x3] %v4107_v38  ;;  %v4109_v40 = vld [vmem:[%s6122_s28 + $0x70] sm:$0x3]  ;;  %v4110_v41 = vld [vmem:[%s6122_s28 + $0x88] sm:$0x3] }
  0x26   : > { %414 = vst [vmem:[#allocation2 + $0x58] sm:$0x3] %v4108_v39  ;;  %416 = vst [vmem:[#allocation2 + $0x70] sm:$0x3] %v4109_v40  ;;  %v4111_v42 = vld [vmem:[%s6122_s28 + $0xa0] sm:$0x3] }
  0x27   : > { %418 = vst [vmem:[#allocation2 + $0x88] sm:$0x3] %v4110_v41  ;;  %v4112_v43 = vld [vmem:[%s6122_s28 + $0xb8] sm:$0x3]  ;;  %v4113_v44 = vld [vmem:[%s6122_s28 + $0xd0] sm:$0x3] }
  0x28   : > { %420 = vst [vmem:[#allocation2 + $0xa0] sm:$0x3] %v4111_v42  ;;  %422 = vst [vmem:[#allocation2 + $0xb8] sm:$0x3] %v4112_v43  ;;  %v4114_v45 = vld [vmem:[%s6122_s28 + $0xe8] sm:$0x3] }
  0x29   : > { %424 = vst [vmem:[#allocation2 + $0xd0] sm:$0x3] %v4113_v44  ;;  %v4115_v46 = vld [vmem:[%s6122_s28 + $0x100] sm:$0x3]  ;;  %v4116_v47 = vld [vmem:[%s6122_s28 + $0x118] sm:$0x3] }
  0x2a   : > { %426 = vst [vmem:[#allocation2 + $0xe8] sm:$0x3] %v4114_v45  ;;  %428 = vst [vmem:[#allocation2 + $0x100] sm:$0x3] %v4115_v46  ;;  %v4117_v48 = vld [vmem:[%s6122_s28 + $0x130] sm:$0x3] }
  0x2b   : > { %430 = vst [vmem:[#allocation2 + $0x118] sm:$0x3] %v4116_v47  ;;  %v4118_v49 = vld [vmem:[%s6122_s28 + $0x148] sm:$0x3]  ;;  %v4119_v50 = vld [vmem:[%s6122_s28 + $0x160] sm:$0x3] }
  0x2c   : > { %432 = vst [vmem:[#allocation2 + $0x130] sm:$0x3] %v4117_v48  ;;  %434 = vst [vmem:[#allocation2 + $0x148] sm:$0x3] %v4118_v49  ;;  %v4120_v51 = vld [vmem:[%s6122_s28 + $0x178] sm:$0x3] }
  0x2d   : > { %436 = vst [vmem:[#allocation2 + $0x160] sm:$0x3] %v4119_v50  ;;  %v4121_v52 = vld [vmem:[%s6122_s28 + $0x190] sm:$0x3]  ;;  %v4122_v53 = vld [vmem:[%s6122_s28 + $0x1a8] sm:$0x3] }
  0x2e   : > { %438 = vst [vmem:[#allocation2 + $0x178] sm:$0x3] %v4120_v51  ;;  %440 = vst [vmem:[#allocation2 + $0x190] sm:$0x3] %v4121_v52 }
  0x2f   : > { %442 = vst [vmem:[#allocation2 + $0x1a8] sm:$0x3] %v4122_v53 }
  0x30   : > { %446 = vsyncadd [#allocation3], 5184 }
  0x31   : > { %6051 = dma.done.wait [#allocation3], 5184 }
  0x32   : > { %6052 = vsyncadd [#allocation3], 4294962112  ;;  %v699_v54 = vlaneseq  ;;  %v4157_v55 = vld [vmem:[%s7399_s2 + $0x80] sm:$0xff]  ;;  %v4158_v56 = vld [vmem:[%s7399_s2 + $0x88] sm:$0xff]  ;;  %v6065_v38 = vmov 0.0   ;;  %vm3955_vm2 = vcmask 1040384  }
  0x33   : > { %v4205_v57 = vld [vmem:[%s7399_s2 + $0x200] sm:$0xff]  ;;  %v5442_v58 = vpack.c.bf16 %v4158_v56, %v4157_v55  ;;  %v4206_v59 = vld [vmem:[%s7399_s2 + $0x208] sm:$0xff]  ;;  %v4159_v60 = vld [vmem:[%s7399_s2 + $0x90] sm:$0xff] }
  0x34   : > { %v4160_v61 = vld [vmem:[%s7399_s2 + $0x98] sm:$0xff]  ;;  %v6206_v62 = vpack.c.bf16 %v4206_v59, %v4205_v57  ;;  %v4207_v0 = vld [vmem:[%s7399_s2 + $0x210] sm:$0xff]  ;;  %v4161_v2 = vld [vmem:[%s7399_s2 + $0xa0] sm:$0xff]  ;;  %v700_v3 = vshrl.u32 %v699_v54, 7 }
  0x35   : > { %v5446_v63 = vpack.c.bf16 %v4160_v61, %v4159_v60  ;;  %v4208_v1 = vld [vmem:[%s7399_s2 + $0x218] sm:$0xff]  ;;  %5443 = vmatprep.subr.bf16.mxu1 %v5442_v58  ;;  %v4162_v5 = vld [vmem:[%s7399_s2 + $0xa8] sm:$0xff]  ;;  %v4209_v6 = vld [vmem:[%s7399_s2 + $0x220] sm:$0xff] }
  0x36   : > { %v6217_v4 = vpack.c.bf16 %v4208_v1, %v4207_v0  ;;  %v4210_v7 = vld [vmem:[%s7399_s2 + $0x228] sm:$0xff]  ;;  %5571 = vmatprep.subr.bf16.mxu0 %v6206_v62  ;;  %5445 = vmatpush3.bf16.msra.mxu1 %v5442_v58  ;;  %v4163_v8 = vld [vmem:[%s7399_s2 + $0xb0] sm:$0xff]  ;;  %v5450_v9 = vpack.c.bf16 %v4162_v5, %v4161_v2  ;;  %v4164_v10 = vld [vmem:[%s7399_s2 + $0xb8] sm:$0xff]  ;;  %v702_v17 = vadd.s32 16, %v700_v3  ;;  %vm757_vm0 = vcmp.ge.s32.totalorder %v700_v3, 1 }
  0x37   : > { %5573 = vmatpush3.bf16.msra.mxu0 %v6206_v62  ;;  %5447 = vmatprep.subr.bf16.mxu1 %v5446_v63  ;;  %v4211_v11 = vld [vmem:[%s7399_s2 + $0x230] sm:$0xff]  ;;  %v4212_v12 = vld [vmem:[%s7399_s2 + $0x238] sm:$0xff]  ;;  %v6243_v13 = vpack.c.bf16 %v4210_v7, %v4209_v6  ;;  %v4165_v14 = vld [vmem:[%s7399_s2 + $0xc0] sm:$0xff]  ;;  %v5454_v24 = vpack.c.bf16 %v4164_v10, %v4163_v8  ;;  %v6308_v39 = vsel %vm757_vm0, 1.0, %v6065_v38 }
  0x38   : > { %7429 = vst [vmem:[#allocation6_spill] sm:$0xff] %v6217_v4  ;;  %5575 = vmatprep.subr.bf16.mxu0 %v6217_v4  ;;  %v4166_v15 = vld [vmem:[%s7399_s2 + $0xc8] sm:$0xff]  ;;  %v4213_v16 = vld [vmem:[%s7399_s2 + $0x240] sm:$0xff]  ;;  %v4167_v19 = vld [vmem:[%s7399_s2 + $0xd0] sm:$0xff]  ;;  %v6283_v28 = vpack.c.bf16 %v4212_v12, %v4211_v11  ;;  %vm816_vm1 = vcmp.le.s32.totalorder %v702_v17, 16 }
  0x39   : > { %7430 = vst [vmem:[#allocation7_spill] sm:$0xff] %v6243_v13  ;;  %v4214_v18 = vld [vmem:[%s7399_s2 + $0x248] sm:$0xff]  ;;  %v4168_v20 = vld [vmem:[%s7399_s2 + $0xd8] sm:$0xff]  ;;  %v4215_v21 = vld [vmem:[%s7399_s2 + $0x250] sm:$0xff]  ;;  %v6291_v32 = vpack.c.bf16 %v4166_v15, %v4165_v14  ;;  %v6321_v51 = vsel %vm816_vm1, 1.0, %v6065_v38 }
  0x3a   : > { %5449 = vmatpush3.bf16.msra.mxu1 %v5446_v63  ;;  %v4216_v22 = vld [vmem:[%s7399_s2 + $0x258] sm:$0xff]  ;;  %v4169_v23 = vld [vmem:[%s7399_s2 + $0xe0] sm:$0xff]  ;;  %v4170_v25 = vld [vmem:[%s7399_s2 + $0xe8] sm:$0xff]  ;;  %7431 = vst [vmem:[#allocation8_spill] sm:$0xff] %v6283_v28  ;;  %v6293_v33 = vpack.c.bf16 %v4214_v18, %v4213_v16  ;;  %v6295_v34 = vpack.c.bf16 %v4168_v20, %v4167_v19 }
  0x3b   : > { %5577 = vmatpush3.bf16.msra.mxu0 %v6217_v4  ;;  %5451 = vmatprep.subr.bf16.mxu1 %v5450_v9  ;;  %v4217_v26 = vld [vmem:[%s7399_s2 + $0x260] sm:$0xff]  ;;  %v4218_v27 = vld [vmem:[%s7399_s2 + $0x268] sm:$0xff]  ;;  %v4171_v29 = vld [vmem:[%s7399_s2 + $0xf0] sm:$0xff]  ;;  %v6310_v40 = vpack.c.bf16 %v4216_v22, %v4215_v21  ;;  %v6312_v41 = vpack.c.bf16 %v4170_v25, %v4169_v23 }
  0x3c   : > { %5579 = vmatprep.subr.bf16.mxu0 %v6243_v13  ;;  %v4172_v30 = vld [vmem:[%s7399_s2 + $0xf8] sm:$0xff]  ;;  %v451_v31 = vld [vmem:[#allocation2] sm:$0xff]  ;;  %7432 = vst [vmem:[#allocation9_spill] sm:$0xff] %v6293_v33  ;;  %v452_v35 = vld [vmem:[#allocation2 + $0x8] sm:$0xff]  ;;  %v6324_v52 = vpack.c.bf16 %v4218_v27, %v4217_v26 }
  0x3d   : > { %v6300_v36 = vld [vmem:[%s7397_s0] ss:$0 sm:$0xff]  ;;  %7433 = vst [vmem:[#allocation10_spill] sm:$0xff] %v6310_v40  ;;  %v454_v44 = vld [vmem:[#allocation2 + $0x18] sm:$0xff]  ;;  %v453_v46 = vld [vmem:[#allocation2 + $0x10] sm:$0x3]  ;;  %v6329_v57 = vpack.c.bf16 %v4172_v30, %v4171_v29 }
  0x3e   : > { %v6305_v37 = vld [vmem:[%s7398_s1] ss:$0 sm:$0xff]  ;;  %5453 = vmatpush3.bf16.msra.mxu1 %v5450_v9  ;;  %v512_v42 = vmul.f32 %v6300_v36, %v451_v31  ;;  %v513_v43 = vmul.f32 %v6300_v36, %v452_v35  ;;  %v515_v47 = vmul.f32 %v6300_v36, %v454_v44  ;;  %v514_v49 = vmul.f32 %v6300_v36, %v453_v46  ;;  %v456_v50 = vld [vmem:[#allocation2 + $0x28] sm:$0x3]  ;;  %v457_v56 = vld [vmem:[#allocation2 + $0x30] sm:$0xff] }
  0x3f   : > { %v455_v45 = vld [vmem:[#allocation2 + $0x20] sm:$0xff]  ;;  %5581 = vmatpush3.bf16.msra.mxu0 %v6243_v13  ;;  %5455 = vmatprep.subr.bf16.mxu1 %v5454_v24  ;;  %7434 = vst [vmem:[#allocation11_spill] sm:$0xff] %v6324_v52  ;;  %v517_v55 = vmul.f32 %v6300_v36, %v456_v50  ;;  %v458_v61 = vld [vmem:[#allocation2 + $0x38] sm:$0xff]  ;;  %v518_v2 = vmul.f32 %v6300_v36, %v457_v56  ;;  %v4219_v5 = vld [vmem:[%s7399_s2 + $0x270] sm:$0xff] }
  0x40   : > { %v516_v48 = vmul.f32 %v6300_v36, %v455_v45  ;;  %5583 = vmatprep.subr.bf16.mxu0 %v6283_v28  ;;  %v573_v53 = vadd.f32 %v6305_v37, %v512_v42  ;;  %v574_v54 = vadd.f32 %v6305_v37, %v513_v43  ;;  %v576_v58 = vadd.f32 %v6305_v37, %v515_v47  ;;  %v459_v3 = vld [vmem:[#allocation2 + $0x40] sm:$0x3]  ;;  %v4220_v6 = vld [vmem:[%s7399_s2 + $0x278] sm:$0xff]  ;;  %v460_v11 = vld [vmem:[#allocation2 + $0x48] sm:$0xff] }
  0x41   : > { %v575_v60 = vadd.f32 %v6305_v37, %v514_v49  ;;  %v578_v1 = vadd.f32 %v6305_v37, %v517_v55  ;;  %v519_v10 = vmul.f32 %v6300_v36, %v458_v61  ;;  %v1119_v15 = vld [vmem:[%s7399_s2] sm:$0xff]  ;;  %v1120_v16 = vld [vmem:[%s7399_s2 + $0x8] sm:$0xff]  ;;  %v579_v18 = vadd.f32 %v6305_v37, %v518_v2  ;;  %v461_v19 = vld [vmem:[#allocation2 + $0x50] sm:$0xff] }
  0x42   : > { %v577_v59 = vadd.f32 %v6305_v37, %v516_v48  ;;  %5457 = vmatpush3.bf16.msra.mxu1 %v5454_v24  ;;  %v627_v63 = vmax.f32 %v573_v53, 0.0  ;;  %v628_v0 = vmax.f32 %v574_v54, 0.0  ;;  %v630_v7 = vmax.f32 %v576_v58, 0.0  ;;  %v4221_v22 = vld [vmem:[%s7399_s2 + $0x280] sm:$0xff]  ;;  %v4222_v23 = vld [vmem:[%s7399_s2 + $0x288] sm:$0xff]  ;;  %v4223_v44 = vld [vmem:[%s7399_s2 + $0x290] sm:$0xff] }
  0x43   : > { %5585 = vmatpush3.bf16.msra.mxu0 %v6283_v28  ;;  %5459 = vmatprep.subr.bf16.mxu1 %v6291_v32  ;;  %v629_v9 = vmax.f32 %v575_v60, 0.0  ;;  %v632_v17 = vmax.f32 %v578_v1, 0.0  ;;  %v580_v24 = vadd.f32 %v6305_v37, %v519_v10  ;;  %v520_v25 = vmul.f32 %v6300_v36, %v459_v3  ;;  %v462_v26 = vld [vmem:[#allocation2 + $0x58] sm:$0x3]  ;;  %v463_v35 = vld [vmem:[#allocation2 + $0x60] sm:$0xff]  ;;  %v464_v38 = vld [vmem:[#allocation2 + $0x68] sm:$0xff] }
  0x44   : > { %v631_v8 = vmax.f32 %v577_v59, 0.0  ;;  %5587 = vmatprep.subr.bf16.mxu0 %v6293_v33  ;;  %v979_v12 = vmul.f32 0.0, %v627_v63  ;;  %v980_v14 = vmul.f32 0.0, %v628_v0  ;;  %v982_v20 = vmul.f32 %v6308_v39, %v630_v7  ;;  %v4224_v45 = vld [vmem:[%s7399_s2 + $0x298] sm:$0xff]  ;;  %v465_v47 = vld [vmem:[#allocation2 + $0x70] sm:$0x3] }
  0x45   : > { %v981_v21 = vmul.f32 0.0, %v629_v9  ;;  %v6363_v27 = vpack.c.bf16 %v4220_v6, %v4219_v5  ;;  %v984_v29 = vmul.f32 %v6321_v51, %v632_v17  ;;  %v633_v30 = vmax.f32 %v579_v18, 0.0  ;;  %v466_v59 = vld [vmem:[#allocation2 + $0x78] sm:$0xff]  ;;  %v1121_v63 = vld [vmem:[%s7399_s2 + $0x10] sm:$0xff]  ;;  %v467_v3 = vld [vmem:[#allocation2 + $0x80] sm:$0xff] }
  0x46   : > { %1037 = vst [vmem:[#allocation2 + $0x20] sm:$0xff] %v631_v8  ;;  %5461 = vmatpush3.bf16.msra.mxu1 %v6291_v32  ;;  %1033 = vst [vmem:[#allocation2] sm:$0xff] %v979_v12  ;;  %v521_v31 = vmul.f32 %v6300_v36, %v460_v11  ;;  %v6369_v42 = vpack.c.bf16 %v1120_v16, %v1119_v15  ;;  %v634_v32 = vmax.f32 %v580_v24, 0.0  ;;  %v1122_v0 = vld [vmem:[%s7399_s2 + $0x18] sm:$0xff]  ;;  %v468_v8 = vld [vmem:[#allocation2 + $0x88] sm:$0x3] }
  0x47   : > { %7435 = vst [vmem:[#allocation12_spill] sm:$0xff] %v6363_v27  ;;  %1034 = vst [vmem:[#allocation2 + $0x8] sm:$0xff] %v980_v14  ;;  %5589 = vmatpush3.bf16.msra.mxu0 %v6293_v33  ;;  %5463 = vmatprep.subr.bf16.mxu1 %v6295_v34  ;;  %v581_v43 = vadd.f32 %v6305_v37, %v520_v25  ;;  %v522_v46 = vmul.f32 %v6300_v36, %v461_v19  ;;  %v4225_v11 = vld [vmem:[%s7399_s2 + $0x2a0] sm:$0xff]  ;;  %v4226_v12 = vld [vmem:[%s7399_s2 + $0x2a8] sm:$0xff] }
  0x48   : > { %1036 = vst [vmem:[#allocation2 + $0x18] sm:$0xff] %v982_v20  ;;  %1035 = vst [vmem:[#allocation2 + $0x10] sm:$0x3] %v981_v21  ;;  %5591 = vmatprep.subr.bf16.mxu0 %v6310_v40  ;;  %v6380_v48 = vpack.c.bf16 %v4222_v23, %v4221_v22  ;;  %v6383_v49 = vmul.f32 %v6308_v39, %v633_v30  ;;  %v582_v50 = vadd.f32 %v6305_v37, %v521_v31  ;;  %v4227_v15 = vld [vmem:[%s7399_s2 + $0x2b0] sm:$0xff]  ;;  %v4228_v21 = vld [vmem:[%s7399_s2 + $0x2b8] sm:$0xff] }
  0x49   : > { %1038 = vst [vmem:[#allocation2 + $0x28] sm:$0x3] %v984_v29  ;;  %v523_v53 = vmul.f32 %v6300_v36, %v462_v26  ;;  %1040 = vst [vmem:[#allocation2 + $0x38] sm:$0xff] %v634_v32  ;;  %v635_v54 = vmax.f32 %v581_v43, 0.0  ;;  %v6388_v55 = vadd.f32 %v6305_v37, %v522_v46  ;;  %v524_v56 = vmul.f32 %v6300_v36, %v463_v35  ;;  %v469_v23 = vld [vmem:[#allocation2 + $0x90] sm:$0xff]  ;;  %v470_v31 = vld [vmem:[#allocation2 + $0x98] sm:$0xff] }
  0x4a   : > { %v525_v58 = vmul.f32 %v6300_v36, %v464_v38  ;;  %5465 = vmatpush3.bf16.msra.mxu1 %v6295_v34  ;;  %1039 = vst [vmem:[#allocation2 + $0x30] sm:$0xff] %v6383_v49  ;;  %v6394_v60 = vpack.c.bf16 %v4224_v45, %v4223_v44  ;;  %v636_v61 = vmax.f32 %v582_v50, 0.0  ;;  %v526_v2 = vmul.f32 %v6300_v36, %v465_v47  ;;  %v471_v35 = vld [vmem:[#allocation2 + $0xa0] sm:$0x3]  ;;  %v472_v43 = vld [vmem:[#allocation2 + $0xa8] sm:$0xff]  ;;  %v473_v50 = vld [vmem:[#allocation2 + $0xb0] sm:$0xff] }
  0x4b   : > { %v584_v1 = vadd.f32 %v6305_v37, %v523_v53  ;;  %5593 = vmatpush3.bf16.msra.mxu0 %v6310_v40  ;;  %5467 = vmatprep.subr.bf16.mxu1 %v6312_v41  ;;  %v987_v34 = vmul.f32 %v6321_v51, %v635_v54  ;;  %v7408_v5 = vmax.f32 %v6388_v55, 0.0  ;;  %v585_v6 = vadd.f32 %v6305_v37, %v524_v56  ;;  %v1123_v56 = vld [vmem:[%s7399_s2 + $0x20] sm:$0xff]  ;;  %v4179_v4 = vld [vmem:[%s7399_s2 + $0x130] sm:$0xff] }
  0x4c   : > { %v6410_v7 = vadd.f32 %v6305_v37, %v525_v58  ;;  %5595 = vmatprep.subr.bf16.mxu0 %v6324_v52  ;;  %v6414_v9 = vmul.f32 %v6308_v39, %v636_v61  ;;  %v587_v14 = vadd.f32 %v6305_v37, %v526_v2  ;;  %v527_v16 = vmul.f32 %v6300_v36, %v466_v59  ;;  %v1124_v58 = vld [vmem:[%s7399_s2 + $0x28] sm:$0xff]  ;;  %v4229_v2 = vld [vmem:[%s7399_s2 + $0x2c0] sm:$0xff] }
  0x4d   : > { %v638_v10 = vmax.f32 %v584_v1, 0.0  ;;  %1041 = vst [vmem:[#allocation2 + $0x40] sm:$0x3] %v987_v34  ;;  %1043 = vst [vmem:[#allocation2 + $0x50] sm:$0xff] %v7408_v5  ;;  %v6429_v18 = vpack.c.bf16 %v1122_v0, %v1121_v63  ;;  %v639_v19 = vmax.f32 %v585_v6, 0.0  ;;  %v528_v22 = vmul.f32 %v6300_v36, %v467_v3  ;;  %v4177_v28 = vld [vmem:[%s7399_s2 + $0x120] sm:$0xff] }
  0x4e   : > { %v1135_v17 = vld [vmem:[#allocation2 + $0x1] sm:$0xff]  ;;  %v7407_v20 = vmax.f32 %v6410_v7, 0.0  ;;  %5469 = vmatpush3.bf16.msra.mxu1 %v6312_v41  ;;  %1042 = vst [vmem:[#allocation2 + $0x48] sm:$0xff] %v6414_v9  ;;  %v641_v26 = vmax.f32 %v587_v14, 0.0  ;;  %v588_v29 = vadd.f32 %v6305_v37, %v527_v16  ;;  %v529_v30 = vmul.f32 %v6300_v36, %v468_v8  ;;  %v474_v6 = vld [vmem:[#allocation2 + $0xb8] sm:$0x3] }
  0x4f   : > { %4754 = vmatprep.mubr.f32.mxu1 %v1135_v17  ;;  %v6437_v24 = vld [vmem:[#allocation2 + $0x19] sm:$0xff]  ;;  %v990_v25 = vmul.f32 %v6321_v51, %v638_v10  ;;  %5597 = vmatpush3.bf16.msra.mxu0 %v6324_v52  ;;  %v6445_v38 = vpack.c.bf16 %v4226_v12, %v4225_v11  ;;  %v6448_v41 = vmul.f32 %v6308_v39, %v639_v19  ;;  %v1136_v63 = vld [vmem:[#allocation2 + $0x9] sm:$0xff] }
  0x50   : > { %5471 = vmatprep.subr.bf16.mxu1 %v6329_v57  ;;  %1046 = vst [vmem:[#allocation2 + $0x68] sm:$0xff] %v7407_v20  ;;  %v6453_v32 = vadd.f32 %v6305_v37, %v528_v22  ;;  %5599 = vmatprep.subr.bf16.mxu0 %v6363_v27  ;;  %v993_v44 = vmul.f32 %v6321_v51, %v641_v26  ;;  %v642_v45 = vmax.f32 %v588_v29, 0.0  ;;  %v4230_v8 = vld [vmem:[%s7399_s2 + $0x2c8] sm:$0xff]  ;;  %v475_v14 = vld [vmem:[#allocation2 + $0xc0] sm:$0xff]  ;;  %v4231_v19 = vld [vmem:[%s7399_s2 + $0x2d0] sm:$0xff] }
  0x51   : > { %5074 = vmatprep.mubr.f32.mxu0 %v6437_v24  ;;  %1044 = vst [vmem:[#allocation2 + $0x58] sm:$0x3] %v990_v25  ;;  %v590_v46 = vadd.f32 %v6305_v37, %v529_v30  ;;  %v530_v47 = vmul.f32 %v6300_v36, %v469_v23  ;;  %1045 = vst [vmem:[#allocation2 + $0x60] sm:$0xff] %v6448_v41  ;;  %v6461_v53 = vpack.c.bf16 %v4228_v21, %v4227_v15  ;;  %v476_v22 = vld [vmem:[#allocation2 + $0xc8] sm:$0xff]  ;;  %v2249_v23 = vld [vmem:[#allocation2 + $0x31] sm:$0xff] }
  0x52   : > { %v7405_v54 = vmax.f32 %v6453_v32, 0.0  ;;  %v531_v59 = vmul.f32 %v6300_v36, %v470_v31  ;;  %v532_v61 = vmul.f32 %v6300_v36, %v471_v35  ;;  %5473 = vmatpush3.bf16.msra.mxu1 %v6329_v57  ;;  %1047 = vst [vmem:[#allocation2 + $0x70] sm:$0x3] %v993_v44  ;;  %v6474_v0 = vmul.f32 %v6308_v39, %v642_v45  ;;  %v2248_v57 = vld [vmem:[#allocation2 + $0x21] sm:$0xff]  ;;  %v4232_v29 = vld [vmem:[%s7399_s2 + $0x2d8] sm:$0xff]  ;;  %v4251_v52 = vld [vmem:[%s7399_s2 + $0x370] sm:$0xff] }
  0x53   : > { %v644_v1 = vmax.f32 %v590_v46, 0.0  ;;  %v591_v3 = vadd.f32 %v6305_v37, %v530_v47  ;;  %v533_v34 = vmul.f32 %v6300_v36, %v472_v43  ;;  %5601 = vmatpush3.bf16.msra.mxu0 %v6363_v27  ;;  %5475 = vmatprep.subr.bf16.mxu1 %v6369_v42  ;;  %v534_v12 = vmul.f32 %v6300_v36, %v473_v50  ;;  %v477_v35 = vld [vmem:[#allocation2 + $0xd0] sm:$0x3]  ;;  %v1126_v47 = vld [vmem:[%s7399_s2 + $0x38] sm:$0xff]  ;;  %v4233_v50 = vld [vmem:[%s7399_s2 + $0x2e0] sm:$0xff] }
  0x54   : > { %1049 = vst [vmem:[#allocation2 + $0x80] sm:$0xff] %v7405_v54  ;;  %v6489_v10 = vadd.f32 %v6305_v37, %v531_v59  ;;  %v593_v11 = vadd.f32 %v6305_v37, %v532_v61  ;;  %5603 = vmatprep.subr.bf16.mxu0 %v6380_v48  ;;  %1048 = vst [vmem:[#allocation2 + $0x78] sm:$0xff] %v6474_v0  ;;  %v6495_v15 = vpack.c.bf16 %v1124_v58, %v1123_v56  ;;  %v1125_v46 = vld [vmem:[%s7399_s2 + $0x30] sm:$0xff]  ;;  %v2250_v56 = vld [vmem:[#allocation2 + $0x39] sm:$0xff] }
  0x55   : > { %v996_v16 = vmul.f32 %v6321_v51, %v644_v1  ;;  %v645_v17 = vmax.f32 %v591_v3, 0.0  ;;  %v594_v21 = vadd.f32 %v6305_v37, %v533_v34  ;;  %4755 = vmatmul.mubr.f32.vlgmr.msra.gmra.mrb[0].mxu1 %v1136_v63  ;;  %v595_v30 = vadd.f32 %v6305_v37, %v534_v12  ;;  %v4234_v63 = vld [vmem:[%s7399_s2 + $0x2e8] sm:$0xff]  ;;  %v6032_v13 = vld [vmem:[#allocation2 + $0x20] sm:$0xff] }
  0x56   : > { %v7404_v25 = vmax.f32 %v6489_v10, 0.0  ;;  %v647_v26 = vmax.f32 %v593_v11, 0.0  ;;  %v535_v31 = vmul.f32 %v6300_v36, %v474_v6  ;;  %5075 = vmatmul.mubr.f32.vlgmr.msra.gmra.mrb[0].mxu0 %v2248_v57  ;;  %5477 = vmatpush3.bf16.msra.mxu1 %v6369_v42  ;;  %v6509_v43 = vpack.c.bf16 %v4230_v8, %v4229_v2  ;;  %v478_v2 = vld [vmem:[#allocation2 + $0xd8] sm:$0xff]  ;;  %v479_v6 = vld [vmem:[#allocation2 + $0xe0] sm:$0xff]  ;;  %v480_v8 = vld [vmem:[#allocation2 + $0xe8] sm:$0x3] }
  0x57   : > { %1050 = vst [vmem:[#allocation2 + $0x88] sm:$0x3] %v996_v16  ;;  %v6512_v44 = vmul.f32 %v6308_v39, %v645_v17  ;;  %v648_v45 = vmax.f32 %v594_v21, 0.0  ;;  %v536_v42 = vmul.f32 %v6300_v36, %v475_v14  ;;  %5605 = vmatpush3.bf16.msra.mxu0 %v6380_v48  ;;  %4757 = vmatprep.mubr.f32.mxu1 %v6437_v24  ;;  %v6529_v59 = vmax.f32 %v595_v30, 0.0  ;;  %v2251_v48 = vld [vmem:[#allocation2 + $0x49] sm:$0xff] }
  0x58   : > { %1052 = vst [vmem:[#allocation2 + $0x98] sm:$0xff] %v7404_v25  ;;  %v999_v58 = vmul.f32 %v6321_v51, %v647_v26  ;;  %v596_v61 = vadd.f32 %v6305_v37, %v535_v31  ;;  %v537_v1 = vmul.f32 %v6300_v36, %v476_v22  ;;  %5077 = vmatprep.mubr.f32.mxu0 %v2249_v23  ;;  %v481_v17 = vld [vmem:[#allocation2 + $0xf0] sm:$0xff]  ;;  %v482_v26 = vld [vmem:[#allocation2 + $0xf8] sm:$0xff] }
  0x59   : > { %5607 = vmatprep.subr.bf16.mxu0 %v6394_v60  ;;  %1051 = vst [vmem:[#allocation2 + $0x90] sm:$0xff] %v6512_v44  ;;  %v6539_v24 = vmul.f32 %v6308_v39, %v648_v45  ;;  %v597_v3 = vadd.f32 %v6305_v37, %v536_v42  ;;  %v538_v34 = vmul.f32 %v6300_v36, %v477_v35  ;;  %1055 = vst [vmem:[#allocation2 + $0xb0] sm:$0xff] %v6529_v59  ;;  %v483_v45 = vld [vmem:[#allocation2 + $0x100] sm:$0x3]  ;;  %v1128_v42 = vld [vmem:[%s7399_s2 + $0x48] sm:$0xff] }
  0x5a   : > { %4758 = vmatmul.mubr.f32.gmra.mrb[2].mxu1 %v2248_v57  ;;  %5479 = vmatprep.subr.bf16.mxu1 %v6429_v18  ;;  %1053 = vst [vmem:[#allocation2 + $0xa0] sm:$0x3] %v999_v58  ;;  %v6544_v11 = vpack.c.bf16 %v4232_v29, %v4231_v19  ;;  %v6547_v12 = vpack.c.bf16 %v1126_v47, %v1125_v46  ;;  %v650_v14 = vmax.f32 %v596_v61, 0.0  ;;  %v2252_v29 = vld [vmem:[#allocation2 + $0x51] sm:$0xff]  ;;  %v2253_v46 = vld [vmem:[#allocation2 + $0x61] sm:$0xff] }
  0x5b   : > { %v598_v16 = vadd.f32 %v6305_v37, %v537_v1  ;;  %5078 = vmatmul.mubr.f32.gmra.mrb[2].mxu0 %v2250_v56  ;;  %4760 = vmatprep.mubr.f32.mxu1 %v2249_v23  ;;  %1054 = vst [vmem:[#allocation2 + $0xa8] sm:$0xff] %v6539_v24  ;;  %v6551_v21 = vpack.c.bf16 %v4234_v63, %v4233_v50  ;;  %v651_v57 = vmax.f32 %v597_v3, 0.0  ;;  %v1127_v50 = vld [vmem:[%s7399_s2 + $0x40] sm:$0xff]  ;;  %v1130_v3 = vld [vmem:[%s7399_s2 + $0x58] sm:$0xff] }
  0x5c   : > { %v599_v22 = vadd.f32 %v6305_v37, %v538_v34  ;;  %v539_v19 = vmul.f32 %v6300_v36, %v478_v2  ;;  %5609 = vmatpush3.bf16.msra.mxu0 %v6394_v60  ;;  %5080 = vmatprep.mubr.f32.mxu0 %v2251_v48  ;;  %v1002_v30 = vmul.f32 %v6321_v51, %v650_v14  ;;  %v1129_v2 = vld [vmem:[%s7399_s2 + $0x50] sm:$0xff]  ;;  %v484_v14 = vld [vmem:[#allocation2 + $0x108] sm:$0xff] }
  0x5d   : > { %v6557_v31 = vmax.f32 %v598_v16, 0.0  ;;  %v540_v23 = vmul.f32 %v6300_v36, %v479_v6  ;;  %v541_v35 = vmul.f32 %v6300_v36, %v480_v8  ;;  %5611 = vmatprep.subr.bf16.mxu0 %v6445_v38  ;;  %5481 = vmatpush3.bf16.msra.mxu1 %v6429_v18  ;;  %v6564_v47 = vmul.f32 %v6308_v39, %v651_v57  ;;  %v485_v16 = vld [vmem:[#allocation2 + $0x110] sm:$0xff] }
  0x5e   : > { %v653_v60 = vmax.f32 %v599_v22, 0.0  ;;  %v600_v58 = vadd.f32 %v6305_v37, %v539_v19  ;;  %v542_v61 = vmul.f32 %v6300_v36, %v481_v17  ;;  %4761 = vmatmul.mubr.f32.gmra.mrb[4].mxu1 %v2250_v56  ;;  %5483 = vmatprep.subr.bf16.mxu1 %v6495_v15  ;;  %1056 = vst [vmem:[#allocation2 + $0xb8] sm:$0x3] %v1002_v30  ;;  %v2254_v17 = vld [vmem:[#allocation2 + $0x69] sm:$0xff]  ;;  %v487_v30 = vld [vmem:[#allocation2 + $0x120] sm:$0xff] }
  0x5f   : > { %1058 = vst [vmem:[#allocation2 + $0xc8] sm:$0xff] %v6557_v31  ;;  %v601_v18 = vadd.f32 %v6305_v37, %v540_v23  ;;  %v602_v63 = vadd.f32 %v6305_v37, %v541_v35  ;;  %v543_v1 = vmul.f32 %v6300_v36, %v482_v26  ;;  %5081 = vmatmul.mubr.f32.gmra.mrb[4].mxu0 %v2252_v29  ;;  %1057 = vst [vmem:[#allocation2 + $0xc0] sm:$0xff] %v6564_v47  ;;  %v486_v26 = vld [vmem:[#allocation2 + $0x118] sm:$0x3] }
  0x60   : > { %4763 = vmatprep.mubr.f32.mxu1 %v2251_v48  ;;  %v1005_v56 = vmul.f32 %v6321_v51, %v653_v60  ;;  %v654_v34 = vmax.f32 %v600_v58, 0.0  ;;  %v603_v6 = vadd.f32 %v6305_v37, %v542_v61  ;;  %v544_v8 = vmul.f32 %v6300_v36, %v483_v45  ;;  %5613 = vmatpush3.bf16.msra.mxu0 %v6445_v38  ;;  %v2255_v23 = vld [vmem:[#allocation2 + $0x79] sm:$0xff] }
  0x61   : > { %5083 = vmatprep.mubr.f32.mxu0 %v2253_v46  ;;  %v6590_v57 = vpack.c.bf16 %v1128_v42, %v1127_v50  ;;  %v6592_v22 = vmax.f32 %v601_v18, 0.0  ;;  %v656_v48 = vmax.f32 %v602_v63, 0.0  ;;  %v604_v19 = vadd.f32 %v6305_v37, %v543_v1  ;;  %5615 = vmatprep.subr.bf16.mxu0 %v6461_v53  ;;  %v488_v50 = vld [vmem:[#allocation2 + $0x128] sm:$0xff]  ;;  %v4235_v18 = vld [vmem:[%s7399_s2 + $0x2f0] sm:$0xff] }
  0x62   : > { %5485 = vmatpush3.bf16.msra.mxu1 %v6495_v15  ;;  %1059 = vst [vmem:[#allocation2 + $0xd0] sm:$0x3] %v1005_v56  ;;  %v6598_v35 = vmul.f32 %v6308_v39, %v654_v34  ;;  %v657_v38 = vmax.f32 %v603_v6, 0.0  ;;  %v605_v45 = vadd.f32 %v6305_v37, %v544_v8  ;;  %v6601_v60 = vpack.c.bf16 %v1130_v3, %v1129_v2  ;;  %v489_v56 = vld [vmem:[#allocation2 + $0x130] sm:$0x3] }
  0x63   : > { %4764 = vmatmul.mubr.f32.gmra.mrb[6].mxu1 %v2252_v29  ;;  %5487 = vmatprep.subr.bf16.mxu1 %v6547_v12  ;;  %1061 = vst [vmem:[#allocation2 + $0xe0] sm:$0xff] %v6592_v22  ;;  %v1008_v42 = vmul.f32 %v6321_v51, %v656_v48  ;;  %v6606_v58 = vmax.f32 %v604_v19, 0.0  ;;  %v545_v15 = vmul.f32 %v6300_v36, %v484_v14  ;;  %v4236_v29 = vld [vmem:[%s7399_s2 + $0x2f8] sm:$0xff]  ;;  %v1131_v14 = vld [vmem:[%s7399_s2 + $0x60] sm:$0xff] }
  0x64   : > { %v546_v61 = vmul.f32 %v6300_v36, %v485_v16  ;;  %5084 = vmatmul.mubr.f32.gmra.mrb[6].mxu0 %v2254_v17  ;;  %4766 = vmatprep.mubr.f32.mxu1 %v2253_v46  ;;  %1060 = vst [vmem:[#allocation2 + $0xd8] sm:$0xff] %v6598_v35  ;;  %v6618_v63 = vmul.f32 %v6308_v39, %v657_v38  ;;  %v659_v1 = vmax.f32 %v605_v45, 0.0  ;;  %v2256_v46 = vld [vmem:[#allocation2 + $0x81] sm:$0xff] }
  0x65   : > { %v547_v2 = vmul.f32 %v6300_v36, %v486_v26  ;;  %v548_v3 = vmul.f32 %v6300_v36, %v487_v30  ;;  %5617 = vmatpush3.bf16.msra.mxu0 %v6461_v53  ;;  %5086 = vmatprep.mubr.f32.mxu0 %v2255_v23  ;;  %1062 = vst [vmem:[#allocation2 + $0xe8] sm:$0x3] %v1008_v42  ;;  %1064 = vst [vmem:[#allocation2 + $0xf8] sm:$0xff] %v6606_v58  ;;  %v1132_v16 = vld [vmem:[%s7399_s2 + $0x68] sm:$0xff]  ;;  %v2257_v53 = vld [vmem:[#allocation2 + $0x91] sm:$0xff] }
  0x66   : > { %v606_v34 = vadd.f32 %v6305_v37, %v545_v15  ;;  %v607_v6 = vadd.f32 %v6305_v37, %v546_v61  ;;  %v549_v8 = vmul.f32 %v6300_v36, %v488_v50  ;;  %5619 = vmatprep.subr.bf16.mxu0 %v6509_v43  ;;  %5489 = vmatpush3.bf16.msra.mxu1 %v6547_v12  ;;  %v490_v30 = vld [vmem:[#allocation2 + $0x138] sm:$0xff]  ;;  %v491_v12 = vld [vmem:[#allocation2 + $0x140] sm:$0xff] }
  0x67   : > { %1063 = vst [vmem:[#allocation2 + $0xf0] sm:$0xff] %v6618_v63  ;;  %v1011_v48 = vmul.f32 %v6321_v51, %v659_v1  ;;  %v608_v19 = vadd.f32 %v6305_v37, %v547_v2  ;;  %v609_v26 = vadd.f32 %v6305_v37, %v548_v3  ;;  %4767 = vmatmul.mubr.f32.gmra.mrb[8].mxu1 %v2254_v17  ;;  %v492_v17 = vld [vmem:[#allocation2 + $0x148] sm:$0x3]  ;;  %v493_v3 = vld [vmem:[#allocation2 + $0x150] sm:$0xff] }
  0x68   : > { %5491 = vmatprep.subr.bf16.mxu1 %v6590_v57  ;;  %v660_v38 = vmax.f32 %v606_v34, 0.0  ;;  %v6640_v45 = vmax.f32 %v607_v6, 0.0  ;;  %v610_v50 = vadd.f32 %v6305_v37, %v549_v8  ;;  %v550_v42 = vmul.f32 %v6300_v36, %v489_v56  ;;  %5087 = vmatmul.mubr.f32.gmra.mrb[8].mxu0 %v2256_v46  ;;  %v2258_v34 = vld [vmem:[#allocation2 + $0x99] sm:$0xff] }
  0x69   : > { %4769 = vmatprep.mubr.f32.mxu1 %v2255_v23  ;;  %v6644_v15 = vpack.c.bf16 %v4236_v29, %v4235_v18  ;;  %1065 = vst [vmem:[#allocation2 + $0x100] sm:$0x3] %v1011_v48  ;;  %v662_v61 = vmax.f32 %v608_v19, 0.0  ;;  %v663_v1 = vmax.f32 %v609_v26, 0.0  ;;  %v6646_v2 = vpack.c.bf16 %v1132_v16, %v1131_v14  ;;  %5621 = vmatpush3.bf16.msra.mxu0 %v6509_v43  ;;  %v494_v29 = vld [vmem:[#allocation2 + $0x158] sm:$0xff]  ;;  %v2259_v14 = vld [vmem:[#allocation2 + $0xa9] sm:$0xff] }
  0x6a   : > { %5089 = vmatprep.mubr.f32.mxu0 %v2257_v53  ;;  %v6650_v6 = vmul.f32 %v6308_v39, %v660_v38  ;;  %1067 = vst [vmem:[#allocation2 + $0x110] sm:$0xff] %v6640_v45  ;;  %v6653_v56 = vmax.f32 %v610_v50, 0.0  ;;  %v611_v23 = vadd.f32 %v6305_v37, %v550_v42  ;;  %v551_v18 = vmul.f32 %v6300_v36, %v490_v30  ;;  %v495_v8 = vld [vmem:[#allocation2 + $0x160] sm:$0x3]  ;;  %v4238_v26 = vld [vmem:[%s7399_s2 + $0x308] sm:$0xff] }
  0x6b   : > { %5623 = vmatprep.subr.bf16.mxu0 %v6544_v11  ;;  %5493 = vmatpush3.bf16.msra.mxu1 %v6590_v57  ;;  %v1014_v43 = vmul.f32 %v6321_v51, %v662_v61  ;;  %v6661_v16 = vmul.f32 %v6308_v39, %v663_v1  ;;  %v552_v48 = vmul.f32 %v6300_v36, %v491_v12  ;;  %v4237_v19 = vld [vmem:[%s7399_s2 + $0x300] sm:$0xff]  ;;  %v1133_v61 = vld [vmem:[%s7399_s2 + $0x70] sm:$0xff]  ;;  %v1134_v1 = vld [vmem:[%s7399_s2 + $0x78] sm:$0xff] }
  0x6c   : > { %4770 = vmatmul.mubr.f32.gmra.mrb[10].mxu1 %v2256_v46  ;;  %5495 = vmatprep.subr.bf16.mxu1 %v6601_v60  ;;  %1066 = vst [vmem:[#allocation2 + $0x108] sm:$0xff] %v6650_v6  ;;  %1070 = vst [vmem:[#allocation2 + $0x128] sm:$0xff] %v6653_v56  ;;  %v665_v57 = vmax.f32 %v611_v23, 0.0  ;;  %v612_v30 = vadd.f32 %v6305_v37, %v551_v18  ;;  %v553_v38 = vmul.f32 %v6300_v36, %v492_v17 }
  0x6d   : > { %v554_v46 = vmul.f32 %v6300_v36, %v493_v3  ;;  %5090 = vmatmul.mubr.f32.gmra.mrb[10].mxu0 %v2258_v34  ;;  %4772 = vmatprep.mubr.f32.mxu1 %v2257_v53  ;;  %1068 = vst [vmem:[#allocation2 + $0x118] sm:$0x3] %v1014_v43  ;;  %1069 = vst [vmem:[#allocation2 + $0x120] sm:$0xff] %v6661_v16  ;;  %v613_v50 = vadd.f32 %v6305_v37, %v552_v48  ;;  %v2260_v53 = vld [vmem:[#allocation2 + $0xb1] sm:$0xff]  ;;  %v2261_v43 = vld [vmem:[#allocation2 + $0xc1] sm:$0xff] }
  0x6e   : > { %v555_v42 = vmul.f32 %v6300_v36, %v494_v29  ;;  %v556_v12 = vmul.f32 %v6300_v36, %v495_v8  ;;  %5625 = vmatpush3.bf16.msra.mxu0 %v6544_v11  ;;  %5092 = vmatprep.mubr.f32.mxu0 %v2259_v14  ;;  %v1017_v17 = vmul.f32 %v6321_v51, %v665_v57  ;;  %v666_v3 = vmax.f32 %v612_v30, 0.0  ;;  %v496_v29 = vld [vmem:[#allocation2 + $0x168] sm:$0xff]  ;;  %v497_v8 = vld [vmem:[#allocation2 + $0x170] sm:$0xff]  ;;  %v498_v30 = vld [vmem:[#allocation2 + $0x178] sm:$0x3] }
  0x6f   : > { %v614_v23 = vadd.f32 %v6305_v37, %v553_v38  ;;  %v615_v18 = vadd.f32 %v6305_v37, %v554_v46  ;;  %5627 = vmatprep.subr.bf16.mxu0 %v6551_v21  ;;  %v6691_v48 = vpack.c.bf16 %v4238_v26, %v4237_v19  ;;  %5497 = vmatpush3.bf16.msra.mxu1 %v6601_v60  ;;  %v6694_v25 = vmax.f32 %v613_v50, 0.0 }
  0x70   : > { %v616_v11 = vadd.f32 %v6305_v37, %v555_v42  ;;  %v617_v57 = vadd.f32 %v6305_v37, %v556_v12  ;;  %4773 = vmatmul.mubr.f32.gmra.mrb[12].mxu1 %v2258_v34  ;;  %1071 = vst [vmem:[#allocation2 + $0x130] sm:$0x3] %v1017_v17  ;;  %5499 = vmatprep.subr.bf16.mxu1 %v6646_v2  ;;  %v4173_v42 = vld [vmem:[%s7399_s2 + $0x100] sm:$0xff]  ;;  %v4174_v12 = vld [vmem:[%s7399_s2 + $0x108] sm:$0xff] }
  0x71   : > { %v6700_v38 = vmul.f32 %v6308_v39, %v666_v3  ;;  %v668_v46 = vmax.f32 %v614_v23, 0.0  ;;  %v669_v54 = vmax.f32 %v615_v18, 0.0  ;;  %v5502_v19 = vpack.c.bf16 %v1134_v1, %v1133_v61  ;;  %5093 = vmatmul.mubr.f32.gmra.mrb[12].mxu0 %v2260_v53  ;;  %4775 = vmatprep.mubr.f32.mxu1 %v2259_v14  ;;  %1073 = vst [vmem:[#allocation2 + $0x140] sm:$0xff] %v6694_v25  ;;  %v2262_v14 = vld [vmem:[#allocation2 + $0xc9] sm:$0xff]  ;;  %v6721_v3 = vld [vmem:[#allocation2 + $0x1a] sm:$0xff] }
  0x72   : > { %v6703_v60 = vmax.f32 %v616_v11, 0.0  ;;  %v671_v26 = vmax.f32 %v617_v57, 0.0  ;;  %v557_v50 = vmul.f32 %v6300_v36, %v496_v29  ;;  %v558_v34 = vmul.f32 %v6300_v36, %v497_v8  ;;  %5629 = vmatpush3.bf16.msra.mxu0 %v6551_v21  ;;  %5095 = vmatprep.mubr.f32.mxu0 %v2261_v43  ;;  %v4240_v29 = vld [vmem:[%s7399_s2 + $0x318] sm:$0xff]  ;;  %v499_v11 = vld [vmem:[#allocation2 + $0x180] sm:$0xff] }
  0x73   : > { %1072 = vst [vmem:[#allocation2 + $0x138] sm:$0xff] %v6700_v38  ;;  %v1020_v61 = vmul.f32 %v6321_v51, %v668_v46  ;;  %v6717_v1 = vmul.f32 %v6308_v39, %v669_v54  ;;  %v559_v17 = vmul.f32 %v6300_v36, %v498_v30  ;;  %5631 = vmatprep.subr.bf16.mxu0 %v6644_v15  ;;  %v4239_v54 = vld [vmem:[%s7399_s2 + $0x310] sm:$0xff]  ;;  %v500_v30 = vld [vmem:[#allocation2 + $0x188] sm:$0xff] }
  0x74   : > { %5501 = vmatpush3.bf16.msra.mxu1 %v6646_v2  ;;  %1076 = vst [vmem:[#allocation2 + $0x158] sm:$0xff] %v6703_v60  ;;  %v1023_v21 = vmul.f32 %v6321_v51, %v671_v26  ;;  %v618_v23 = vadd.f32 %v6305_v37, %v557_v50  ;;  %v619_v18 = vadd.f32 %v6305_v37, %v558_v34  ;;  %v501_v46 = vld [vmem:[#allocation2 + $0x190] sm:$0x3]  ;;  %v6742_v26 = vld [vmem:[#allocation2 + $0x22] sm:$0xff]  ;;  %v1153_v50 = vld [vmem:[#allocation2 + $0xd9] sm:$0xff] }
  0x75   : > { %4776 = vmatmul.mubr.f32.gmra.mrb[14].mxu1 %v2260_v53  ;;  %1074 = vst [vmem:[#allocation2 + $0x148] sm:$0x3] %v1020_v61  ;;  %1075 = vst [vmem:[#allocation2 + $0x150] sm:$0xff] %v6717_v1  ;;  %5503 = vmatprep.subr.bf16.mxu1 %v5502_v19  ;;  %v620_v2 = vadd.f32 %v6305_v37, %v559_v17  ;;  %v6736_v8 = vpack.c.bf16 %v4174_v12, %v4173_v42  ;;  %v6745_v42 = vld [vmem:[#allocation2 + $0x32] sm:$0xff]  ;;  %v4242_v17 = vld [vmem:[%s7399_s2 + $0x328] sm:$0xff] }
  0x76   : > { %5096 = vmatmul.mubr.f32.gmra.mrb[14].mxu0 %v2262_v14  ;;  %4778 = vmatprep.mubr.f32.mxu1 %v2261_v43  ;;  %1077 = vst [vmem:[#allocation2 + $0x160] sm:$0x3] %v1023_v21  ;;  %v672_v53 = vmax.f32 %v618_v23, 0.0  ;;  %v6738_v57 = vmax.f32 %v619_v18, 0.0  ;;  %v5638_v12 = vpack.c.bf16 %v4240_v29, %v4239_v54  ;;  %v560_v61 = vmul.f32 %v6300_v36, %v499_v11  ;;  %v6767_v54 = vld [vmem:[#allocation2 + $0x3a] sm:$0xff]  ;;  %v1155_v29 = vld [vmem:[#allocation2 + $0xf1] sm:$0xff] }
  0x77   : > { %5633 = vmatpush3.bf16.msra.mxu0 %v6644_v15  ;;  %5154 = vmatprep.mubr.f32.mxu0 %v6721_v3  ;;  %v674_v34 = vmax.f32 %v620_v2, 0.0  ;;  %v4241_v15 = vld [vmem:[%s7399_s2 + $0x320] sm:$0xff]  ;;  %v562_v23 = vmul.f32 %v6300_v36, %v501_v46  ;;  %v6773_v11 = vld [vmem:[#allocation2 + $0x4a] sm:$0xff]  ;;  %v4244_v46 = vld [vmem:[%s7399_s2 + $0x338] sm:$0xff] }
  0x78   : > { %5635 = vmatprep.subr.bf16.mxu0 %v6691_v48  ;;  %5505 = vmatpush3.bf16.msra.mxu1 %v5502_v19  ;;  %v6748_v43 = vmul.f32 %v6308_v39, %v672_v53  ;;  %1079 = vst [vmem:[#allocation2 + $0x170] sm:$0xff] %v6738_v57  ;;  %v561_v19 = vmul.f32 %v6300_v36, %v500_v30 }
  0x79   : > { %4779 = vmatmul.mubr.f32.gmra.mrb[16].mxu1 %v2262_v14  ;;  %v1026_v21 = vmul.f32 %v6321_v51, %v674_v34  ;;  %5507 = vmatprep.subr.bf16.mxu1 %v6736_v8  ;;  %v1154_v14 = vld [vmem:[#allocation2 + $0xe1] sm:$0xff]  ;;  %v621_v18 = vadd.f32 %v6305_v37, %v560_v61  ;;  %v623_v36 = vadd.f32 %v6305_v37, %v562_v23 }
  0x7a   : > { %5155 = vmatmul.mubr.f32.vlgmr.msra.gmra.mrb[0].mxu0 %v6742_v26  ;;  %4781 = vmatprep.mubr.f32.mxu1 %v1153_v50  ;;  %1078 = vst [vmem:[#allocation2 + $0x168] sm:$0xff] %v6748_v43  ;;  %v6770_v2 = vadd.f32 %v6305_v37, %v561_v19  ;;  %v5642_v53 = vpack.c.bf16 %v4242_v17, %v4241_v15  ;;  %v1156_v37 = vld [vmem:[#allocation2 + $0xf9] sm:$0xff]  ;;  %v1157_v17 = vld [vmem:[#allocation2 + $0x109] sm:$0xff] }
  0x7b   : > { %5637 = vmatpush3.bf16.msra.mxu0 %v6691_v48  ;;  %5157 = vmatprep.mubr.f32.mxu0 %v6745_v42  ;;  %1080 = vst [vmem:[#allocation2 + $0x178] sm:$0x3] %v1026_v21  ;;  %v675_v30 = vmax.f32 %v621_v18, 0.0  ;;  %v4243_v48 = vld [vmem:[%s7399_s2 + $0x330] sm:$0xff]  ;;  %v677_v34 = vmax.f32 %v623_v36, 0.0  ;;  %v6792_v19 = vld [vmem:[#allocation2 + $0x62] sm:$0xff] }
  0x7c   : > { %5639 = vmatprep.subr.bf16.mxu0 %v5638_v12  ;;  %v7406_v50 = vmax.f32 %v6770_v2, 0.0  ;;  %v6787_v15 = vld [vmem:[#allocation2 + $0x52] sm:$0xff]  ;;  %v5646_v23 = vpack.c.bf16 %v4244_v46, %v4243_v48  ;;  %v1159_v18 = vld [vmem:[#allocation2 + $0x121] sm:$0xff]  ;;  %v1160_v46 = vld [vmem:[#allocation2 + $0x129] sm:$0xff] }
  0x7d   : > { %4782 = vmatmul.mubr.f32.gmra.mrb[18].mxu1 %v1154_v14  ;;  %v6784_v61 = vmul.f32 %v6308_v39, %v675_v30  ;;  %v1029_v21 = vmul.f32 %v6321_v51, %v677_v34  ;;  %v4245_v39 = vld [vmem:[%s7399_s2 + $0x340] sm:$0xff]  ;;  %v1158_v51 = vld [vmem:[#allocation2 + $0x111] sm:$0xff] }
  0x7e   : > { %5158 = vmatmul.mubr.f32.gmra.mrb[2].mxu0 %v6767_v54  ;;  %4784 = vmatprep.mubr.f32.mxu1 %v1155_v29  ;;  %1082 = vst [vmem:[#allocation2 + $0x188] sm:$0xff] %v7406_v50  ;;  %v6803_v14 = vld [vmem:[#allocation2 + $0x6a] sm:$0xff]  ;;  %v6805_v29 = vld [vmem:[#allocation2 + $0x7a] sm:$0xff] }
  0x7f   : > { %5160 = vmatprep.mubr.f32.mxu0 %v6773_v11  ;;  %5641 = vmatpush3.bf16.msra.mxu0 %v5638_v12  ;;  %1081 = vst [vmem:[#allocation2 + $0x180] sm:$0xff] %v6784_v61  ;;  %v4246_v12 = vld [vmem:[%s7399_s2 + $0x348] sm:$0xff]  ;;  %1083 = vst [vmem:[#allocation2 + $0x190] sm:$0x3] %v1029_v21  ;;  %v4247_v30 = vld [vmem:[%s7399_s2 + $0x350] sm:$0xff] }
  0x80   : > { %5643 = vmatprep.subr.bf16.mxu0 %v5642_v53  ;;  %v5650_v36 = vpack.c.bf16 %v4246_v12, %v4245_v39  ;;  %v4248_v48 = vld [vmem:[%s7399_s2 + $0x358] sm:$0xff]  ;;  %v6822_v39 = vld [vmem:[%s7397_s0] ss:$0 sm:$0xff] }
  0x81   : > { %4785 = vmatmul.mubr.f32.gmra.mrb[20].mxu1 %v1156_v37  ;;  %v1161_v34 = vld [vmem:[#allocation2 + $0x139] sm:$0xff]  ;;  %v5654_v21 = vpack.c.bf16 %v4248_v48, %v4247_v30  ;;  %v1162_v30 = vld [vmem:[#allocation2 + $0x141] sm:$0xff]  ;;  %v1163_v20 = vld [vmem:[#allocation2 + $0x151] sm:$0xff] }
  0x82   : > { %5161 = vmatmul.mubr.f32.gmra.mrb[4].mxu0 %v6787_v15  ;;  %4787 = vmatprep.mubr.f32.mxu1 %v1157_v17  ;;  %v502_v37 = vld [vmem:[#allocation2 + $0x198] sm:$0xff]  ;;  %v6836_v48 = vld [vmem:[%s7398_s1] ss:$0 sm:$0xff] }
  0x83   : > { %5163 = vmatprep.mubr.f32.mxu0 %v6792_v19  ;;  %5645 = vmatpush3.bf16.msra.mxu0 %v5642_v53  ;;  %v6815_v53 = vld [vmem:[#allocation2 + $0x82] sm:$0xff]  ;;  %v6817_v17 = vld [vmem:[#allocation2 + $0x92] sm:$0xff]  ;;  %v563_v12 = vmul.f32 %v6822_v39, %v502_v37  ;;  %v6840_v37 = vld [vmem:[#allocation2 + $0x9a] sm:$0xff] }
  0x84   : > { %5647 = vmatprep.subr.bf16.mxu0 %v5646_v23 }
  0x85   : > { %4788 = vmatmul.mubr.f32.gmra.mrb[22].mxu1 %v1158_v51  ;;  %v503_v51 = vld [vmem:[#allocation2 + $0x1a0] sm:$0xff] }
  0x86   : > { %5164 = vmatmul.mubr.f32.gmra.mrb[6].mxu0 %v6803_v14  ;;  %4790 = vmatprep.mubr.f32.mxu1 %v1159_v18  ;;  %v4249_v18 = vld [vmem:[%s7399_s2 + $0x360] sm:$0xff]  ;;  %v564_v50 = vmul.f32 %v6822_v39, %v503_v51  ;;  %v6843_v51 = vld [vmem:[#allocation2 + $0xaa] sm:$0xff] }
  0x87   : > { %5166 = vmatprep.mubr.f32.mxu0 %v6805_v29  ;;  %5649 = vmatpush3.bf16.msra.mxu0 %v5646_v23  ;;  %v4250_v23 = vld [vmem:[%s7399_s2 + $0x368] sm:$0xff] }
  0x88   : > { %5651 = vmatprep.subr.bf16.mxu0 %v5650_v36  ;;  %v625_v5 = vadd.f32 %v6836_v48, %v564_v50 }
  0x89   : > { %4791 = vmatmul.mubr.f32.gmra.mrb[24].mxu1 %v1160_v46  ;;  %v624_v46 = vadd.f32 %v6836_v48, %v563_v12  ;;  %v4252_v12 = vld [vmem:[%s7399_s2 + $0x378] sm:$0xff] }
  0x8a   : > { %5167 = vmatmul.mubr.f32.gmra.mrb[8].mxu0 %v6815_v53  ;;  %4793 = vmatprep.mubr.f32.mxu1 %v1161_v34  ;;  %v5658_v34 = vpack.c.bf16 %v4250_v23, %v4249_v18  ;;  %v679_v40 = vmax.f32 %v625_v5, 0.0  ;;  %v6855_v18 = vld [vmem:[#allocation2 + $0xb2] sm:$0xff]  ;;  %v1165_v23 = vld [vmem:[#allocation2 + $0x169] sm:$0xff]  ;;  %v5662_v33 = vpack.c.bf16 %v4252_v12, %v4251_v52 }
  0x8b   : > { %5169 = vmatprep.mubr.f32.mxu0 %v6817_v17  ;;  %5653 = vmatpush3.bf16.msra.mxu0 %v5650_v36  ;;  %v678_v27 = vmax.f32 %v624_v46, 0.0  ;;  %v1164_v36 = vld [vmem:[#allocation2 + $0x159] sm:$0xff]  ;;  %v6859_v46 = vld [vmem:[#allocation2 + $0xc2] sm:$0xff]  ;;  %v6871_v52 = vld [vmem:[#allocation2 + $0xca] sm:$0xff] }
  0x8c   : > { %5655 = vmatprep.subr.bf16.mxu0 %v5654_v21  ;;  %v4254_v5 = vld [vmem:[%s7399_s2 + $0x388] sm:$0xff]  ;;  %v4175_v12 = vld [vmem:[%s7399_s2 + $0x110] sm:$0xff] }
  0x8d   : > { %4794 = vmatmul.mubr.f32.gmra.mrb[26].mxu1 %v1162_v30  ;;  %v6852_v50 = vmul.f32 0.0, %v678_v27  ;;  %v6857_v30 = vmul.f32 0.0, %v679_v40  ;;  %v4253_v27 = vld [vmem:[%s7399_s2 + $0x380] sm:$0xff]  ;;  %v1166_v40 = vld [vmem:[#allocation2 + $0x171] sm:$0xff] }
  0x8e   : > { %5170 = vmatmul.mubr.f32.gmra.mrb[10].mxu0 %v6840_v37  ;;  %4796 = vmatprep.mubr.f32.mxu1 %v1163_v20  ;;  %v6873_v20 = vld [vmem:[#allocation2 + $0xda] sm:$0xff] }
  0x8f   : > { %5172 = vmatprep.mubr.f32.mxu0 %v6843_v51  ;;  %5657 = vmatpush3.bf16.msra.mxu0 %v5654_v21  ;;  %1084 = vst [vmem:[#allocation2 + $0x198] sm:$0xff] %v6852_v50  ;;  %1085 = vst [vmem:[#allocation2 + $0x1a0] sm:$0xff] %v6857_v30  ;;  %v6875_v21 = vpack.c.bf16 %v4254_v5, %v4253_v27  ;;  %v6887_v27 = vld [vmem:[#allocation2 + $0xf2] sm:$0xff] }
  0x90   : > { %5659 = vmatprep.subr.bf16.mxu0 %v5658_v34  ;;  %7436 = vst [vmem:[#allocation13_spill] sm:$0xff] %v6887_v27 }
  0x91   : > { %4797 = vmatmul.mubr.f32.gmra.mrb[28].mxu1 %v1164_v36  ;;  %v4176_v36 = vld [vmem:[%s7399_s2 + $0x118] sm:$0xff] }
  0x92   : > { %5173 = vmatmul.mubr.f32.gmra.mrb[12].mxu0 %v6855_v18  ;;  %4799 = vmatprep.mubr.f32.mxu1 %v1165_v23  ;;  %v6029_v23 = vld [vmem:[#allocation2] sm:$0xff]  ;;  %v5510_v5 = vpack.c.bf16 %v4176_v36, %v4175_v12  ;;  %v6901_v36 = vld [vmem:[#allocation2 + $0x10a] sm:$0xff] }
  0x93   : > { %5175 = vmatprep.mubr.f32.mxu0 %v6859_v46  ;;  %5661 = vmatpush3.bf16.msra.mxu0 %v5658_v34  ;;  %v6885_v34 = vld [vmem:[#allocation2 + $0xe2] sm:$0xff]  ;;  %v6899_v12 = vld [vmem:[#allocation2 + $0xfa] sm:$0xff] }
  0x94   : > { %5663 = vmatprep.subr.bf16.mxu0 %v5662_v33  ;;  %7437 = vst [vmem:[#allocation14_spill] sm:$0xff] %v6899_v12 }
  0x95   : > { %4800 = vmatmul.mubr.f32.gmra.mrb[30].mxu1 %v1166_v40  ;;  %v6030_v40 = vld [vmem:[#allocation2 + $0x8] sm:$0xff] }
  0x96   : > { %5176 = vmatmul.mubr.f32.gmra.mrb[14].mxu0 %v6871_v52  ;;  %4834 = vmatprep.mubr.f32.mxu1 %v6029_v23  ;;  %v4178_v23 = vld [vmem:[%s7399_s2 + $0x128] sm:$0xff] }
  0x97   : > { %5178 = vmatprep.mubr.f32.mxu0 %v6873_v20  ;;  %5665 = vmatpush3.bf16.msra.mxu0 %v5662_v33  ;;  %v6031_v33 = vld [vmem:[#allocation2 + $0x18] sm:$0xff] }
  0x98   : > { %5667 = vmatprep.subr.bf16.mxu0 %v6875_v21 }
  0x99   : > { %4835 = vmatmul.mubr.f32.vlgmr.msra.gmra.mrb[0].mxu1 %v6030_v40  ;;  %v5514_v40 = vpack.c.bf16 %v4178_v23, %v4177_v28  ;;  %v6914_v28 = vld [vmem:[#allocation2 + $0x122] sm:$0xff]  ;;  %v6033_v23 = vld [vmem:[#allocation2 + $0x38] sm:$0xff] }
  0x9a   : > { %5179 = vmatmul.mubr.f32.gmra.mrb[16].mxu0 %v6885_v34  ;;  %5509 = vmatpush3.bf16.msra.mxu1 %v6736_v8  ;;  %v4180_v8 = vld [vmem:[%s7399_s2 + $0x138] sm:$0xff]  ;;  %7439 = vst [vmem:[#allocation16_spill] sm:$0xff] %v6914_v28 }
  0x9b   : > { %4837 = vmatprep.mubr.f32.mxu1 %v6031_v33  ;;  %5181 = vmatprep.mubr.f32.mxu0 %v6887_v27  ;;  %v6912_v33 = vld [vmem:[#allocation2 + $0x112] sm:$0xff]  ;;  %v4181_v27 = vld [vmem:[%s7399_s2 + $0x140] sm:$0xff] }
  0x9c   : > { %5511 = vmatprep.subr.bf16.mxu1 %v5510_v5  ;;  %7438 = vst [vmem:[#allocation15_spill] sm:$0xff] %v6912_v33 }
  0x9d   : > { %4838 = vmatmul.mubr.f32.gmra.mrb[2].mxu1 %v6032_v13  ;;  %v5518_v13 = vpack.c.bf16 %v4180_v8, %v4179_v4  ;;  %v6927_v4 = vld [vmem:[#allocation2 + $0x13a] sm:$0xff]  ;;  %v7440_v8 = vmax.f32 %v6388_v55, 0.0  ;;  %v6943_v55 = vld [vmem:[#allocation2 + $0x152] sm:$0xff] }
  0x9e   : > { %5182 = vmatmul.mubr.f32.gmra.mrb[18].mxu0 %v6899_v12  ;;  %4840 = vmatprep.mubr.f32.mxu1 %v6383_v49  ;;  %v4182_v12 = vld [vmem:[%s7399_s2 + $0x148] sm:$0xff] }
  0x9f   : > { %5184 = vmatprep.mubr.f32.mxu0 %v6901_v36  ;;  %5513 = vmatpush3.bf16.msra.mxu1 %v5510_v5  ;;  %v6925_v49 = vld [vmem:[#allocation2 + $0x12a] sm:$0xff]  ;;  %v5522_v5 = vpack.c.bf16 %v4182_v12, %v4181_v27  ;;  %v6941_v27 = vld [vmem:[#allocation2 + $0x142] sm:$0xff] }
  0xa0   : > { %5515 = vmatprep.subr.bf16.mxu1 %v5514_v40 }
  0xa1   : > { %4841 = vmatmul.mubr.f32.gmra.mrb[4].mxu1 %v6033_v23  ;;  %v4183_v23 = vld [vmem:[%s7399_s2 + $0x150] sm:$0xff] }
  0xa2   : > { %5185 = vmatmul.mubr.f32.gmra.mrb[20].mxu0 %v6912_v33  ;;  %4843 = vmatprep.mubr.f32.mxu1 %v6414_v9  ;;  %v4184_v9 = vld [vmem:[%s7399_s2 + $0x158] sm:$0xff]  ;;  %v504_v33 = vld [vmem:[#allocation2 + $0x1a8] sm:$0x3] }
  0xa3   : > { %5187 = vmatprep.mubr.f32.mxu0 %v6914_v28  ;;  %5517 = vmatpush3.bf16.msra.mxu1 %v5514_v40  ;;  %v565_v40 = vmul.f32 %v6822_v39, %v504_v33  ;;  %v5526_v12 = vpack.c.bf16 %v4184_v9, %v4183_v23  ;;  %v7441_v28 = vmax.f32 %v6410_v7, 0.0  ;;  %v4186_v39 = vld [vmem:[%s7399_s2 + $0x168] sm:$0xff]  ;;  %v7442_v23 = vmax.f32 %v6453_v32, 0.0  ;;  %v4187_v9 = vld [vmem:[%s7399_s2 + $0x170] sm:$0xff] }
  0xa4   : > { %5519 = vmatprep.subr.bf16.mxu1 %v5518_v13  ;;  %v6959_v7 = vld [vmem:[#allocation2 + $0x16a] sm:$0xff]  ;;  %v2583_v32 = vld [vmem:[#allocation2 + $0x182] sm:$0xff] }
  0xa5   : > { %4844 = vmatmul.mubr.f32.gmra.mrb[6].mxu1 %v7440_v8  ;;  %v626_v8 = vadd.f32 %v6836_v48, %v565_v40 }
  0xa6   : > { %5188 = vmatmul.mubr.f32.gmra.mrb[22].mxu0 %v6925_v49  ;;  %4846 = vmatprep.mubr.f32.mxu1 %v6448_v41  ;;  %v4185_v41 = vld [vmem:[%s7399_s2 + $0x160] sm:$0xff] }
  0xa7   : > { %5190 = vmatprep.mubr.f32.mxu0 %v6927_v4  ;;  %5521 = vmatpush3.bf16.msra.mxu1 %v5518_v13  ;;  %v680_v33 = vmax.f32 %v626_v8, 0.0  ;;  %v6957_v13 = vld [vmem:[#allocation2 + $0x15a] sm:$0xff]  ;;  %v5530_v48 = vpack.c.bf16 %v4186_v39, %v4185_v41  ;;  %v7443_v8 = vmax.f32 %v6489_v10, 0.0  ;;  %v4190_v39 = vld [vmem:[%s7399_s2 + $0x188] sm:$0xff] }
  0xa8   : > { %5523 = vmatprep.subr.bf16.mxu1 %v5522_v5  ;;  %v4189_v41 = vld [vmem:[%s7399_s2 + $0x180] sm:$0xff] }
  0xa9   : > { %4847 = vmatmul.mubr.f32.gmra.mrb[8].mxu1 %v7441_v28  ;;  %v1032_v28 = vmul.f32 0.0, %v680_v33  ;;  %v6984_v33 = vld [vmem:[#allocation2 + $0x30] sm:$0xff]  ;;  %v6986_v10 = vpack.c.bf16 %v4190_v39, %v4189_v41  ;;  %v7015_v41 = vld [vmem:[#allocation2 + $0x60] sm:$0xff] }
  0xaa   : > { %5191 = vmatmul.mubr.f32.gmra.mrb[24].mxu0 %v6941_v27  ;;  %4849 = vmatprep.mubr.f32.mxu1 %v6474_v0  ;;  %v4188_v0 = vld [vmem:[%s7399_s2 + $0x178] sm:$0xff]  ;;  %7445 = vst [vmem:[#allocation18_spill] sm:$0xff] %v7015_v41 }
  0xab   : > { %5193 = vmatprep.mubr.f32.mxu0 %v6943_v55  ;;  %5525 = vmatpush3.bf16.msra.mxu1 %v5522_v5  ;;  %1086 = vst [vmem:[#allocation2 + $0x1a8] sm:$0x3] %v1032_v28  ;;  %v6972_v5 = vld [vmem:[#allocation2 + $0x172] sm:$0xff]  ;;  %v5534_v40 = vpack.c.bf16 %v4188_v0, %v4187_v9  ;;  %v6999_v9 = vld [vmem:[#allocation2 + $0x48] sm:$0xff] }
  0xac   : > { %5527 = vmatprep.subr.bf16.mxu1 %v5526_v12  ;;  %v4255_v28 = vld [vmem:[%s7399_s2 + $0x390] sm:$0xff] }
  0xad   : > { %4850 = vmatmul.mubr.f32.gmra.mrb[10].mxu1 %v7442_v23  ;;  %v4256_v23 = vld [vmem:[%s7399_s2 + $0x398] sm:$0xff] }
  0xae   : > { %5194 = vmatmul.mubr.f32.gmra.mrb[26].mxu0 %v6957_v13  ;;  %4852 = vmatprep.mubr.f32.mxu1 %v6512_v44  ;;  %v5670_v0 = vpack.c.bf16 %v4256_v23, %v4255_v28  ;;  %v4260_v28 = vld [vmem:[%s7399_s2 + $0x3b8] sm:$0xff] }
  0xaf   : > { %5196 = vmatprep.mubr.f32.mxu0 %v6959_v7  ;;  %5529 = vmatpush3.bf16.msra.mxu1 %v5526_v12  ;;  %v2584_v12 = vld [vmem:[#allocation2 + $0x18a] sm:$0xff] }
  0xb0   : > { %5531 = vmatprep.subr.bf16.mxu1 %v5530_v48 }
  0xb1   : > { %4853 = vmatmul.mubr.f32.gmra.mrb[12].mxu1 %v7443_v8  ;;  %v4258_v8 = vld [vmem:[%s7399_s2 + $0x3a8] sm:$0xff] }
  0xb2   : > { %5197 = vmatmul.mubr.f32.gmra.mrb[28].mxu0 %v6972_v5  ;;  %4855 = vmatprep.mubr.f32.mxu1 %v6539_v24 }
  0xb3   : > { %5199 = vmatprep.mubr.f32.mxu0 %v2583_v32  ;;  %5533 = vmatpush3.bf16.msra.mxu1 %v5530_v48  ;;  %v6997_v48 = vld [vmem:[#allocation2 + $0x38] sm:$0xff]  ;;  %v4257_v32 = vld [vmem:[%s7399_s2 + $0x3a0] sm:$0xff] }
  0xb4   : > { %5535 = vmatprep.subr.bf16.mxu1 %v5534_v40  ;;  %v5674_v39 = vpack.c.bf16 %v4258_v8, %v4257_v32  ;;  %v4261_v32 = vld [vmem:[%s7399_s2 + $0x3c0] sm:$0xff]  ;;  %v4262_v8 = vld [vmem:[%s7399_s2 + $0x3c8] sm:$0xff] }
  0xb5   : > { %4856 = vmatmul.mubr.f32.gmra.mrb[14].mxu1 %v6529_v59 }
  0xb6   : > { %5200 = vmatmul.mubr.f32.gmra.mrb[30].mxu0 %v2584_v12  ;;  %4858 = vmatprep.mubr.f32.mxu1 %v6564_v47  ;;  %v4259_v12 = vld [vmem:[%s7399_s2 + $0x3b0] sm:$0xff] }
  0xb7   : > { %5234 = vmatprep.mubr.f32.mxu0 %v6984_v33  ;;  %5537 = vmatpush3.bf16.msra.mxu1 %v5534_v40  ;;  %v7013_v40 = vld [vmem:[#allocation2 + $0x50] sm:$0xff]  ;;  %v5678_v23 = vpack.c.bf16 %v4260_v28, %v4259_v12  ;;  %v4264_v28 = vld [vmem:[%s7399_s2 + $0x3d8] sm:$0xff] }
  0xb8   : > { %5539 = vmatprep.subr.bf16.mxu1 %v6986_v10  ;;  %7444 = vst [vmem:[#allocation17_spill] sm:$0xff] %v7013_v40  ;;  %v4263_v12 = vld [vmem:[%s7399_s2 + $0x3d0] sm:$0xff] }
  0xb9   : > { %4859 = vmatmul.mubr.f32.gmra.mrb[16].mxu1 %v6557_v31 }
  0xba   : > { %5235 = vmatmul.mubr.f32.vlgmr.msra.gmra.mrb[0].mxu0 %v6997_v48  ;;  %4861 = vmatprep.mubr.f32.mxu1 %v6598_v35 }
  0xbb   : > { %5669 = vmatpush3.bf16.msra.mxu0 %v6875_v21  ;;  %5237 = vmatprep.mubr.f32.mxu0 %v6999_v9  ;;  %v7027_v21 = vld [vmem:[#allocation2 + $0x68] sm:$0xff] }
  0xbc   : > { %5671 = vmatprep.subr.bf16.mxu0 %v5670_v0 }
  0xbd   : > { %4862 = vmatmul.mubr.f32.gmra.mrb[18].mxu1 %v6592_v22 }
  0xbe   : > { %5238 = vmatmul.mubr.f32.gmra.mrb[2].mxu0 %v7013_v40  ;;  %4864 = vmatprep.mubr.f32.mxu1 %v6618_v63  ;;  %v6035_v40 = vld [vmem:[#allocation2 + $0x80] sm:$0xff] }
  0xbf   : > { %5240 = vmatprep.mubr.f32.mxu0 %v7015_v41  ;;  %5673 = vmatpush3.bf16.msra.mxu0 %v5670_v0  ;;  %v6034_v41 = vld [vmem:[#allocation2 + $0x78] sm:$0xff]  ;;  %v5682_v0 = vpack.c.bf16 %v4262_v8, %v4261_v32  ;;  %v4266_v32 = vld [vmem:[%s7399_s2 + $0x3e8] sm:$0xff] }
  0xc0   : > { %5675 = vmatprep.subr.bf16.mxu0 %v5674_v39  ;;  %v6036_v8 = vld [vmem:[#allocation2 + $0x98] sm:$0xff] }
  0xc1   : > { %4865 = vmatmul.mubr.f32.gmra.mrb[20].mxu1 %v6606_v58 }
  0xc2   : > { %5241 = vmatmul.mubr.f32.gmra.mrb[4].mxu0 %v7027_v21  ;;  %4867 = vmatprep.mubr.f32.mxu1 %v6650_v6 }
  0xc3   : > { %5243 = vmatprep.mubr.f32.mxu0 %v6034_v41  ;;  %5677 = vmatpush3.bf16.msra.mxu0 %v5674_v39  ;;  %v5686_v41 = vpack.c.bf16 %v4264_v28, %v4263_v12  ;;  %v4265_v39 = vld [vmem:[%s7399_s2 + $0x3e0] sm:$0xff]  ;;  %v4270_v12 = vld [vmem:[%s7399_s2 + $0x408] sm:$0xff]  ;;  %v4191_v28 = vld [vmem:[%s7399_s2 + $0x190] sm:$0xff] }
  0xc4   : > { %5679 = vmatprep.subr.bf16.mxu0 %v5678_v23 }
  0xc5   : > { %4868 = vmatmul.mubr.f32.gmra.mrb[22].mxu1 %v6640_v45 }
  0xc6   : > { %5244 = vmatmul.mubr.f32.gmra.mrb[6].mxu0 %v6035_v40  ;;  %4870 = vmatprep.mubr.f32.mxu1 %v6661_v16  ;;  %v4267_v40 = vld [vmem:[%s7399_s2 + $0x3f0] sm:$0xff] }
  0xc7   : > { %5246 = vmatprep.mubr.f32.mxu0 %v6512_v44  ;;  %5681 = vmatpush3.bf16.msra.mxu0 %v5678_v23  ;;  %v5690_v44 = vpack.c.bf16 %v4266_v32, %v4265_v39  ;;  %v4268_v23 = vld [vmem:[%s7399_s2 + $0x3f8] sm:$0xff]  ;;  %v4193_v39 = vld [vmem:[%s7399_s2 + $0x1a0] sm:$0xff]  ;;  %v4194_v32 = vld [vmem:[%s7399_s2 + $0x1a8] sm:$0xff] }
  0xc8   : > { %5683 = vmatprep.subr.bf16.mxu0 %v5682_v0 }
  0xc9   : > { %4871 = vmatmul.mubr.f32.gmra.mrb[24].mxu1 %v6653_v56 }
  0xca   : > { %5247 = vmatmul.mubr.f32.gmra.mrb[8].mxu0 %v6036_v8  ;;  %4873 = vmatprep.mubr.f32.mxu1 %v6700_v38  ;;  %v4196_v8 = vld [vmem:[%s7399_s2 + $0x1b8] sm:$0xff] }
  0xcb   : > { %5249 = vmatprep.mubr.f32.mxu0 %v6539_v24  ;;  %5685 = vmatpush3.bf16.msra.mxu0 %v5682_v0  ;;  %v5694_v24 = vpack.c.bf16 %v4268_v23, %v4267_v40  ;;  %v4269_v0 = vld [vmem:[%s7399_s2 + $0x400] sm:$0xff]  ;;  %v3174_v40 = vld [vmem:[#allocation2 + $0x91] sm:$0xff] }
  0xcc   : > { %5687 = vmatprep.subr.bf16.mxu0 %v5686_v41 }
  0xcd   : > { %4874 = vmatmul.mubr.f32.gmra.mrb[26].mxu1 %v6694_v25 }
  0xce   : > { %5250 = vmatmul.mubr.f32.gmra.mrb[10].mxu0 %v6529_v59  ;;  %4876 = vmatprep.mubr.f32.mxu1 %v6717_v1  ;;  %v1634_v59 = vld [vmem:[#allocation2 + $0x2] sm:$0xff] }
  0xcf   : > { %5252 = vmatprep.mubr.f32.mxu0 %v6564_v47  ;;  %5689 = vmatpush3.bf16.msra.mxu0 %v5686_v41  ;;  %v7076_v47 = vpack.c.bf16 %v4270_v12, %v4269_v0  ;;  %v4192_v41 = vld [vmem:[%s7399_s2 + $0x198] sm:$0xff]  ;;  %v4279_v0 = vld [vmem:[%s7399_s2 + $0x450] sm:$0xff] }
  0xd0   : > { %5691 = vmatprep.subr.bf16.mxu0 %v5690_v44  ;;  %v4280_v12 = vld [vmem:[%s7399_s2 + $0x458] sm:$0xff] }
  0xd1   : > { %4877 = vmatmul.mubr.f32.gmra.mrb[28].mxu1 %v6703_v60 }
  0xd2   : > { %5253 = vmatmul.mubr.f32.gmra.mrb[12].mxu0 %v6557_v31  ;;  %4879 = vmatprep.mubr.f32.mxu1 %v6748_v43  ;;  %v1635_v31 = vld [vmem:[#allocation2 + $0xa] sm:$0xff] }
  0xd3   : > { %5255 = vmatprep.mubr.f32.mxu0 %v6598_v35  ;;  %5693 = vmatpush3.bf16.msra.mxu0 %v5690_v44  ;;  %v5542_v35 = vpack.c.bf16 %v4192_v41, %v4191_v28  ;;  %v3173_v44 = vld [vmem:[#allocation2 + $0x81] sm:$0xff]  ;;  %v5718_v28 = vpack.c.bf16 %v4280_v12, %v4279_v0 }
  0xd4   : > { %5695 = vmatprep.subr.bf16.mxu0 %v5694_v24  ;;  %v4281_v41 = vld [vmem:[%s7399_s2 + $0x460] sm:$0xff] }
  0xd5   : > { %4880 = vmatmul.mubr.f32.gmra.mrb[30].mxu1 %v6738_v57  ;;  %v1963_v0 = vld [vmem:[#allocation2 + $0x120] sm:$0xff] }
  0xd6   : > { %5256 = vmatmul.mubr.f32.gmra.mrb[14].mxu0 %v6592_v22  ;;  %4914 = vmatprep.mubr.f32.mxu1 %v1634_v59  ;;  %v5546_v22 = vpack.c.bf16 %v4194_v32, %v4193_v39  ;;  %v7450_v59 = vld [vmem:[#allocation16_spill] sm:$0xff] }
  0xd7   : > { %5258 = vmatprep.mubr.f32.mxu0 %v6618_v63  ;;  %5697 = vmatpush3.bf16.msra.mxu0 %v5694_v24  ;;  %v4195_v63 = vld [vmem:[%s7399_s2 + $0x1b0] sm:$0xff]  ;;  %v7449_v24 = vld [vmem:[#allocation15_spill] sm:$0xff]  ;;  %v3178_v39 = vld [vmem:[#allocation2 + $0xc1] sm:$0xff] }
  0xd8   : > { %5699 = vmatprep.subr.bf16.mxu0 %v7076_v47  ;;  %v3478_v12 = vld [vmem:[#allocation2 + $0x7a] sm:$0xff] }
  0xd9   : > { %4915 = vmatmul.mubr.f32.vlgmr.msra.gmra.mrb[0].mxu1 %v1635_v31  ;;  %v4282_v31 = vld [vmem:[%s7399_s2 + $0x468] sm:$0xff] }
  0xda   : > { %5259 = vmatmul.mubr.f32.gmra.mrb[16].mxu0 %v6606_v58  ;;  %5541 = vmatpush3.bf16.msra.mxu1 %v6986_v10  ;;  %v5550_v58 = vpack.c.bf16 %v4196_v8, %v4195_v63  ;;  %v4278_v10 = vld [vmem:[%s7399_s2 + $0x448] sm:$0xff]  ;;  %v5722_v32 = vpack.c.bf16 %v4282_v31, %v4281_v41  ;;  %v7212_v63 = vld [vmem:[#allocation2 + $0xd9] sm:$0xff] }
  0xdb   : > { %4917 = vmatprep.mubr.f32.mxu1 %v6721_v3  ;;  %5261 = vmatprep.mubr.f32.mxu0 %v6650_v6  ;;  %v4197_v6 = vld [vmem:[%s7399_s2 + $0x1c0] sm:$0xff]  ;;  %v4198_v3 = vld [vmem:[%s7399_s2 + $0x1c8] sm:$0xff] }
  0xdc   : > { %5543 = vmatprep.subr.bf16.mxu1 %v5542_v35  ;;  %v1966_v41 = vld [vmem:[#allocation2 + $0x140] sm:$0xff] }
  0xdd   : > { %4918 = vmatmul.mubr.f32.gmra.mrb[2].mxu1 %v6742_v26  ;;  %v4200_v26 = vld [vmem:[%s7399_s2 + $0x1d8] sm:$0xff] }
  0xde   : > { %5262 = vmatmul.mubr.f32.gmra.mrb[18].mxu0 %v6640_v45  ;;  %4920 = vmatprep.mubr.f32.mxu1 %v6745_v42  ;;  %v5554_v45 = vpack.c.bf16 %v4198_v3, %v4197_v6  ;;  %v4202_v42 = vld [vmem:[%s7399_s2 + $0x1e8] sm:$0xff]  ;;  %v7219_v6 = vld [vmem:[#allocation2 + $0xf1] sm:$0xff]  ;;  %v3481_v31 = vld [vmem:[#allocation2 + $0x9a] sm:$0xff] }
  0xdf   : > { %5264 = vmatprep.mubr.f32.mxu0 %v6661_v16  ;;  %5545 = vmatpush3.bf16.msra.mxu1 %v5542_v35  ;;  %v4199_v16 = vld [vmem:[%s7399_s2 + $0x1d0] sm:$0xff]  ;;  %v7234_v3 = vld [vmem:[#allocation2 + $0x121] sm:$0xff] }
  0xe0   : > { %5547 = vmatprep.subr.bf16.mxu1 %v5546_v22  ;;  %v3177_v35 = vld [vmem:[#allocation2 + $0xb1] sm:$0xff] }
  0xe1   : > { %4921 = vmatmul.mubr.f32.gmra.mrb[4].mxu1 %v6767_v54  ;;  %v4204_v54 = vld [vmem:[%s7399_s2 + $0x1f8] sm:$0xff] }
  0xe2   : > { %5265 = vmatmul.mubr.f32.gmra.mrb[20].mxu0 %v6653_v56  ;;  %4923 = vmatprep.mubr.f32.mxu1 %v6773_v11  ;;  %v5558_v56 = vpack.c.bf16 %v4200_v26, %v4199_v16  ;;  %v3166_v11 = vld [vmem:[#allocation2 + $0x31] sm:$0xff]  ;;  %v7241_v16 = vld [vmem:[#allocation2 + $0x129] sm:$0xff] }
  0xe3   : > { %5267 = vmatprep.mubr.f32.mxu0 %v6700_v38  ;;  %5549 = vmatpush3.bf16.msra.mxu1 %v5546_v22  ;;  %v4201_v38 = vld [vmem:[%s7399_s2 + $0x1e0] sm:$0xff]  ;;  %v4284_v22 = vld [vmem:[%s7399_s2 + $0x478] sm:$0xff]  ;;  %v7453_v26 = vld [vmem:[#allocation17_spill] sm:$0xff] }
  0xe4   : > { %5551 = vmatprep.subr.bf16.mxu1 %v5550_v58 }
  0xe5   : > { %4924 = vmatmul.mubr.f32.gmra.mrb[6].mxu1 %v6787_v15  ;;  %v3168_v15 = vld [vmem:[#allocation2 + $0x49] sm:$0xff] }
  0xe6   : > { %5268 = vmatmul.mubr.f32.gmra.mrb[22].mxu0 %v6694_v25  ;;  %4926 = vmatprep.mubr.f32.mxu1 %v6792_v19  ;;  %v5562_v25 = vpack.c.bf16 %v4202_v42, %v4201_v38  ;;  %v7254_v38 = vld [vmem:[#allocation2 + $0x151] sm:$0xff]  ;;  %v7455_v42 = vld [vmem:[#allocation8_spill] sm:$0xff] }
  0xe7   : > { %5270 = vmatprep.mubr.f32.mxu0 %v6717_v1  ;;  %5553 = vmatpush3.bf16.msra.mxu1 %v5550_v58  ;;  %v4203_v1 = vld [vmem:[%s7399_s2 + $0x1f0] sm:$0xff]  ;;  %v1941_v58 = vld [vmem:[#allocation2 + $0x18] sm:$0xff] }
  0xe8   : > { %5555 = vmatprep.subr.bf16.mxu1 %v5554_v45 }
  0xe9   : > { %4927 = vmatmul.mubr.f32.gmra.mrb[8].mxu1 %v6803_v14  ;;  %v4273_v14 = vld [vmem:[%s7399_s2 + $0x420] sm:$0xff] }
  0xea   : > { %5271 = vmatmul.mubr.f32.gmra.mrb[24].mxu0 %v6703_v60  ;;  %4929 = vmatprep.mubr.f32.mxu1 %v6805_v29  ;;  %v5566_v60 = vpack.c.bf16 %v4204_v54, %v4203_v1  ;;  %v4274_v29 = vld [vmem:[%s7399_s2 + $0x428] sm:$0xff]  ;;  %v7260_v1 = vld [vmem:[#allocation2 + $0x159] sm:$0xff]  ;;  %v1951_v54 = vld [vmem:[#allocation2 + $0x90] sm:$0xff] }
  0xeb   : > { %5273 = vmatprep.mubr.f32.mxu0 %v6748_v43  ;;  %5557 = vmatpush3.bf16.msra.mxu1 %v5554_v45  ;;  %v7446_v43 = vmax.f32 %v6770_v2, 0.0  ;;  %v3167_v2 = vld [vmem:[#allocation2 + $0x39] sm:$0xff]  ;;  %v7451_v45 = vld [vmem:[#allocation6_spill] sm:$0xff] }
  0xec   : > { %5559 = vmatprep.subr.bf16.mxu1 %v5558_v56 }
  0xed   : > { %4930 = vmatmul.mubr.f32.gmra.mrb[10].mxu1 %v6815_v53  ;;  %v3169_v53 = vld [vmem:[#allocation2 + $0x51] sm:$0xff] }
  0xee   : > { %5274 = vmatmul.mubr.f32.gmra.mrb[26].mxu0 %v6738_v57  ;;  %4932 = vmatprep.mubr.f32.mxu1 %v6817_v17  ;;  %v4271_v57 = vld [vmem:[%s7399_s2 + $0x410] sm:$0xff]  ;;  %v3170_v17 = vld [vmem:[#allocation2 + $0x61] sm:$0xff] }
  0xef   : > { %5276 = vmatprep.mubr.f32.mxu0 %v6784_v61  ;;  %5561 = vmatpush3.bf16.msra.mxu1 %v5558_v56  ;;  %v4272_v61 = vld [vmem:[%s7399_s2 + $0x418] sm:$0xff]  ;;  %v7454_v56 = vld [vmem:[#allocation18_spill] sm:$0xff] }
  0xf0   : > { %5563 = vmatprep.subr.bf16.mxu1 %v5562_v25  ;;  %v5702_v19 = vpack.c.bf16 %v4272_v61, %v4271_v57  ;;  %v1953_v57 = vld [vmem:[#allocation2 + $0xa8] sm:$0xff] }
  0xf1   : > { %4933 = vmatmul.mubr.f32.gmra.mrb[12].mxu1 %v6840_v37  ;;  %v5706_v37 = vpack.c.bf16 %v4274_v29, %v4273_v14  ;;  %v7271_v61 = vld [vmem:[#allocation2 + $0x181] sm:$0xff]  ;;  %v3196_v29 = vld [vmem:[#allocation2 + $0x199] sm:$0xff] }
  0xf2   : > { %5277 = vmatmul.mubr.f32.gmra.mrb[28].mxu0 %v7446_v43  ;;  %4935 = vmatprep.mubr.f32.mxu1 %v6843_v51  ;;  %v4275_v51 = vld [vmem:[%s7399_s2 + $0x430] sm:$0xff]  ;;  %v7456_v43 = vld [vmem:[#allocation9_spill] sm:$0xff]  ;;  %v1955_v14 = vld [vmem:[#allocation2 + $0xc0] sm:$0xff] }
  0xf3   : > { %5279 = vmatprep.mubr.f32.mxu0 %v6852_v50  ;;  %5565 = vmatpush3.bf16.msra.mxu1 %v5562_v25  ;;  %v4276_v50 = vld [vmem:[%s7399_s2 + $0x438] sm:$0xff]  ;;  %v1950_v25 = vld [vmem:[#allocation2 + $0x80] sm:$0xff] }
  0xf4   : > { %5567 = vmatprep.subr.bf16.mxu1 %v5566_v60 }
  0xf5   : > { %4936 = vmatmul.mubr.f32.gmra.mrb[14].mxu1 %v6855_v18  ;;  %v7447_v18 = vld [vmem:[#allocation13_spill] sm:$0xff] }
  0xf6   : > { %5280 = vmatmul.mubr.f32.gmra.mrb[30].mxu0 %v6857_v30  ;;  %4938 = vmatprep.mubr.f32.mxu1 %v6859_v46  ;;  %v3171_v30 = vld [vmem:[#allocation2 + $0x69] sm:$0xff]  ;;  %v3172_v46 = vld [vmem:[#allocation2 + $0x79] sm:$0xff] }
  0xf7   : > { %5314 = vmatprep.mubr.f32.mxu0 %v3166_v11  ;;  %5569 = vmatpush3.bf16.msra.mxu1 %v5566_v60  ;;  %v7263_v60 = vld [vmem:[#allocation2 + $0x169] sm:$0xff]  ;;  %v7268_v11 = vld [vmem:[#allocation2 + $0x171] sm:$0xff] }
  0xf8   : > { %5730 = vmatprep.subr.bf16.mxu1 %v6206_v62 }
  0xf9   : > { %4939 = vmatmul.mubr.f32.gmra.mrb[16].mxu1 %v6871_v52  ;;  %v5710_v52 = vpack.c.bf16 %v4276_v50, %v4275_v51  ;;  %v1957_v51 = vld [vmem:[#allocation2 + $0xd8] sm:$0xff] }
  0xfa   : > { %5315 = vmatmul.mubr.f32.vlgmr.msra.gmra.mrb[0].mxu0 %v3167_v2  ;;  %4941 = vmatprep.mubr.f32.mxu1 %v6873_v20  ;;  %v7448_v20 = vld [vmem:[#allocation14_spill] sm:$0xff] }
  0xfb   : > { %5701 = vmatpush3.bf16.msra.mxu0 %v7076_v47  ;;  %5317 = vmatprep.mubr.f32.mxu0 %v3168_v15  ;;  %v3176_v47 = vld [vmem:[#allocation2 + $0xa9] sm:$0xff]  ;;  %v3472_v50 = vld [vmem:[#allocation2 + $0x32] sm:$0xff] }
  0xfc   : > { %5703 = vmatprep.subr.bf16.mxu0 %v5702_v19  ;;  %v7457_v2 = vld [vmem:[#allocation10_spill] sm:$0xff] }
  0xfd   : > { %4942 = vmatmul.mubr.f32.gmra.mrb[18].mxu1 %v6885_v34  ;;  %v4277_v34 = vld [vmem:[%s7399_s2 + $0x440] sm:$0xff]  ;;  %v1954_v15 = vld [vmem:[#allocation2 + $0xb0] sm:$0xff] }
  0xfe   : > { %5318 = vmatmul.mubr.f32.gmra.mrb[2].mxu0 %v3169_v53  ;;  %4944 = vmatprep.mubr.f32.mxu1 %v7447_v18  ;;  %v5714_v23 = vpack.c.bf16 %v4278_v10, %v4277_v34  ;;  %v7458_v53 = vld [vmem:[#allocation11_spill] sm:$0xff]  ;;  %v7459_v18 = vld [vmem:[#allocation12_spill] sm:$0xff] }
  0xff   : > { %5320 = vmatprep.mubr.f32.mxu0 %v3170_v17  ;;  %5705 = vmatpush3.bf16.msra.mxu0 %v5702_v19  ;;  %v7276_v19 = vld [vmem:[#allocation2 + $0x189] sm:$0xff]  ;;  %v1960_v34 = vld [vmem:[#allocation2 + $0xf8] sm:$0xff] }
 0x100   : > { %5707 = vmatprep.subr.bf16.mxu0 %v5706_v37  ;;  %v1956_v17 = vld [vmem:[#allocation2 + $0xc8] sm:$0xff]  ;;  %v3475_v10 = vld [vmem:[#allocation2 + $0x52] sm:$0xff] }
 0x101   : > { %4945 = vmatmul.mubr.f32.gmra.mrb[20].mxu1 %v7448_v20  ;;  %v3474_v20 = vld [vmem:[#allocation2 + $0x4a] sm:$0xff] }
 0x102   : > { %5321 = vmatmul.mubr.f32.gmra.mrb[4].mxu0 %v3171_v30  ;;  %4947 = vmatprep.mubr.f32.mxu1 %v6901_v36  ;;  %v3175_v36 = vld [vmem:[#allocation2 + $0x99] sm:$0xff] }
 0x103   : > { %5323 = vmatprep.mubr.f32.mxu0 %v3172_v46  ;;  %5709 = vmatpush3.bf16.msra.mxu0 %v5706_v37  ;;  %v3197_v37 = vld [vmem:[#allocation2 + $0x1a1] sm:$0xff] }
 0x104   : > { %5711 = vmatprep.subr.bf16.mxu0 %v5710_v52  ;;  %v1958_v30 = vld [vmem:[#allocation2 + $0xe0] sm:$0xff] }
 0x105   : > { %4948 = vmatmul.mubr.f32.gmra.mrb[22].mxu1 %v7449_v24  ;;  %v3473_v46 = vld [vmem:[#allocation2 + $0x3a] sm:$0xff]  ;;  %v3477_v24 = vld [vmem:[#allocation2 + $0x6a] sm:$0xff] }
 0x106   : > { %5324 = vmatmul.mubr.f32.gmra.mrb[6].mxu0 %v3173_v44  ;;  %4950 = vmatprep.mubr.f32.mxu1 %v7450_v59  ;;  %v1961_v44 = vld [vmem:[#allocation2 + $0x108] sm:$0xff] }
 0x107   : > { %5326 = vmatprep.mubr.f32.mxu0 %v3174_v40  ;;  %5713 = vmatpush3.bf16.msra.mxu0 %v5710_v52  ;;  %v1959_v52 = vld [vmem:[#allocation2 + $0xf0] sm:$0xff]  ;;  %v3476_v40 = vld [vmem:[#allocation2 + $0x62] sm:$0xff] }
 0x108   : > { %5715 = vmatprep.subr.bf16.mxu0 %v5714_v23  ;;  %v1964_v59 = vld [vmem:[#allocation2 + $0x128] sm:$0xff] }
 0x109   : > { %4951 = vmatmul.mubr.f32.gmra.mrb[24].mxu1 %v6925_v49  ;;  %v4283_v49 = vld [vmem:[%s7399_s2 + $0x470] sm:$0xff] }
 0x10a   : > { %5327 = vmatmul.mubr.f32.gmra.mrb[8].mxu0 %v3175_v36  ;;  %4953 = vmatprep.mubr.f32.mxu1 %v6927_v4  ;;  %v3179_v4 = vld [vmem:[#allocation2 + $0xc9] sm:$0xff]  ;;  %v5726_v8 = vpack.c.bf16 %v4284_v22, %v4283_v49  ;;  %v3483_v49 = vld [vmem:[#allocation2 + $0xb2] sm:$0xff] }
 0x10b   : > { %5329 = vmatprep.mubr.f32.mxu0 %v3176_v47  ;;  %5717 = vmatpush3.bf16.msra.mxu0 %v5714_v23  ;;  %v1962_v23 = vld [vmem:[#allocation2 + $0x110] sm:$0xff]  ;;  %v3479_v36 = vld [vmem:[#allocation2 + $0x82] sm:$0xff]  ;;  %v1965_v47 = vld [vmem:[#allocation2 + $0x138] sm:$0xff] }
 0x10c   : > { %5719 = vmatprep.subr.bf16.mxu0 %v5718_v28  ;;  %v1969_v22 = vld [vmem:[#allocation2 + $0x168] sm:$0xff] }
 0x10d   : > { %4954 = vmatmul.mubr.f32.gmra.mrb[26].mxu1 %v6941_v27  ;;  %v7217_v27 = vld [vmem:[#allocation2 + $0xe1] sm:$0xff] }
 0x10e   : > { %5330 = vmatmul.mubr.f32.gmra.mrb[10].mxu0 %v3177_v35  ;;  %4956 = vmatprep.mubr.f32.mxu1 %v6943_v55  ;;  %v1942_v55 = vld [vmem:[#allocation2 + $0x20] sm:$0xff]  ;;  %v1967_v35 = vld [vmem:[#allocation2 + $0x150] sm:$0xff] }
 0x10f   : > { %5332 = vmatprep.mubr.f32.mxu0 %v3178_v39  ;;  %5721 = vmatpush3.bf16.msra.mxu0 %v5718_v28  ;;  %v3480_v28 = vld [vmem:[#allocation2 + $0x92] sm:$0xff]  ;;  %v3482_v39 = vld [vmem:[#allocation2 + $0xaa] sm:$0xff] }
 0x110   : > { %5723 = vmatprep.subr.bf16.mxu0 %v5722_v32 }
 0x111   : > { %4957 = vmatmul.mubr.f32.gmra.mrb[28].mxu1 %v6957_v13  ;;  %v7224_v13 = vld [vmem:[#allocation2 + $0xf9] sm:$0xff] }
 0x112   : > { %5333 = vmatmul.mubr.f32.gmra.mrb[12].mxu0 %v3179_v4  ;;  %4959 = vmatprep.mubr.f32.mxu1 %v6959_v7  ;;  %v7226_v7 = vld [vmem:[#allocation2 + $0x109] sm:$0xff] }
 0x113   : > { %5335 = vmatprep.mubr.f32.mxu0 %v7212_v63  ;;  %5725 = vmatpush3.bf16.msra.mxu0 %v5722_v32  ;;  %v1968_v32 = vld [vmem:[#allocation2 + $0x158] sm:$0xff]  ;;  %v3484_v4 = vld [vmem:[#allocation2 + $0xc2] sm:$0xff] }
 0x114   : > { %5727 = vmatprep.subr.bf16.mxu0 %v5726_v8 }
 0x115   : > { %4960 = vmatmul.mubr.f32.gmra.mrb[30].mxu1 %v6972_v5  ;;  %v7232_v5 = vld [vmem:[#allocation2 + $0x111] sm:$0xff] }
 0x116   : > { %5336 = vmatmul.mubr.f32.gmra.mrb[14].mxu0 %v7217_v27  ;;  %4994 = vmatprep.mubr.f32.mxu1 %v1941_v58  ;;  %v3485_v58 = vld [vmem:[#allocation2 + $0xca] sm:$0xff] }
 0x117   : > { %5338 = vmatprep.mubr.f32.mxu0 %v7219_v6  ;;  %5729 = vmatpush3.bf16.msra.mxu0 %v5726_v8  ;;  %v1970_v8 = vld [vmem:[#allocation2 + $0x170] sm:$0xff] }
 0x119   : > { %4995 = vmatmul.mubr.f32.vlgmr.msra.gmra.mrb[0].mxu1 %v1942_v55  ;;  %v3486_v55 = vld [vmem:[#allocation2 + $0xda] sm:$0xff] }
 0x11a   : > { %5339 = vmatmul.mubr.f32.gmra.mrb[16].mxu0 %v7224_v13  ;;  %5738 = vmatpush3.bf16.msra.mxu1 %v6206_v62  ;;  %v7244_v62 = vld [vmem:[#allocation2 + $0x139] sm:$0xff] }
 0x11b   : > { %4997 = vmatprep.mubr.f32.mxu1 %v6984_v33  ;;  %5341 = vmatprep.mubr.f32.mxu0 %v7226_v7  ;;  %v7452_v33 = vld [vmem:[#allocation7_spill] sm:$0xff] }
 0x11c   : > { %5731 = vmatprep.subr.bf16.mxu1 %v7451_v45 }
 0x11d   : > { %4998 = vmatmul.mubr.f32.gmra.mrb[2].mxu1 %v6997_v48  ;;  %v7251_v48 = vld [vmem:[#allocation2 + $0x141] sm:$0xff] }
 0x11e   : > { %5342 = vmatmul.mubr.f32.gmra.mrb[18].mxu0 %v7232_v5  ;;  %5000 = vmatprep.mubr.f32.mxu1 %v6999_v9  ;;  %v1949_v9 = vld [vmem:[#allocation2 + $0x78] sm:$0xff] }
 0x11f   : > { %5344 = vmatprep.mubr.f32.mxu0 %v7234_v3  ;;  %5739 = vmatpush3.bf16.msra.mxu1 %v7451_v45  ;;  %v6037_v45 = vld [vmem:[#allocation2 + $0x180] sm:$0xff] }
 0x120   : > { %5732 = vmatprep.subr.bf16.mxu1 %v7452_v33 }
 0x121   : > { %5001 = vmatmul.mubr.f32.gmra.mrb[4].mxu1 %v7453_v26  ;;  %v3488_v26 = vld [vmem:[#allocation2 + $0xf2] sm:$0xff] }
 0x122   : > { %5345 = vmatmul.mubr.f32.gmra.mrb[20].mxu0 %v7241_v16  ;;  %5003 = vmatprep.mubr.f32.mxu1 %v7454_v56  ;;  %v6038_v56 = vld [vmem:[#allocation2 + $0x188] sm:$0xff] }
 0x123   : > { %5347 = vmatprep.mubr.f32.mxu0 %v7244_v62  ;;  %5740 = vmatpush3.bf16.msra.mxu1 %v7452_v33  ;;  %v3487_v33 = vld [vmem:[#allocation2 + $0xe2] sm:$0xff] }
 0x124   : > { %5733 = vmatprep.subr.bf16.mxu1 %v7455_v42 }
 0x125   : > { %5004 = vmatmul.mubr.f32.gmra.mrb[6].mxu1 %v7027_v21  ;;  %v1952_v21 = vld [vmem:[#allocation2 + $0x98] sm:$0xff] }
 0x126   : > { %5348 = vmatmul.mubr.f32.gmra.mrb[22].mxu0 %v7251_v48  ;;  %5006 = vmatprep.mubr.f32.mxu1 %v1949_v9  ;;  %v3489_v9 = vld [vmem:[#allocation2 + $0xfa] sm:$0xff] }
 0x127   : > { %5350 = vmatprep.mubr.f32.mxu0 %v7254_v38  ;;  %5741 = vmatpush3.bf16.msra.mxu1 %v7455_v42  ;;  %v3490_v42 = vld [vmem:[#allocation2 + $0x10a] sm:$0xff] }
 0x128   : > { %5734 = vmatprep.subr.bf16.mxu1 %v7456_v43 }
 0x129   : > { %5007 = vmatmul.mubr.f32.gmra.mrb[8].mxu1 %v1950_v25  ;;  %v3491_v25 = vld [vmem:[#allocation2 + $0x112] sm:$0xff] }
 0x12a   : > { %5351 = vmatmul.mubr.f32.gmra.mrb[24].mxu0 %v7260_v1  ;;  %5009 = vmatprep.mubr.f32.mxu1 %v1951_v54  ;;  %v3492_v54 = vld [vmem:[#allocation2 + $0x122] sm:$0xff] }
 0x12b   : > { %5353 = vmatprep.mubr.f32.mxu0 %v7263_v60  ;;  %5742 = vmatpush3.bf16.msra.mxu1 %v7456_v43  ;;  %v3493_v43 = vld [vmem:[#allocation2 + $0x12a] sm:$0xff] }
 0x12c   : > { %5735 = vmatprep.subr.bf16.mxu1 %v7457_v2 }
 0x12d   : > { %5010 = vmatmul.mubr.f32.gmra.mrb[10].mxu1 %v1952_v21  ;;  %v3494_v21 = vld [vmem:[#allocation2 + $0x13a] sm:$0xff] }
 0x12e   : > { %5354 = vmatmul.mubr.f32.gmra.mrb[26].mxu0 %v7268_v11  ;;  %5012 = vmatprep.mubr.f32.mxu1 %v1953_v57 }
 0x12f   : > { %5356 = vmatprep.mubr.f32.mxu0 %v7271_v61  ;;  %5743 = vmatpush3.bf16.msra.mxu1 %v7457_v2 }
 0x130   : > { %5736 = vmatprep.subr.bf16.mxu1 %v7458_v53 }
 0x131   : > { %5013 = vmatmul.mubr.f32.gmra.mrb[12].mxu1 %v1954_v15 }
 0x132   : > { %5357 = vmatmul.mubr.f32.gmra.mrb[28].mxu0 %v7276_v19  ;;  %5015 = vmatprep.mubr.f32.mxu1 %v1955_v14 }
 0x133   : > { %5359 = vmatprep.mubr.f32.mxu0 %v3196_v29  ;;  %5744 = vmatpush3.bf16.msra.mxu1 %v7458_v53 }
 0x134   : > { %5737 = vmatprep.subr.bf16.mxu1 %v7459_v18 }
 0x135   : > { %5016 = vmatmul.mubr.f32.gmra.mrb[14].mxu1 %v1956_v17 }
 0x136   : > { %5360 = vmatmul.mubr.f32.gmra.mrb[30].mxu0 %v3197_v37  ;;  %5018 = vmatprep.mubr.f32.mxu1 %v1957_v51 }
 0x137   : > { %5394 = vmatprep.mubr.f32.mxu0 %v3472_v50  ;;  %5745 = vmatpush3.bf16.msra.mxu1 %v7459_v18  ;;  %v7315_v18 = vld [vmem:[%s7400_s3] ss:$0 sm:$0xff] }
 0x139   : > { %5019 = vmatmul.mubr.f32.gmra.mrb[16].mxu1 %v1958_v30 }
 0x13a   : > { %5395 = vmatmul.mubr.f32.vlgmr.msra.gmra.mrb[0].mxu0 %v3473_v46  ;;  %5021 = vmatprep.mubr.f32.mxu1 %v1959_v52 }
 0x13b   : > { %5397 = vmatprep.mubr.f32.mxu0 %v3474_v20 }
 0x13d   : > { %5022 = vmatmul.mubr.f32.gmra.mrb[18].mxu1 %v1960_v34 }
 0x13e   : > { %5398 = vmatmul.mubr.f32.gmra.mrb[2].mxu0 %v3475_v10  ;;  %5024 = vmatprep.mubr.f32.mxu1 %v1961_v44 }
 0x13f   : > { %5400 = vmatprep.mubr.f32.mxu0 %v3476_v40 }
 0x141   : > { %5025 = vmatmul.mubr.f32.gmra.mrb[20].mxu1 %v1962_v23 }
 0x142   : > { %5401 = vmatmul.mubr.f32.gmra.mrb[4].mxu0 %v3477_v24  ;;  %5027 = vmatprep.mubr.f32.mxu1 %v1963_v0 }
 0x143   : > { %5403 = vmatprep.mubr.f32.mxu0 %v3478_v12 }
 0x145   : > { %5028 = vmatmul.mubr.f32.gmra.mrb[22].mxu1 %v1964_v59 }
 0x146   : > { %5404 = vmatmul.mubr.f32.gmra.mrb[6].mxu0 %v3479_v36  ;;  %5030 = vmatprep.mubr.f32.mxu1 %v1965_v47 }
 0x147   : > { %5406 = vmatprep.mubr.f32.mxu0 %v3480_v28 }
 0x149   : > { %5031 = vmatmul.mubr.f32.gmra.mrb[24].mxu1 %v1966_v41 }
 0x14a   : > { %5407 = vmatmul.mubr.f32.gmra.mrb[8].mxu0 %v3481_v31  ;;  %5033 = vmatprep.mubr.f32.mxu1 %v1967_v35 }
 0x14b   : > { %5409 = vmatprep.mubr.f32.mxu0 %v3482_v39 }
 0x14d   : > { %5034 = vmatmul.mubr.f32.gmra.mrb[26].mxu1 %v1968_v32 }
 0x14e   : > { %5410 = vmatmul.mubr.f32.gmra.mrb[10].mxu0 %v3483_v49  ;;  %5036 = vmatprep.mubr.f32.mxu1 %v1969_v22 }
 0x14f   : > { %5412 = vmatprep.mubr.f32.mxu0 %v3484_v4 }
 0x151   : > { %5037 = vmatmul.mubr.f32.gmra.mrb[28].mxu1 %v1970_v8 }
 0x152   : > { %5413 = vmatmul.mubr.f32.gmra.mrb[12].mxu0 %v3485_v58  ;;  %5039 = vmatprep.mubr.f32.mxu1 %v6037_v45 }
 0x153   : > { %5415 = vmatprep.mubr.f32.mxu0 %v3486_v55 }
 0x155   : > { %5040 = vmatmul.mubr.f32.gmra.mrb[30].mxu1 %v6038_v56 }
 0x156   : > { %5416 = vmatmul.mubr.f32.gmra.mrb[14].mxu0 %v3487_v33  ;;  %5098 = vmatprep.mubr.f32.mxu1 %v7212_v63  ;;  %v3495_v63 = vld [vmem:[#allocation2 + $0x142] sm:$0xff] }
 0x157   : > { %5418 = vmatprep.mubr.f32.mxu0 %v3488_v26 }
 0x159   : > { %5099 = vmatmul.mubr.f32.vlgmr.msra.gmra.mrb[16].mxu1 %v7217_v27  ;;  %v3496_v27 = vld [vmem:[#allocation2 + $0x152] sm:$0xff] }
 0x15a   : > { %5419 = vmatmul.mubr.f32.gmra.mrb[16].mxu0 %v3489_v9  ;;  %5101 = vmatprep.mubr.f32.mxu1 %v7219_v6  ;;  %v3497_v6 = vld [vmem:[#allocation2 + $0x15a] sm:$0xff] }
 0x15b   : > { %5421 = vmatprep.mubr.f32.mxu0 %v3490_v42 }
 0x15d   : > { %5102 = vmatmul.mubr.f32.gmra.mrb[18].mxu1 %v7224_v13  ;;  %v3498_v13 = vld [vmem:[#allocation2 + $0x16a] sm:$0xff] }
 0x15e   : > { %5422 = vmatmul.mubr.f32.gmra.mrb[18].mxu0 %v3491_v25  ;;  %5104 = vmatprep.mubr.f32.mxu1 %v7226_v7  ;;  %v3499_v7 = vld [vmem:[#allocation2 + $0x172] sm:$0xff] }
 0x15f   : > { %5424 = vmatprep.mubr.f32.mxu0 %v3492_v54 }
 0x161   : > { %5105 = vmatmul.mubr.f32.gmra.mrb[20].mxu1 %v7232_v5  ;;  %v3500_v5 = vld [vmem:[#allocation2 + $0x182] sm:$0xff] }
 0x162   : > { %5425 = vmatmul.mubr.f32.gmra.mrb[20].mxu0 %v3493_v43  ;;  %5107 = vmatprep.mubr.f32.mxu1 %v7234_v3  ;;  %v3501_v3 = vld [vmem:[#allocation2 + $0x18a] sm:$0xff] }
 0x163   : > { %5427 = vmatprep.mubr.f32.mxu0 %v3494_v21 }
 0x165   : > { %5108 = vmatmul.mubr.f32.gmra.mrb[22].mxu1 %v7241_v16  ;;  %v3502_v16 = vld [vmem:[#allocation2 + $0x19a] sm:$0xff] }
 0x166   : > { %5428 = vmatmul.mubr.f32.gmra.mrb[22].mxu0 %v3495_v63  ;;  %5110 = vmatprep.mubr.f32.mxu1 %v7244_v62  ;;  %v3503_v62 = vld [vmem:[#allocation2 + $0x1a2] sm:$0xff] }
 0x167   : > { %5430 = vmatprep.mubr.f32.mxu0 %v3496_v27 }
 0x169   : > { %5111 = vmatmul.mubr.f32.gmra.mrb[24].mxu1 %v7251_v48 }
 0x16a   : > { %5431 = vmatmul.mubr.f32.gmra.mrb[24].mxu0 %v3497_v6  ;;  %5113 = vmatprep.mubr.f32.mxu1 %v7254_v38 }
 0x16b   : > { %5433 = vmatprep.mubr.f32.mxu0 %v3498_v13 }
 0x16d   : > { %5114 = vmatmul.mubr.f32.gmra.mrb[26].mxu1 %v7260_v1 }
 0x16e   : > { %5434 = vmatmul.mubr.f32.gmra.mrb[26].mxu0 %v3499_v7  ;;  %5116 = vmatprep.mubr.f32.mxu1 %v7263_v60 }
 0x16f   : > { %5436 = vmatprep.mubr.f32.mxu0 %v3500_v5 }
 0x171   : > { %5117 = vmatmul.mubr.f32.gmra.mrb[28].mxu1 %v7268_v11 }
 0x172   : > { %5437 = vmatmul.mubr.f32.gmra.mrb[28].mxu0 %v3501_v3  ;;  %5119 = vmatprep.mubr.f32.mxu1 %v7271_v61 }
 0x173   : > { %5439 = vmatprep.mubr.f32.mxu0 %v3502_v16 }
 0x175   : > { %5120 = vmatmul.mubr.f32.gmra.mrb[30].mxu1 %v7276_v19 }
 0x176   : > { %5440 = vmatmul.mubr.f32.gmra.mrb[30].mxu0 %v3503_v62 }
 0x1ec   : > { %v4996_v48 = vpop.f32.mrb[0].mxu1 }
 0x1ed   : > { %v2056_v38 = vpop.f32.mrb[1].mxu1 }
 0x1f0   : > { %v4999_v57 = vpop.f32.mrb[2].mxu1 }
 0x1f1   : > { %v2066_v1 = vpop.f32.mrb[3].mxu1 }
 0x1f4   : > { %v5002_v2 = vpop.f32.mrb[4].mxu1 }
 0x1f5   : > { %v2076_v15 = vpop.f32.mrb[5].mxu1 }
 0x1f8   : > { %v5005_v60 = vpop.f32.mrb[6].mxu1 }
 0x1f9   : > { %v2086_v14 = vpop.f32.mrb[7].mxu1 }
 0x1fc   : > { %v5008_v29 = vpop.f32.mrb[8].mxu1 }
 0x1fd   : > { %v2096_v53 = vpop.f32.mrb[9].mxu1 }
 0x200   : > { %v7300_v11 = vpop.f32.mrb[10].mxu1 }
 0x201   : > { %v7302_v17 = vpop.f32.mrb[11].mxu1 }
 0x204   : > { %v7304_v61 = vpop.f32.mrb[12].mxu1 }
 0x205   : > { %v7306_v19 = vpop.f32.mrb[13].mxu1 }
 0x208   : > { %v7308_v37 = vpop.f32.mrb[14].mxu1 }
 0x209   : > { %v7310_v51 = vpop.f32.mrb[15].mxu1 }
 0x20d   : > { %v5396_v50 = vpop.f32.mrb[0].mxu0 }
 0x20e   : > { %v5746_v30 = vadd.f32 %v5396_v50, %v4996_v48  ;;  %v3587_v46 = vpop.f32.mrb[1].mxu0 }
 0x20f   : > { %v5747_v52 = vadd.f32 %v3587_v46, %v2056_v38 }
 0x210   : > { %v3786_v20 = vadd.f32 %v5746_v30, %v7315_v18 }
 0x211   : > { %v3785_v34 = vadd.f32 %v5747_v52, %v7315_v18  ;;  %v5399_v10 = vpop.f32.mrb[2].mxu0 }
 0x212   : > { %3818 = vst [vmem:[%s6130_s9 + $0x8] sm:$0xff] %v3786_v20  ;;  %v3887_v44 = vmul.f32 %v3786_v20, %v3786_v20  ;;  %v5748_v40 = vadd.f32 %v5399_v10, %v4999_v57  ;;  %v3597_v23 = vpop.f32.mrb[3].mxu0 }
 0x213   : > { %3817 = vst [vmem:[%s6130_s9] sm:$0xff] %v3785_v34  ;;  %v3849_v24 = vadd.f32 %v3786_v20, %v3785_v34  ;;  %v3886_v0 = vmul.f32 %v3785_v34, %v3785_v34  ;;  %v5749_v12 = vadd.f32 %v3597_v23, %v2066_v1 }
 0x214   : > { %v3788_v59 = vadd.f32 %v5748_v40, %v7315_v18 }
 0x215   : > { %v3918_v36 = vadd.f32 %v3887_v44, %v3886_v0  ;;  %v3787_v47 = vadd.f32 %v5749_v12, %v7315_v18  ;;  %v5402_v28 = vpop.f32.mrb[4].mxu0 }
 0x216   : > { %3820 = vst [vmem:[%s6130_s9 + $0x18] sm:$0xff] %v3788_v59  ;;  %v5750_v41 = vadd.f32 %v5402_v28, %v5002_v2  ;;  %v3607_v31 = vpop.f32.mrb[5].mxu0  ;;  %v3889_v22 = vmul.f32 %v3788_v59, %v3788_v59 }
 0x217   : > { %3819 = vst [vmem:[%s6130_s9 + $0x10] sm:$0xff] %v3787_v47  ;;  %v3850_v35 = vadd.f32 %v3849_v24, %v3787_v47  ;;  %v3888_v39 = vmul.f32 %v3787_v47, %v3787_v47  ;;  %v5751_v32 = vadd.f32 %v3607_v31, %v2076_v15 }
 0x218   : > { %v3790_v49 = vadd.f32 %v5750_v41, %v7315_v18 }
 0x219   : > { %v3919_v4 = vadd.f32 %v3918_v36, %v3888_v39  ;;  %v3789_v8 = vadd.f32 %v5751_v32, %v7315_v18  ;;  %v3851_v58 = vadd.f32 %v3850_v35, %v3788_v59  ;;  %v5405_v55 = vpop.f32.mrb[6].mxu0 }
 0x21a   : > { %3822 = vst [vmem:[%s6130_s9 + $0x28] sm:$0xff] %v3790_v49  ;;  %v5752_v45 = vadd.f32 %v5405_v55, %v5005_v60  ;;  %v3617_v33 = vpop.f32.mrb[7].mxu0  ;;  %v3891_v54 = vmul.f32 %v3790_v49, %v3790_v49 }
 0x21b   : > { %3821 = vst [vmem:[%s6130_s9 + $0x20] sm:$0xff] %v3789_v8  ;;  %v3852_v26 = vadd.f32 %v3851_v58, %v3789_v8  ;;  %v3890_v56 = vmul.f32 %v3789_v8, %v3789_v8  ;;  %v3920_v9 = vadd.f32 %v3919_v4, %v3889_v22  ;;  %v5753_v42 = vadd.f32 %v3617_v33, %v2086_v14 }
 0x21c   : > { %v3792_v25 = vadd.f32 %v5752_v45, %v7315_v18 }
 0x21d   : > { %v3921_v43 = vadd.f32 %v3920_v9, %v3890_v56  ;;  %v3791_v21 = vadd.f32 %v5753_v42, %v7315_v18  ;;  %v3853_v63 = vadd.f32 %v3852_v26, %v3790_v49  ;;  %v5408_v27 = vpop.f32.mrb[8].mxu0 }
 0x21e   : > { %3824 = vst [vmem:[%s6130_s9 + $0x38] sm:$0xff] %v3792_v25  ;;  %v5754_v6 = vadd.f32 %v5408_v27, %v5008_v29  ;;  %v3627_v13 = vpop.f32.mrb[9].mxu0  ;;  %v3893_v48 = vmul.f32 %v3792_v25, %v3792_v25 }
 0x21f   : > { %3823 = vst [vmem:[%s6130_s9 + $0x30] sm:$0xff] %v3791_v21  ;;  %v3854_v7 = vadd.f32 %v3853_v63, %v3791_v21  ;;  %v3892_v5 = vmul.f32 %v3791_v21, %v3791_v21  ;;  %v3922_v3 = vadd.f32 %v3921_v43, %v3891_v54  ;;  %v5755_v16 = vadd.f32 %v3627_v13, %v2096_v53 }
 0x220   : > { %v3794_v62 = vadd.f32 %v5754_v6, %v7315_v18 }
 0x221   : > { %v3923_v38 = vadd.f32 %v3922_v3, %v3892_v5  ;;  %v3793_v57 = vadd.f32 %v5755_v16, %v7315_v18  ;;  %v3855_v1 = vadd.f32 %v3854_v7, %v3792_v25  ;;  %v5411_v2 = vpop.f32.mrb[10].mxu0 }
 0x222   : > { %3826 = vst [vmem:[%s6130_s9 + $0x48] sm:$0xff] %v3794_v62  ;;  %v5756_v15 = vadd.f32 %v5411_v2, %v7300_v11  ;;  %v3637_v60 = vpop.f32.mrb[11].mxu0  ;;  %v3895_v46 = vmul.f32 %v3794_v62, %v3794_v62 }
 0x223   : > { %3825 = vst [vmem:[%s6130_s9 + $0x40] sm:$0xff] %v3793_v57  ;;  %v3856_v14 = vadd.f32 %v3855_v1, %v3793_v57  ;;  %v3894_v29 = vmul.f32 %v3793_v57, %v3793_v57  ;;  %v3924_v50 = vadd.f32 %v3923_v38, %v3893_v48  ;;  %v5757_v53 = vadd.f32 %v3637_v60, %v7302_v17 }
 0x224   : > { %v3796_v30 = vadd.f32 %v5756_v15, %v7315_v18 }
 0x225   : > { %v3925_v52 = vadd.f32 %v3924_v50, %v3894_v29  ;;  %v3795_v20 = vadd.f32 %v5757_v53, %v7315_v18  ;;  %v3857_v34 = vadd.f32 %v3856_v14, %v3794_v62  ;;  %v5414_v10 = vpop.f32.mrb[12].mxu0 }
 0x226   : > { %3828 = vst [vmem:[%s6130_s9 + $0x58] sm:$0xff] %v3796_v30  ;;  %v5758_v11 = vadd.f32 %v5414_v10, %v7304_v61  ;;  %v3647_v44 = vpop.f32.mrb[13].mxu0  ;;  %v3897_v12 = vmul.f32 %v3796_v30, %v3796_v30 }
 0x227   : > { %3827 = vst [vmem:[%s6130_s9 + $0x50] sm:$0xff] %v3795_v20  ;;  %v3858_v40 = vadd.f32 %v3857_v34, %v3795_v20  ;;  %v3896_v23 = vmul.f32 %v3795_v20, %v3795_v20  ;;  %v3926_v24 = vadd.f32 %v3925_v52, %v3895_v46  ;;  %v5759_v17 = vadd.f32 %v3647_v44, %v7306_v19 }
 0x228   : > { %v3798_v0 = vadd.f32 %v5758_v11, %v7315_v18 }
 0x229   : > { %v3927_v59 = vadd.f32 %v3926_v24, %v3896_v23  ;;  %v3797_v36 = vadd.f32 %v5759_v17, %v7315_v18  ;;  %v3859_v47 = vadd.f32 %v3858_v40, %v3796_v30  ;;  %v5417_v28 = vpop.f32.mrb[14].mxu0 }
 0x22a   : > { %3830 = vst [vmem:[%s6130_s9 + $0x68] sm:$0xff] %v3798_v0  ;;  %v5760_v61 = vadd.f32 %v5417_v28, %v7308_v37  ;;  %v3657_v41 = vpop.f32.mrb[15].mxu0  ;;  %v3899_v22 = vmul.f32 %v3798_v0, %v3798_v0 }
 0x22b   : > { %3829 = vst [vmem:[%s6130_s9 + $0x60] sm:$0xff] %v3797_v36  ;;  %v3860_v31 = vadd.f32 %v3859_v47, %v3797_v36  ;;  %v3898_v35 = vmul.f32 %v3797_v36, %v3797_v36  ;;  %v3928_v39 = vadd.f32 %v3927_v59, %v3897_v12  ;;  %v5761_v19 = vadd.f32 %v3657_v41, %v7310_v51 }
 0x22c   : > { %v3800_v32 = vadd.f32 %v5760_v61, %v7315_v18  ;;  %v5100_v49 = vpop.f32.mrb[16].mxu1 }
 0x22d   : > { %v3929_v4 = vadd.f32 %v3928_v39, %v3898_v35  ;;  %v3799_v8 = vadd.f32 %v5761_v19, %v7315_v18  ;;  %v3861_v58 = vadd.f32 %v3860_v31, %v3798_v0  ;;  %v5420_v55 = vpop.f32.mrb[16].mxu0  ;;  %v2442_v45 = vpop.f32.mrb[17].mxu1 }
 0x22e   : > { %3832 = vst [vmem:[%s6130_s9 + $0x78] sm:$0xff] %v3800_v32  ;;  %v5762_v37 = vadd.f32 %v5420_v55, %v5100_v49  ;;  %v3667_v33 = vpop.f32.mrb[17].mxu0  ;;  %v3901_v54 = vmul.f32 %v3800_v32, %v3800_v32 }
 0x22f   : > { %3831 = vst [vmem:[%s6130_s9 + $0x70] sm:$0xff] %v3799_v8  ;;  %v3862_v26 = vadd.f32 %v3861_v58, %v3799_v8  ;;  %v3900_v56 = vmul.f32 %v3799_v8, %v3799_v8  ;;  %v3930_v9 = vadd.f32 %v3929_v4, %v3899_v22  ;;  %v5763_v51 = vadd.f32 %v3667_v33, %v2442_v45 }
 0x230   : > { %v3802_v42 = vadd.f32 %v5762_v37, %v7315_v18  ;;  %v5103_v25 = vpop.f32.mrb[18].mxu1 }
 0x231   : > { %v3931_v43 = vadd.f32 %v3930_v9, %v3900_v56  ;;  %v3801_v21 = vadd.f32 %v5763_v51, %v7315_v18  ;;  %v3863_v63 = vadd.f32 %v3862_v26, %v3800_v32  ;;  %v5423_v27 = vpop.f32.mrb[18].mxu0  ;;  %v2452_v6 = vpop.f32.mrb[19].mxu1 }
 0x232   : > { %3834 = vst [vmem:[%s6130_s9 + $0x88] sm:$0xff] %v3802_v42  ;;  %v5764_v13 = vadd.f32 %v5423_v27, %v5103_v25  ;;  %v3677_v7 = vpop.f32.mrb[19].mxu0  ;;  %v3903_v57 = vmul.f32 %v3802_v42, %v3802_v42 }
 0x233   : > { %3833 = vst [vmem:[%s6130_s9 + $0x80] sm:$0xff] %v3801_v21  ;;  %v3864_v5 = vadd.f32 %v3863_v63, %v3801_v21  ;;  %v3902_v3 = vmul.f32 %v3801_v21, %v3801_v21  ;;  %v3932_v16 = vadd.f32 %v3931_v43, %v3901_v54  ;;  %v5765_v62 = vadd.f32 %v3677_v7, %v2452_v6 }
 0x234   : > { %v3804_v48 = vadd.f32 %v5764_v13, %v7315_v18  ;;  %v5106_v38 = vpop.f32.mrb[20].mxu1 }
 0x235   : > { %v3933_v1 = vadd.f32 %v3932_v16, %v3902_v3  ;;  %v3803_v2 = vadd.f32 %v5765_v62, %v7315_v18  ;;  %v3865_v15 = vadd.f32 %v3864_v5, %v3802_v42  ;;  %v5426_v60 = vpop.f32.mrb[20].mxu0  ;;  %v2462_v14 = vpop.f32.mrb[21].mxu1 }
 0x236   : > { %3836 = vst [vmem:[%s6130_s9 + $0x98] sm:$0xff] %v3804_v48  ;;  %v5766_v29 = vadd.f32 %v5426_v60, %v5106_v38  ;;  %v3687_v50 = vpop.f32.mrb[21].mxu0  ;;  %v3905_v10 = vmul.f32 %v3804_v48, %v3804_v48 }
 0x237   : > { %3835 = vst [vmem:[%s6130_s9 + $0x90] sm:$0xff] %v3803_v2  ;;  %v3866_v53 = vadd.f32 %v3865_v15, %v3803_v2  ;;  %v3904_v30 = vmul.f32 %v3803_v2, %v3803_v2  ;;  %v3934_v46 = vadd.f32 %v3933_v1, %v3903_v57  ;;  %v5767_v52 = vadd.f32 %v3687_v50, %v2462_v14 }
 0x238   : > { %v3806_v20 = vadd.f32 %v5766_v29, %v7315_v18  ;;  %v5109_v34 = vpop.f32.mrb[22].mxu1 }
 0x239   : > { %v3935_v11 = vadd.f32 %v3934_v46, %v3904_v30  ;;  %v3805_v44 = vadd.f32 %v5767_v52, %v7315_v18  ;;  %v3867_v40 = vadd.f32 %v3866_v53, %v3804_v48  ;;  %v5429_v23 = vpop.f32.mrb[22].mxu0  ;;  %v2472_v24 = vpop.f32.mrb[23].mxu1 }
 0x23a   : > { %3838 = vst [vmem:[%s6130_s9 + $0xa8] sm:$0xff] %v3806_v20  ;;  %v5768_v17 = vadd.f32 %v5429_v23, %v5109_v34  ;;  %v3697_v0 = vpop.f32.mrb[23].mxu0  ;;  %v3907_v41 = vmul.f32 %v3806_v20, %v3806_v20 }
 0x23b   : > { %3837 = vst [vmem:[%s6130_s9 + $0xa0] sm:$0xff] %v3805_v44  ;;  %v3868_v12 = vadd.f32 %v3867_v40, %v3805_v44  ;;  %v3906_v59 = vmul.f32 %v3805_v44, %v3805_v44  ;;  %v3936_v36 = vadd.f32 %v3935_v11, %v3905_v10  ;;  %v5769_v47 = vadd.f32 %v3697_v0, %v2472_v24 }
 0x23c   : > { %v3808_v28 = vadd.f32 %v5768_v17, %v7315_v18  ;;  %v5112_v61 = vpop.f32.mrb[24].mxu1 }
 0x23d   : > { %v3937_v31 = vadd.f32 %v3936_v36, %v3906_v59  ;;  %v3807_v35 = vadd.f32 %v5769_v47, %v7315_v18  ;;  %v3869_v39 = vadd.f32 %v3868_v12, %v3806_v20  ;;  %v5432_v19 = vpop.f32.mrb[24].mxu0  ;;  %v2482_v32 = vpop.f32.mrb[25].mxu1 }
 0x23e   : > { %3840 = vst [vmem:[%s6130_s9 + $0xb8] sm:$0xff] %v3808_v28  ;;  %v5770_v49 = vadd.f32 %v5432_v19, %v5112_v61  ;;  %v3707_v22 = vpop.f32.mrb[25].mxu0  ;;  %v3909_v33 = vmul.f32 %v3808_v28, %v3808_v28 }
 0x23f   : > { %3839 = vst [vmem:[%s6130_s9 + $0xb0] sm:$0xff] %v3807_v35  ;;  %v3870_v4 = vadd.f32 %v3869_v39, %v3807_v35  ;;  %v3908_v8 = vmul.f32 %v3807_v35, %v3807_v35  ;;  %v3938_v58 = vadd.f32 %v3937_v31, %v3907_v41  ;;  %v5771_v55 = vadd.f32 %v3707_v22, %v2482_v32 }
 0x240   : > { %v3810_v45 = vadd.f32 %v5770_v49, %v7315_v18  ;;  %v5115_v37 = vpop.f32.mrb[26].mxu1 }
 0x241   : > { %v3939_v26 = vadd.f32 %v3938_v58, %v3908_v8  ;;  %v3809_v56 = vadd.f32 %v5771_v55, %v7315_v18  ;;  %v3871_v9 = vadd.f32 %v3870_v4, %v3808_v28  ;;  %v5435_v51 = vpop.f32.mrb[26].mxu0  ;;  %v2492_v42 = vpop.f32.mrb[27].mxu1 }
 0x242   : > { %3842 = vst [vmem:[%s6130_s9 + $0xc8] sm:$0xff] %v3810_v45  ;;  %v5772_v25 = vadd.f32 %v5435_v51, %v5115_v37  ;;  %v3717_v54 = vpop.f32.mrb[27].mxu0  ;;  %v3911_v7 = vmul.f32 %v3810_v45, %v3810_v45 }
 0x243   : > { %3841 = vst [vmem:[%s6130_s9 + $0xc0] sm:$0xff] %v3809_v56  ;;  %v3872_v43 = vadd.f32 %v3871_v9, %v3809_v56  ;;  %v3910_v21 = vmul.f32 %v3809_v56, %v3809_v56  ;;  %v3940_v63 = vadd.f32 %v3939_v26, %v3909_v33  ;;  %v5773_v27 = vadd.f32 %v3717_v54, %v2492_v42 }
 0x244   : > { %v3812_v6 = vadd.f32 %v5772_v25, %v7315_v18  ;;  %v5118_v13 = vpop.f32.mrb[28].mxu1 }
 0x245   : > { %v3941_v5 = vadd.f32 %v3940_v63, %v3910_v21  ;;  %v3811_v3 = vadd.f32 %v5773_v27, %v7315_v18  ;;  %v3873_v16 = vadd.f32 %v3872_v43, %v3810_v45  ;;  %v5438_v62 = vpop.f32.mrb[28].mxu0  ;;  %v2502_v48 = vpop.f32.mrb[29].mxu1 }
 0x246   : > { %3844 = vst [vmem:[%s6130_s9 + $0xd8] sm:$0xff] %v3812_v6  ;;  %v5774_v38 = vadd.f32 %v5438_v62, %v5118_v13  ;;  %v3727_v57 = vpop.f32.mrb[29].mxu0  ;;  %v3913_v50 = vmul.f32 %v3812_v6, %v3812_v6 }
 0x247   : > { %3843 = vst [vmem:[%s6130_s9 + $0xd0] sm:$0xff] %v3811_v3  ;;  %v3874_v1 = vadd.f32 %v3873_v16, %v3811_v3  ;;  %v3912_v2 = vmul.f32 %v3811_v3, %v3811_v3  ;;  %v3942_v15 = vadd.f32 %v3941_v5, %v3911_v7  ;;  %v5775_v60 = vadd.f32 %v3727_v57, %v2502_v48 }
 0x248   : > { %v3814_v14 = vadd.f32 %v5774_v38, %v7315_v18  ;;  %v5121_v29 = vpop.f32.mrb[30].mxu1 }
 0x249   : > { %v3943_v53 = vadd.f32 %v3942_v15, %v3912_v2  ;;  %v3813_v30 = vadd.f32 %v5775_v60, %v7315_v18  ;;  %v3875_v46 = vadd.f32 %v3874_v1, %v3812_v6  ;;  %v5441_v52 = vpop.f32.mrb[30].mxu0  ;;  %v2512_v20 = vpop.f32.mrb[31].mxu1 }
 0x24a   : > { %3846 = vst [vmem:[%s6130_s9 + $0xe8] sm:$0xff] %v3814_v14  ;;  %v5776_v34 = vadd.f32 %v5441_v52, %v5121_v29  ;;  %v3737_v10 = vpop.f32.mrb[31].mxu0  ;;  %v3915_v17 = vmul.f32 %v3814_v14, %v3814_v14 }
 0x24b   : > { %3845 = vst [vmem:[%s6130_s9 + $0xe0] sm:$0xff] %v3813_v30  ;;  %v3876_v11 = vadd.f32 %v3875_v46, %v3813_v30  ;;  %v3914_v44 = vmul.f32 %v3813_v30, %v3813_v30  ;;  %v3944_v40 = vadd.f32 %v3943_v53, %v3913_v50  ;;  %v5777_v23 = vadd.f32 %v3737_v10, %v2512_v20 }
 0x24c   : > { %v3816_v24 = vadd.f32 %v5776_v34, %v7315_v18 }
 0x24d   : > { %v3945_v0 = vadd.f32 %v3944_v40, %v3914_v44  ;;  %v3815_v12 = vadd.f32 %v5777_v23, %v7315_v18  ;;  %v3877_v59 = vadd.f32 %v3876_v11, %v3814_v14 }
 0x24e   : > { %3848 = vst [vmem:[%s6130_s9 + $0xf8] sm:$0xff] %v3816_v24  ;;  %v3917_v61 = vmul.f32 %v3816_v24, %v3816_v24 }
 0x24f   : > { %3847 = vst [vmem:[%s6130_s9 + $0xf0] sm:$0xff] %v3815_v12  ;;  %v3878_v36 = vadd.f32 %v3877_v59, %v3815_v12  ;;  %v3916_v47 = vmul.f32 %v3815_v12, %v3815_v12  ;;  %v3946_v28 = vadd.f32 %v3945_v0, %v3915_v17 }
 0x251   : > { %v3879_v41 = vadd.f32 %v3878_v36, %v3816_v24  ;;  %v3947_v31 = vadd.f32 %v3946_v28, %v3916_v47 }
 0x253   : > { %v3880_v35 = vrot.slane %v3879_v41, 4  ;;  %v3948_v39 = vadd.f32 %v3947_v31, %v3917_v61 }
 0x255   : > { %v3881_v19 = vadd.f32 %v3880_v35, %v3879_v41  ;;  %v3949_v32 = vrot.slane %v3948_v39, 4 }
 0x257   : > { %v3882_v49 = vrot.slane %v3881_v19, 2  ;;  %v3950_v22 = vadd.f32 %v3949_v32, %v3948_v39 }
 0x259   : > { %v3883_v4 = vadd.f32 %v3882_v49, %v3881_v19  ;;  %v3951_v8 = vrot.slane %v3950_v22, 2 }
 0x25b   : > { %v3884_v58 = vrot.slane %v3883_v4, 1  ;;  %v3952_v18 = vadd.f32 %v3951_v8, %v3950_v22 }
 0x25d   : > { %v3953_v55 = vrot.slane %v3952_v18, 1  ;;  %v3885_v45 = vadd.f32 %v3884_v58, %v3883_v4 }
 0x25f   : > { %v3954_v37 = vadd.f32 %v3953_v55, %v3952_v18 }
 0x261   : > { %v3956_v33 = vsel %vm3955_vm2, %v3885_v45, %v3954_v37 }
 0x262   : > { %3957 = vst [vmem:[%s6135_s12] sm:$0x3] %v3956_v33 }
 0x263 PF: > { %s17_s23 = sadd.s32 1, %s6063_s23   ;;  %s7460_s21 = smov %s6059_s22 }
 0x264   : > { %p14_p5 = scmp.ge.s32.totalorder %s17_s23, 4   ;;  %s7461_s22 = smov %s7463_s24 }
 0x266   :  { %16 = sbr.rel (!%p14_p5) target bundleno = 2 (0x2), region = 137 }
 0x26d   :  { %4010 = vsyncmov [#allocation3] }
 0x270   :  { %s4011_s9 = vpop.sfrf %4010 }
 0x271   :  { %p4288_p6 = scmp.ne.s32.totalorder %s4011_s9, 0 }
 0x273   :  { %4015 = shalt.err (%p4288_p6)  }

</bundles_post_ra>
